<compile_context>
chip_gen: v7x
topology: tpu7x:2x2x1
jax: 0.10.0
libtpu: 0.0.40
codegen_flags: <defaults>
</compile_context>

<pallas_src>
import functools
import math

import jax
import jax.numpy as jnp
import numpy as np
from jax.experimental import pallas as pl
from jax.experimental.pallas import tpu as pltpu

D = 2          # state dimension of the inverted pendulum
ZETA = 200     # hidden width (zeta in the module)
ZETA_PAD = 256 # hidden width padded to a multiple of 128 for clean MXU tiles
F = D + 3      # MLP input features: [cos(tau), sin(tau), y1, y2, h]
F_PAD = 8      # padded feature count (sublane multiple)
N_GL = 10      # Gauss-Legendre points used in the Integral_Euler branch
LANE = 128


def _nn_kernel(y_ref, tau_ref, eps_ref, h_ref,
               w1t_ref, b1_ref, w2t_ref, b2_ref, w3t_ref, b3_ref,
               out_ref, *, gl_nodes, gl_weights):
    # Lane-dense layout: samples along the last (lane) axis.
    y1 = y_ref[0:1, :]                       # (1, Kb)
    y2 = y_ref[1:2, :]                       # (1, Kb)
    tau = tau_ref[...]                       # (1, Kb)
    eps = eps_ref[...]                       # (1, Kb)
    h = h_ref[...]                           # (1, Kb)

    sin_y1 = jnp.sin(y1)
    cos_y1 = jnp.cos(y1)
    sin_2y1 = jnp.sin(2.0 * y1)
    cosy1_y2 = cos_y1 * y2                   # loop-invariant

    # f_avg_NN for I_Pendulum: [y2, sin(y1) - 1/4 sin(2 y1)]
    avg0 = y2
    avg1 = sin_y1 - 0.25 * sin_2y1

    two_pi = 2.0 * math.pi
    tau0 = tau + jnp.round(h / (two_pi * eps)) * two_pi
    tau1 = tau + h / eps
    half = 0.5 * (tau1 - tau0)
    mid = 0.5 * (tau0 + tau1)
    eps_half = eps * half                    # loop-invariant

    # 10-point Gauss-Legendre quadrature of eps * (f_NN(eps*xi, y) - f_avg_NN(y)).
    # f_NN is evaluated at t = eps*xi, so every sin(t/eps) == sin(xi).
    xr0 = jnp.zeros_like(y1)
    xr1 = jnp.zeros_like(y1)
    for ksi, w in zip(gl_nodes, gl_weights):
        xi = half * ksi + mid                # (1, Kb)
        s = jnp.sin(xi)
        coef = eps_half * w
        xr0 = xr0 + coef * (s * sin_y1)                                  # f0 - avg0
        xr1 = xr1 + coef * ((0.25 - 0.5 * (s * s)) * sin_2y1 - s * cosy1_y2)  # f1 - avg1

    # MLP residual, lane-dense: feature slab (F_PAD, Kb), hidden (ZETA_PAD, Kb).
    zrow = jnp.zeros_like(tau)
    xrf = jnp.concatenate(
        [jnp.cos(tau), jnp.sin(tau), y1, y2, h, zrow, zrow, zrow], axis=0)  # (8, Kb)

    hdn = jnp.tanh(jnp.dot(w1t_ref[...], xrf,
                           preferred_element_type=jnp.float32) + b1_ref[...])
    hdn = jnp.tanh(jnp.dot(w2t_ref[...], hdn,
                           preferred_element_type=jnp.float32) + b2_ref[...])
    mlp = jnp.dot(w3t_ref[...], hdn,
                  preferred_element_type=jnp.float32) + b3_ref[...]        # (D, Kb)

    h2 = h * h
    row0 = h * avg0 + xr0 + h2 * mlp[0:1, :]
    row1 = h * avg1 + xr1 + h2 * mlp[1:2, :]
    out_ref[...] = jnp.concatenate([row0, row1], axis=0)                   # (D, Kb)


def _pad_params(params):
    """Transpose + zero-pad the MLP weights to (ZETA_PAD, F_PAD / ZETA_PAD) tiles."""
    W1, b1, W2, b2, W3, b3 = [jnp.asarray(p, jnp.float32) for p in params]
    w1t = jnp.zeros((ZETA_PAD, F_PAD), jnp.float32).at[:ZETA, :F].set(W1.T)
    b1p = jnp.zeros((ZETA_PAD, 1), jnp.float32).at[:ZETA, :].set(b1.T)
    w2t = jnp.zeros((ZETA_PAD, ZETA_PAD), jnp.float32).at[:ZETA, :ZETA].set(W2.T)
    b2p = jnp.zeros((ZETA_PAD, 1), jnp.float32).at[:ZETA, :].set(b2.T)
    w3t = jnp.zeros((D, ZETA_PAD), jnp.float32).at[:, :ZETA].set(W3.T)
    b3p = b3.reshape(D, 1)
    return w1t, b1p, w2t, b2p, w3t, b3p


def nn_forward(tau, x, eps, h, params, block_k=512):
    """Pallas version of NN.forward (Integral_Euler branch).

    x: (D, K); tau/eps/h: (1, K).  Returns (D, K), matching the PyTorch layout.
    """
    x = jnp.asarray(x, jnp.float32)
    tau = jnp.asarray(tau, jnp.float32)
    eps = jnp.asarray(eps, jnp.float32)
    h = jnp.asarray(h, jnp.float32)
    K = x.shape[1]

    # Pick a lane block (multiple of 128) and pad K up to a multiple of it.
    k_pad = -(-K // LANE) * LANE
    kb = min(int(block_k), k_pad)
    k_pad = -(-k_pad // kb) * kb
    if k_pad != K:
        pad = k_pad - K
        x = jnp.pad(x, ((0, 0), (0, pad)))
        tau = jnp.pad(tau, ((0, 0), (0, pad)))
        eps = jnp.pad(eps, ((0, 0), (0, pad)), constant_values=1.0)  # avoid 0/0
        h = jnp.pad(h, ((0, 0), (0, pad)))

    w1t, b1p, w2t, b2p, w3t, b3p = _pad_params(params)

    nodes, weights = np.polynomial.legendre.leggauss(N_GL)
    kernel = functools.partial(
        _nn_kernel,
        gl_nodes=tuple(float(v) for v in nodes),
        gl_weights=tuple(float(v) for v in weights),
    )

    out = pl.pallas_call(
        kernel,
        out_shape=jax.ShapeDtypeStruct((D, k_pad), jnp.float32),
        grid=(k_pad // kb,),
        in_specs=[
            pl.BlockSpec((D, kb), lambda i: (0, i)),            # x  (D, K)
            pl.BlockSpec((1, kb), lambda i: (0, i)),            # tau
            pl.BlockSpec((1, kb), lambda i: (0, i)),            # eps
            pl.BlockSpec((1, kb), lambda i: (0, i)),            # h
            pl.BlockSpec((ZETA_PAD, F_PAD), lambda i: (0, 0)),  # W1^T (resident)
            pl.BlockSpec((ZETA_PAD, 1), lambda i: (0, 0)),      # b1
            pl.BlockSpec((ZETA_PAD, ZETA_PAD), lambda i: (0, 0)),  # W2^T
            pl.BlockSpec((ZETA_PAD, 1), lambda i: (0, 0)),      # b2
            pl.BlockSpec((D, ZETA_PAD), lambda i: (0, 0)),      # W3^T
            pl.BlockSpec((D, 1), lambda i: (0, 0)),             # b3
        ],
        out_specs=pl.BlockSpec((D, kb), lambda i: (0, i)),
        compiler_params=pltpu.CompilerParams(
            dimension_semantics=("parallel",),
            vmem_limit_bytes=64 * 1024 * 1024,
        ),
    )(x, tau, eps, h, w1t, b1p, w2t, b2p, w3t, b3p)
    return out[:, :K]


def nn_forward_ref(tau, x, eps, h, params):
    """Pure-JAX reference (mirrors the PyTorch forward) for correctness checking."""
    W1, b1, W2, b2, W3, b3 = params
    y = jnp.asarray(x, jnp.float32).T
    tau = jnp.asarray(tau, jnp.float32).T
    eps = jnp.asarray(eps, jnp.float32).T
    h = jnp.asarray(h, jnp.float32).T
    y1, y2 = y[:, 0:1], y[:, 1:2]
    x0_avg = jnp.concatenate([y2, jnp.sin(y1) - 0.25 * jnp.sin(2 * y1)], axis=1)
    nodes, weights = np.polynomial.legendre.leggauss(N_GL)
    two_pi = 2.0 * math.pi
    tau0 = tau + jnp.round(h / (two_pi * eps)) * two_pi
    tau1 = tau + h / eps
    x_r = jnp.zeros_like(x0_avg)
    for ksi, w in zip(nodes, weights):
        xi = (tau1 - tau0) / 2 * ksi + (tau0 + tau1) / 2
        s = jnp.sin(xi)
        f0 = y2 + s * jnp.sin(y1)
        f1 = jnp.sin(y1) - 0.5 * s * s * jnp.sin(2 * y1) - s * jnp.cos(y1) * y2
        fnn = jnp.concatenate([f0, f1], axis=1)
        x_r = x_r + eps * float(w) * (tau1 - tau0) / 2 * (fnn - x0_avg)
    xrf = jnp.concatenate([jnp.cos(tau), jnp.sin(tau), y, h], axis=1)
    hdn = jnp.tanh(xrf @ W1 + b1)
    hdn = jnp.tanh(hdn @ W2 + b2)
    mlp = hdn @ W3 + b3
    return (h * x0_avg + x_r + h * h * mlp).T


if __name__ == "__main__":
    K = 256  # number of samples (columns of x) — small demo size
    key = jax.random.PRNGKey(0)
    k1, k2, k3, kp = jax.random.split(key, 4)

    # Inputs consistent with the data-generation code: y0 in [-R, R]^d with R=2,
    # tau in [0, 2*pi], h log-uniform in [1e-3, 1e-1], eps = eps_simul = 0.1.
    x = jax.random.uniform(k1, (D, K), jnp.float32, -2.0, 2.0)
    tau = jax.random.uniform(k2, (1, K), jnp.float32, 0.0, 2.0 * math.pi)
    h = jnp.exp(jax.random.uniform(k3, (1, K), jnp.float32,
                                   math.log(0.001), math.log(0.1)))
    eps = jnp.full((1, K), 0.1, jnp.float32)

    # Deterministic parameter init (PyTorch Linear-style uniform bounds).
    def init_linear(key, fan_in, fan_out):
        bound = 1.0 / math.sqrt(fan_in)
        kw, kb = jax.random.split(key)
        W = jax.random.uniform(kw, (fan_in, fan_out), jnp.float32, -bound, bound)
        b = jax.random.uniform(kb, (1, fan_out), jnp.float32, -bound, bound)
        return W, b

    kps = jax.random.split(kp, 3)
    W1, b1 = init_linear(kps[0], D + 3, ZETA)
    W2, b2 = init_linear(kps[1], ZETA, ZETA)
    W3, b3 = init_linear(kps[2], ZETA, D)
    params = (W1, b1, W2, b2, W3, b3)

    # block_k=128 exercises a multi-step "parallel" grid even at this small K.
    out = jax.block_until_ready(nn_forward(tau, x, eps, h, params, block_k=128))
    ref = jax.block_until_ready(nn_forward_ref(tau, x, eps, h, params))
    assert out.shape == (D, K), out.shape
    assert jnp.allclose(out, ref, atol=1e-4, rtol=1e-4), \
        float(jnp.max(jnp.abs(out - ref)))
    print("KERNEL_OK")
</pallas_src>

<mosaic_0001>
module attributes {stable_mosaic.version = 11 : i64} {
  func.func @_nn_kernel(%arg0: i32, %arg1: memref<2x128xf32, #tpu.memory_space<vmem>>, %arg2: memref<1x128xf32, #tpu.memory_space<vmem>>, %arg3: memref<1x128xf32, #tpu.memory_space<vmem>>, %arg4: memref<1x128xf32, #tpu.memory_space<vmem>>, %arg5: memref<256x8xf32, #tpu.memory_space<vmem>>, %arg6: memref<256x1xf32, #tpu.memory_space<vmem>>, %arg7: memref<256x256xf32, #tpu.memory_space<vmem>>, %arg8: memref<256x1xf32, #tpu.memory_space<vmem>>, %arg9: memref<2x256xf32, #tpu.memory_space<vmem>>, %arg10: memref<2x1xf32, #tpu.memory_space<vmem>>, %arg11: memref<2x128xf32, #tpu.memory_space<vmem>>) attributes {dimension_semantics = [#tpu.dimension_semantics<parallel>], iteration_bounds = array<i64: 2>, scalar_prefetch = 0 : i64, scratch_operands = 0 : i64, tpu.core_type = #tpu.core_type<tc>, window_params = [{transform_indices = @transform_0, window_bounds = array<i64: 2, 128>}, {transform_indices = @transform_1, window_bounds = array<i64: 1, 128>}, {transform_indices = @transform_2, window_bounds = array<i64: 1, 128>}, {transform_indices = @transform_3, window_bounds = array<i64: 1, 128>}, {pipeline_mode = #tpu.pipeline_mode<synchronous>, transform_indices = @transform_4, window_bounds = array<i64: 256, 8>}, {pipeline_mode = #tpu.pipeline_mode<synchronous>, transform_indices = @transform_5, window_bounds = array<i64: 256, 1>}, {pipeline_mode = #tpu.pipeline_mode<synchronous>, transform_indices = @transform_6, window_bounds = array<i64: 256, 256>}, {pipeline_mode = #tpu.pipeline_mode<synchronous>, transform_indices = @transform_7, window_bounds = array<i64: 256, 1>}, {pipeline_mode = #tpu.pipeline_mode<synchronous>, transform_indices = @transform_8, window_bounds = array<i64: 2, 256>}, {pipeline_mode = #tpu.pipeline_mode<synchronous>, transform_indices = @transform_9, window_bounds = array<i64: 2, 1>}, {transform_indices = @transform_10, window_bounds = array<i64: 2, 128>}]} {
    %c0 = arith.constant 0 : index
    %c0_0 = arith.constant 0 : index
    %0 = vector.load %arg1[%c0, %c0_0] : memref<2x128xf32, #tpu.memory_space<vmem>>, vector<1x128xf32>
    %c1 = arith.constant 1 : index
    %c0_1 = arith.constant 0 : index
    %1 = vector.load %arg1[%c1, %c0_1] : memref<2x128xf32, #tpu.memory_space<vmem>>, vector<1x128xf32>
    %c0_2 = arith.constant 0 : index
    %c0_3 = arith.constant 0 : index
    %2 = vector.load %arg2[%c0_2, %c0_3] : memref<1x128xf32, #tpu.memory_space<vmem>>, vector<1x128xf32>
    %c0_4 = arith.constant 0 : index
    %c0_5 = arith.constant 0 : index
    %3 = vector.load %arg3[%c0_4, %c0_5] : memref<1x128xf32, #tpu.memory_space<vmem>>, vector<1x128xf32>
    %c0_6 = arith.constant 0 : index
    %c0_7 = arith.constant 0 : index
    %4 = vector.load %arg4[%c0_6, %c0_7] : memref<1x128xf32, #tpu.memory_space<vmem>>, vector<1x128xf32>
    %5 = math.sin %0 : vector<1x128xf32>
    %6 = math.cos %0 : vector<1x128xf32>
    %cst = arith.constant 2.000000e+00 : f32
    %7 = vector.broadcast %cst : f32 to vector<1x128xf32>
    %8 = arith.mulf %7, %0 : vector<1x128xf32>
    %9 = math.sin %8 : vector<1x128xf32>
    %10 = arith.mulf %6, %1 : vector<1x128xf32>
    %cst_8 = arith.constant 2.500000e-01 : f32
    %11 = vector.broadcast %cst_8 : f32 to vector<1x128xf32>
    %12 = arith.mulf %11, %9 : vector<1x128xf32>
    %13 = arith.subf %5, %12 : vector<1x128xf32>
    %cst_9 = arith.constant 6.28318548 : f32
    %14 = vector.broadcast %cst_9 : f32 to vector<1x128xf32>
    %15 = arith.mulf %14, %3 : vector<1x128xf32>
    %16 = arith.divf %4, %15 : vector<1x128xf32>
    %17 = math.roundeven %16 : vector<1x128xf32>
    %cst_10 = arith.constant 6.28318548 : f32
    %18 = vector.broadcast %cst_10 : f32 to vector<1x128xf32>
    %19 = arith.mulf %17, %18 : vector<1x128xf32>
    %20 = arith.addf %2, %19 : vector<1x128xf32>
    %21 = arith.divf %4, %3 : vector<1x128xf32>
    %22 = arith.addf %2, %21 : vector<1x128xf32>
    %23 = arith.subf %22, %20 : vector<1x128xf32>
    %cst_11 = arith.constant 5.000000e-01 : f32
    %24 = vector.broadcast %cst_11 : f32 to vector<1x128xf32>
    %25 = arith.mulf %24, %23 : vector<1x128xf32>
    %26 = arith.addf %20, %22 : vector<1x128xf32>
    %cst_12 = arith.constant 5.000000e-01 : f32
    %27 = vector.broadcast %cst_12 : f32 to vector<1x128xf32>
    %28 = arith.mulf %27, %26 : vector<1x128xf32>
    %29 = arith.mulf %3, %25 : vector<1x128xf32>
    %cst_13 = arith.constant 0.000000e+00 : f32
    %30 = vector.broadcast %cst_13 : f32 to vector<1x128xf32>
    %cst_14 = arith.constant 0.000000e+00 : f32
    %31 = vector.broadcast %cst_14 : f32 to vector<1x128xf32>
    %cst_15 = arith.constant -0.973906517 : f32
    %32 = vector.broadcast %cst_15 : f32 to vector<1x128xf32>
    %33 = arith.mulf %25, %32 : vector<1x128xf32>
    %34 = arith.addf %33, %28 : vector<1x128xf32>
    %35 = math.sin %34 : vector<1x128xf32>
    %cst_16 = arith.constant 0.0666713416 : f32
    %36 = vector.broadcast %cst_16 : f32 to vector<1x128xf32>
    %37 = arith.mulf %29, %36 : vector<1x128xf32>
    %38 = arith.mulf %35, %5 : vector<1x128xf32>
    %39 = arith.mulf %37, %38 : vector<1x128xf32>
    %40 = arith.addf %30, %39 : vector<1x128xf32>
    %41 = arith.mulf %35, %35 : vector<1x128xf32>
    %cst_17 = arith.constant 5.000000e-01 : f32
    %42 = vector.broadcast %cst_17 : f32 to vector<1x128xf32>
    %43 = arith.mulf %42, %41 : vector<1x128xf32>
    %cst_18 = arith.constant 2.500000e-01 : f32
    %44 = vector.broadcast %cst_18 : f32 to vector<1x128xf32>
    %45 = arith.subf %44, %43 : vector<1x128xf32>
    %46 = arith.mulf %45, %9 : vector<1x128xf32>
    %47 = arith.mulf %35, %10 : vector<1x128xf32>
    %48 = arith.subf %46, %47 : vector<1x128xf32>
    %49 = arith.mulf %37, %48 : vector<1x128xf32>
    %50 = arith.addf %31, %49 : vector<1x128xf32>
    %cst_19 = arith.constant -0.865063369 : f32
    %51 = vector.broadcast %cst_19 : f32 to vector<1x128xf32>
    %52 = arith.mulf %25, %51 : vector<1x128xf32>
    %53 = arith.addf %52, %28 : vector<1x128xf32>
    %54 = math.sin %53 : vector<1x128xf32>
    %cst_20 = arith.constant 0.149451345 : f32
    %55 = vector.broadcast %cst_20 : f32 to vector<1x128xf32>
    %56 = arith.mulf %29, %55 : vector<1x128xf32>
    %57 = arith.mulf %54, %5 : vector<1x128xf32>
    %58 = arith.mulf %56, %57 : vector<1x128xf32>
    %59 = arith.addf %40, %58 : vector<1x128xf32>
    %60 = arith.mulf %54, %54 : vector<1x128xf32>
    %cst_21 = arith.constant 5.000000e-01 : f32
    %61 = vector.broadcast %cst_21 : f32 to vector<1x128xf32>
    %62 = arith.mulf %61, %60 : vector<1x128xf32>
    %cst_22 = arith.constant 2.500000e-01 : f32
    %63 = vector.broadcast %cst_22 : f32 to vector<1x128xf32>
    %64 = arith.subf %63, %62 : vector<1x128xf32>
    %65 = arith.mulf %64, %9 : vector<1x128xf32>
    %66 = arith.mulf %54, %10 : vector<1x128xf32>
    %67 = arith.subf %65, %66 : vector<1x128xf32>
    %68 = arith.mulf %56, %67 : vector<1x128xf32>
    %69 = arith.addf %50, %68 : vector<1x128xf32>
    %cst_23 = arith.constant -0.679409563 : f32
    %70 = vector.broadcast %cst_23 : f32 to vector<1x128xf32>
    %71 = arith.mulf %25, %70 : vector<1x128xf32>
    %72 = arith.addf %71, %28 : vector<1x128xf32>
    %73 = math.sin %72 : vector<1x128xf32>
    %cst_24 = arith.constant 0.219086364 : f32
    %74 = vector.broadcast %cst_24 : f32 to vector<1x128xf32>
    %75 = arith.mulf %29, %74 : vector<1x128xf32>
    %76 = arith.mulf %73, %5 : vector<1x128xf32>
    %77 = arith.mulf %75, %76 : vector<1x128xf32>
    %78 = arith.addf %59, %77 : vector<1x128xf32>
    %79 = arith.mulf %73, %73 : vector<1x128xf32>
    %cst_25 = arith.constant 5.000000e-01 : f32
    %80 = vector.broadcast %cst_25 : f32 to vector<1x128xf32>
    %81 = arith.mulf %80, %79 : vector<1x128xf32>
    %cst_26 = arith.constant 2.500000e-01 : f32
    %82 = vector.broadcast %cst_26 : f32 to vector<1x128xf32>
    %83 = arith.subf %82, %81 : vector<1x128xf32>
    %84 = arith.mulf %83, %9 : vector<1x128xf32>
    %85 = arith.mulf %73, %10 : vector<1x128xf32>
    %86 = arith.subf %84, %85 : vector<1x128xf32>
    %87 = arith.mulf %75, %86 : vector<1x128xf32>
    %88 = arith.addf %69, %87 : vector<1x128xf32>
    %cst_27 = arith.constant -0.433395386 : f32
    %89 = vector.broadcast %cst_27 : f32 to vector<1x128xf32>
    %90 = arith.mulf %25, %89 : vector<1x128xf32>
    %91 = arith.addf %90, %28 : vector<1x128xf32>
    %92 = math.sin %91 : vector<1x128xf32>
    %cst_28 = arith.constant 0.269266725 : f32
    %93 = vector.broadcast %cst_28 : f32 to vector<1x128xf32>
    %94 = arith.mulf %29, %93 : vector<1x128xf32>
    %95 = arith.mulf %92, %5 : vector<1x128xf32>
    %96 = arith.mulf %94, %95 : vector<1x128xf32>
    %97 = arith.addf %78, %96 : vector<1x128xf32>
    %98 = arith.mulf %92, %92 : vector<1x128xf32>
    %cst_29 = arith.constant 5.000000e-01 : f32
    %99 = vector.broadcast %cst_29 : f32 to vector<1x128xf32>
    %100 = arith.mulf %99, %98 : vector<1x128xf32>
    %cst_30 = arith.constant 2.500000e-01 : f32
    %101 = vector.broadcast %cst_30 : f32 to vector<1x128xf32>
    %102 = arith.subf %101, %100 : vector<1x128xf32>
    %103 = arith.mulf %102, %9 : vector<1x128xf32>
    %104 = arith.mulf %92, %10 : vector<1x128xf32>
    %105 = arith.subf %103, %104 : vector<1x128xf32>
    %106 = arith.mulf %94, %105 : vector<1x128xf32>
    %107 = arith.addf %88, %106 : vector<1x128xf32>
    %cst_31 = arith.constant -0.148874342 : f32
    %108 = vector.broadcast %cst_31 : f32 to vector<1x128xf32>
    %109 = arith.mulf %25, %108 : vector<1x128xf32>
    %110 = arith.addf %109, %28 : vector<1x128xf32>
    %111 = math.sin %110 : vector<1x128xf32>
    %cst_32 = arith.constant 0.29552424 : f32
    %112 = vector.broadcast %cst_32 : f32 to vector<1x128xf32>
    %113 = arith.mulf %29, %112 : vector<1x128xf32>
    %114 = arith.mulf %111, %5 : vector<1x128xf32>
    %115 = arith.mulf %113, %114 : vector<1x128xf32>
    %116 = arith.addf %97, %115 : vector<1x128xf32>
    %117 = arith.mulf %111, %111 : vector<1x128xf32>
    %cst_33 = arith.constant 5.000000e-01 : f32
    %118 = vector.broadcast %cst_33 : f32 to vector<1x128xf32>
    %119 = arith.mulf %118, %117 : vector<1x128xf32>
    %cst_34 = arith.constant 2.500000e-01 : f32
    %120 = vector.broadcast %cst_34 : f32 to vector<1x128xf32>
    %121 = arith.subf %120, %119 : vector<1x128xf32>
    %122 = arith.mulf %121, %9 : vector<1x128xf32>
    %123 = arith.mulf %111, %10 : vector<1x128xf32>
    %124 = arith.subf %122, %123 : vector<1x128xf32>
    %125 = arith.mulf %113, %124 : vector<1x128xf32>
    %126 = arith.addf %107, %125 : vector<1x128xf32>
    %cst_35 = arith.constant 0.148874342 : f32
    %127 = vector.broadcast %cst_35 : f32 to vector<1x128xf32>
    %128 = arith.mulf %25, %127 : vector<1x128xf32>
    %129 = arith.addf %128, %28 : vector<1x128xf32>
    %130 = math.sin %129 : vector<1x128xf32>
    %cst_36 = arith.constant 0.29552424 : f32
    %131 = vector.broadcast %cst_36 : f32 to vector<1x128xf32>
    %132 = arith.mulf %29, %131 : vector<1x128xf32>
    %133 = arith.mulf %130, %5 : vector<1x128xf32>
    %134 = arith.mulf %132, %133 : vector<1x128xf32>
    %135 = arith.addf %116, %134 : vector<1x128xf32>
    %136 = arith.mulf %130, %130 : vector<1x128xf32>
    %cst_37 = arith.constant 5.000000e-01 : f32
    %137 = vector.broadcast %cst_37 : f32 to vector<1x128xf32>
    %138 = arith.mulf %137, %136 : vector<1x128xf32>
    %cst_38 = arith.constant 2.500000e-01 : f32
    %139 = vector.broadcast %cst_38 : f32 to vector<1x128xf32>
    %140 = arith.subf %139, %138 : vector<1x128xf32>
    %141 = arith.mulf %140, %9 : vector<1x128xf32>
    %142 = arith.mulf %130, %10 : vector<1x128xf32>
    %143 = arith.subf %141, %142 : vector<1x128xf32>
    %144 = arith.mulf %132, %143 : vector<1x128xf32>
    %145 = arith.addf %126, %144 : vector<1x128xf32>
    %cst_39 = arith.constant 0.433395386 : f32
    %146 = vector.broadcast %cst_39 : f32 to vector<1x128xf32>
    %147 = arith.mulf %25, %146 : vector<1x128xf32>
    %148 = arith.addf %147, %28 : vector<1x128xf32>
    %149 = math.sin %148 : vector<1x128xf32>
    %cst_40 = arith.constant 0.269266725 : f32
    %150 = vector.broadcast %cst_40 : f32 to vector<1x128xf32>
    %151 = arith.mulf %29, %150 : vector<1x128xf32>
    %152 = arith.mulf %149, %5 : vector<1x128xf32>
    %153 = arith.mulf %151, %152 : vector<1x128xf32>
    %154 = arith.addf %135, %153 : vector<1x128xf32>
    %155 = arith.mulf %149, %149 : vector<1x128xf32>
    %cst_41 = arith.constant 5.000000e-01 : f32
    %156 = vector.broadcast %cst_41 : f32 to vector<1x128xf32>
    %157 = arith.mulf %156, %155 : vector<1x128xf32>
    %cst_42 = arith.constant 2.500000e-01 : f32
    %158 = vector.broadcast %cst_42 : f32 to vector<1x128xf32>
    %159 = arith.subf %158, %157 : vector<1x128xf32>
    %160 = arith.mulf %159, %9 : vector<1x128xf32>
    %161 = arith.mulf %149, %10 : vector<1x128xf32>
    %162 = arith.subf %160, %161 : vector<1x128xf32>
    %163 = arith.mulf %151, %162 : vector<1x128xf32>
    %164 = arith.addf %145, %163 : vector<1x128xf32>
    %cst_43 = arith.constant 0.679409563 : f32
    %165 = vector.broadcast %cst_43 : f32 to vector<1x128xf32>
    %166 = arith.mulf %25, %165 : vector<1x128xf32>
    %167 = arith.addf %166, %28 : vector<1x128xf32>
    %168 = math.sin %167 : vector<1x128xf32>
    %cst_44 = arith.constant 0.219086364 : f32
    %169 = vector.broadcast %cst_44 : f32 to vector<1x128xf32>
    %170 = arith.mulf %29, %169 : vector<1x128xf32>
    %171 = arith.mulf %168, %5 : vector<1x128xf32>
    %172 = arith.mulf %170, %171 : vector<1x128xf32>
    %173 = arith.addf %154, %172 : vector<1x128xf32>
    %174 = arith.mulf %168, %168 : vector<1x128xf32>
    %cst_45 = arith.constant 5.000000e-01 : f32
    %175 = vector.broadcast %cst_45 : f32 to vector<1x128xf32>
    %176 = arith.mulf %175, %174 : vector<1x128xf32>
    %cst_46 = arith.constant 2.500000e-01 : f32
    %177 = vector.broadcast %cst_46 : f32 to vector<1x128xf32>
    %178 = arith.subf %177, %176 : vector<1x128xf32>
    %179 = arith.mulf %178, %9 : vector<1x128xf32>
    %180 = arith.mulf %168, %10 : vector<1x128xf32>
    %181 = arith.subf %179, %180 : vector<1x128xf32>
    %182 = arith.mulf %170, %181 : vector<1x128xf32>
    %183 = arith.addf %164, %182 : vector<1x128xf32>
    %cst_47 = arith.constant 0.865063369 : f32
    %184 = vector.broadcast %cst_47 : f32 to vector<1x128xf32>
    %185 = arith.mulf %25, %184 : vector<1x128xf32>
    %186 = arith.addf %185, %28 : vector<1x128xf32>
    %187 = math.sin %186 : vector<1x128xf32>
    %cst_48 = arith.constant 0.149451345 : f32
    %188 = vector.broadcast %cst_48 : f32 to vector<1x128xf32>
    %189 = arith.mulf %29, %188 : vector<1x128xf32>
    %190 = arith.mulf %187, %5 : vector<1x128xf32>
    %191 = arith.mulf %189, %190 : vector<1x128xf32>
    %192 = arith.addf %173, %191 : vector<1x128xf32>
    %193 = arith.mulf %187, %187 : vector<1x128xf32>
    %cst_49 = arith.constant 5.000000e-01 : f32
    %194 = vector.broadcast %cst_49 : f32 to vector<1x128xf32>
    %195 = arith.mulf %194, %193 : vector<1x128xf32>
    %cst_50 = arith.constant 2.500000e-01 : f32
    %196 = vector.broadcast %cst_50 : f32 to vector<1x128xf32>
    %197 = arith.subf %196, %195 : vector<1x128xf32>
    %198 = arith.mulf %197, %9 : vector<1x128xf32>
    %199 = arith.mulf %187, %10 : vector<1x128xf32>
    %200 = arith.subf %198, %199 : vector<1x128xf32>
    %201 = arith.mulf %189, %200 : vector<1x128xf32>
    %202 = arith.addf %183, %201 : vector<1x128xf32>
    %cst_51 = arith.constant 0.973906517 : f32
    %203 = vector.broadcast %cst_51 : f32 to vector<1x128xf32>
    %204 = arith.mulf %25, %203 : vector<1x128xf32>
    %205 = arith.addf %204, %28 : vector<1x128xf32>
    %206 = math.sin %205 : vector<1x128xf32>
    %cst_52 = arith.constant 0.0666713416 : f32
    %207 = vector.broadcast %cst_52 : f32 to vector<1x128xf32>
    %208 = arith.mulf %29, %207 : vector<1x128xf32>
    %209 = arith.mulf %206, %5 : vector<1x128xf32>
    %210 = arith.mulf %208, %209 : vector<1x128xf32>
    %211 = arith.addf %192, %210 : vector<1x128xf32>
    %212 = arith.mulf %206, %206 : vector<1x128xf32>
    %cst_53 = arith.constant 5.000000e-01 : f32
    %213 = vector.broadcast %cst_53 : f32 to vector<1x128xf32>
    %214 = arith.mulf %213, %212 : vector<1x128xf32>
    %cst_54 = arith.constant 2.500000e-01 : f32
    %215 = vector.broadcast %cst_54 : f32 to vector<1x128xf32>
    %216 = arith.subf %215, %214 : vector<1x128xf32>
    %217 = arith.mulf %216, %9 : vector<1x128xf32>
    %218 = arith.mulf %206, %10 : vector<1x128xf32>
    %219 = arith.subf %217, %218 : vector<1x128xf32>
    %220 = arith.mulf %208, %219 : vector<1x128xf32>
    %221 = arith.addf %202, %220 : vector<1x128xf32>
    %cst_55 = arith.constant 0.000000e+00 : f32
    %222 = vector.broadcast %cst_55 : f32 to vector<1x128xf32>
    %223 = math.cos %2 : vector<1x128xf32>
    %224 = math.sin %2 : vector<1x128xf32>
    %225 = tpu.concatenate %223, %224, %0, %1, %4, %222, %222, %222 in 0 : vector<1x128xf32>, vector<1x128xf32>, vector<1x128xf32>, vector<1x128xf32>, vector<1x128xf32>, vector<1x128xf32>, vector<1x128xf32>, vector<1x128xf32> -> vector<8x128xf32>
    %c0_56 = arith.constant 0 : index
    %c0_57 = arith.constant 0 : index
    %226 = vector.load %arg5[%c0_56, %c0_57] : memref<256x8xf32, #tpu.memory_space<vmem>>, vector<256x8xf32>
    %cst_58 = arith.constant dense<0.000000e+00> : vector<256x128xf32>
    %227 = tpu.matmul %226, %225, %cst_58 {dimension_numbers = #tpu.dot_dimension_numbers<[1], [0], [0], [1], [0, 0, 1, 1], [], []>} : vector<256x8xf32>, vector<8x128xf32>, vector<256x128xf32> -> vector<256x128xf32>
    %c0_59 = arith.constant 0 : index
    %c0_60 = arith.constant 0 : index
    %228 = vector.load %arg6[%c0_59, %c0_60] : memref<256x1xf32, #tpu.memory_space<vmem>>, vector<256x1xf32>
    %229 = vector.broadcast %228 : vector<256x1xf32> to vector<256x128xf32>
    %230 = arith.addf %227, %229 : vector<256x128xf32>
    %231 = math.tanh %230 : vector<256x128xf32>
    %c0_61 = arith.constant 0 : index
    %c0_62 = arith.constant 0 : index
    %232 = vector.load %arg7[%c0_61, %c0_62] : memref<256x256xf32, #tpu.memory_space<vmem>>, vector<256x256xf32>
    %cst_63 = arith.constant dense<0.000000e+00> : vector<256x128xf32>
    %233 = tpu.matmul %232, %231, %cst_63 {dimension_numbers = #tpu.dot_dimension_numbers<[1], [0], [0], [1], [0, 0, 1, 1], [], []>} : vector<256x256xf32>, vector<256x128xf32>, vector<256x128xf32> -> vector<256x128xf32>
    %c0_64 = arith.constant 0 : index
    %c0_65 = arith.constant 0 : index
    %234 = vector.load %arg8[%c0_64, %c0_65] : memref<256x1xf32, #tpu.memory_space<vmem>>, vector<256x1xf32>
    %235 = vector.broadcast %234 : vector<256x1xf32> to vector<256x128xf32>
    %236 = arith.addf %233, %235 : vector<256x128xf32>
    %237 = math.tanh %236 : vector<256x128xf32>
    %c0_66 = arith.constant 0 : index
    %c0_67 = arith.constant 0 : index
    %238 = vector.load %arg9[%c0_66, %c0_67] : memref<2x256xf32, #tpu.memory_space<vmem>>, vector<2x256xf32>
    %cst_68 = arith.constant dense<0.000000e+00> : vector<2x128xf32>
    %239 = tpu.matmul %238, %237, %cst_68 {dimension_numbers = #tpu.dot_dimension_numbers<[1], [0], [0], [1], [0, 0, 1, 1], [], []>} : vector<2x256xf32>, vector<256x128xf32>, vector<2x128xf32> -> vector<2x128xf32>
    %c0_69 = arith.constant 0 : index
    %c0_70 = arith.constant 0 : index
    %240 = vector.load %arg10[%c0_69, %c0_70] : memref<2x1xf32, #tpu.memory_space<vmem>>, vector<2x1xf32>
    %241 = vector.broadcast %240 : vector<2x1xf32> to vector<2x128xf32>
    %242 = arith.addf %239, %241 : vector<2x128xf32>
    %243 = arith.mulf %4, %4 : vector<1x128xf32>
    %244 = arith.mulf %4, %1 : vector<1x128xf32>
    %245 = arith.addf %244, %211 : vector<1x128xf32>
    %246 = vector.extract_strided_slice %242 {offsets = [0, 0], sizes = [1, 128], strides = [1, 1]} : vector<2x128xf32> to vector<1x128xf32>
    %247 = arith.mulf %243, %246 : vector<1x128xf32>
    %248 = arith.addf %245, %247 : vector<1x128xf32>
    %249 = arith.mulf %4, %13 : vector<1x128xf32>
    %250 = arith.addf %249, %221 : vector<1x128xf32>
    %251 = vector.extract_strided_slice %242 {offsets = [1, 0], sizes = [1, 128], strides = [1, 1]} : vector<2x128xf32> to vector<1x128xf32>
    %252 = arith.mulf %243, %251 : vector<1x128xf32>
    %253 = arith.addf %250, %252 : vector<1x128xf32>
    %254 = tpu.concatenate %248, %253 in 0 : vector<1x128xf32>, vector<1x128xf32> -> vector<2x128xf32>
    %c0_71 = arith.constant 0 : index
    %c0_72 = arith.constant 0 : index
    %255 = vector.load %arg11[%c0_71, %c0_72] : memref<2x128xf32, #tpu.memory_space<vmem>>, vector<2x128xf32>
    tpu.vector_store %arg11[%c0_71, %c0_72], %254 {strides = array<i32>} : memref<2x128xf32, #tpu.memory_space<vmem>>, vector<2x128xf32>,
    return
  }
  func.func @transform_0(%arg0: i32) -> (i32, i32) {
    %c0_i32 = arith.constant 0 : i32
    %c0_i32_0 = arith.constant 0 : i32
    return %c0_i32, %arg0 : i32, i32
  }
  func.func @transform_1(%arg0: i32) -> (i32, i32) {
    %c0_i32 = arith.constant 0 : i32
    %c0_i32_0 = arith.constant 0 : i32
    return %c0_i32, %arg0 : i32, i32
  }
  func.func @transform_2(%arg0: i32) -> (i32, i32) {
    %c0_i32 = arith.constant 0 : i32
    %c0_i32_0 = arith.constant 0 : i32
    return %c0_i32, %arg0 : i32, i32
  }
  func.func @transform_3(%arg0: i32) -> (i32, i32) {
    %c0_i32 = arith.constant 0 : i32
    %c0_i32_0 = arith.constant 0 : i32
    return %c0_i32, %arg0 : i32, i32
  }
  func.func @transform_4(%arg0: i32) -> (i32, i32) {
    %c0_i32 = arith.constant 0 : i32
    %c0_i32_0 = arith.constant 0 : i32
    %c0_i32_1 = arith.constant 0 : i32
    return %c0_i32, %c0_i32_0 : i32, i32
  }
  func.func @transform_5(%arg0: i32) -> (i32, i32) {
    %c0_i32 = arith.constant 0 : i32
    %c0_i32_0 = arith.constant 0 : i32
    %c0_i32_1 = arith.constant 0 : i32
    return %c0_i32, %c0_i32_0 : i32, i32
  }
  func.func @transform_6(%arg0: i32) -> (i32, i32) {
    %c0_i32 = arith.constant 0 : i32
    %c0_i32_0 = arith.constant 0 : i32
    %c0_i32_1 = arith.constant 0 : i32
    return %c0_i32, %c0_i32_0 : i32, i32
  }
  func.func @transform_7(%arg0: i32) -> (i32, i32) {
    %c0_i32 = arith.constant 0 : i32
    %c0_i32_0 = arith.constant 0 : i32
    %c0_i32_1 = arith.constant 0 : i32
    return %c0_i32, %c0_i32_0 : i32, i32
  }
  func.func @transform_8(%arg0: i32) -> (i32, i32) {
    %c0_i32 = arith.constant 0 : i32
    %c0_i32_0 = arith.constant 0 : i32
    %c0_i32_1 = arith.constant 0 : i32
    return %c0_i32, %c0_i32_0 : i32, i32
  }
  func.func @transform_9(%arg0: i32) -> (i32, i32) {
    %c0_i32 = arith.constant 0 : i32
    %c0_i32_0 = arith.constant 0 : i32
    %c0_i32_1 = arith.constant 0 : i32
    return %c0_i32, %c0_i32_0 : i32, i32
  }
  func.func @transform_10(%arg0: i32) -> (i32, i32) {
    %c0_i32 = arith.constant 0 : i32
    %c0_i32_0 = arith.constant 0 : i32
    return %c0_i32, %arg0 : i32, i32
  }
}

</mosaic_0001>

<bundles_post_ra>
// kernel: tpu_custom_call.1
= control target key start
LH: loop header
LB: loop body
LE: loop exit
PB: predicated region body
PF: predicated region fallthrough
CT: control target
= control target key end

     0   :  { %s7106_s0 = inlined_call_operand.hbm [shape: f32[2,256], index: 0, kind: input, shape index: {}]   ;;  %s7107_s1 = inlined_call_operand.hbm [shape: f32[1,256], index: 1, kind: input, shape index: {}]   ;;  %s7108_s2 = inlined_call_operand.hbm [shape: f32[1,256], index: 2, kind: input, shape index: {}]   ;;  %s7109_s3 = inlined_call_operand.hbm [shape: f32[1,256], index: 3, kind: input, shape index: {}]   ;;  %s7110_s4 = inlined_call_operand.hbm [shape: f32[256,8], index: 4, kind: input, shape index: {}]   ;;  %s7111_s5 = inlined_call_operand.hbm [shape: f32[256,1], index: 5, kind: input, shape index: {}]   ;;  %s7112_s6 = inlined_call_operand.hbm [shape: f32[256,256], index: 6, kind: input, shape index: {}]   ;;  %s7113_s7 = inlined_call_operand.hbm [shape: f32[256,1], index: 7, kind: input, shape index: {}]   ;;  %s7114_s8 = inlined_call_operand.hbm [shape: f32[2,256], index: 8, kind: input, shape index: {}]   ;;  %s7115_s9 = inlined_call_operand.hbm [shape: f32[2,1], index: 9, kind: input, shape index: {}]   ;;  %s7116_s10 = inlined_call_operand.hbm [shape: f32[2,256], index: 10, kind: output, shape index: {}]  }
   0x1   :  { %7176 = sst [smem:[#allocation45_spill]] %s7107_s1 }
   0x2   :  { %7177 = sst [smem:[#allocation46_spill]] %s7110_s4 }
   0x3   :  { %7178 = sst [smem:[#allocation47_spill]] %s7111_s5 }
   0x4   :  { %7179 = sst [smem:[#allocation48_spill]] %s7113_s7 }
   0x5   :  { %7180 = sst [smem:[#allocation49_spill]] %s7116_s10 }
   0x6   :  { %15 = vsyncpa [#allocation3], 0 }
   0x7   :  { %17 = vsyncpa [#allocation3 + $0x1], 0 }
   0x8   :  { %18 = vsyncpa [#allocation6], 0 }
   0x9   :  { %20 = vsyncpa [#allocation6 + $0x1], 0 }
   0xa   :  { %21 = vsyncpa [#allocation9], 0 }
   0xb   :  { %23 = vsyncpa [#allocation9 + $0x1], 0 }
   0xc   :  { %24 = vsyncpa [#allocation12], 0 }
   0xd   :  { %25 = vsyncpa [#allocation15], 0 }
   0xe   :  { %26 = vsyncpa [#allocation18], 0 }
   0xf   :  { %27 = vsyncpa [#allocation4], 0 }
  0x10   :  { %29 = vsyncpa [#allocation4 + $0x1], 0  ;;  %s4909_s13 = smov 0   ;;  %s4911_s14 = smov 0  }
  0x11   :  { %s4913_s15 = smov 0   ;;  %s4915_s16 = smov 0  }
  0x12 LB: > { %7181 = sst [smem:[#allocation28_spill]] %s4816_s13  ;;  %s4830_s17 = smov [#allocation10]   ;;  %s4828_s16 = sphi %s4915_s16, %s7286_s16   ;;  %s4824_s15 = sphi %s4913_s15, %s7288_s15   ;;  %s4820_s14 = sphi %s4911_s14, %s7290_s14   ;;  %s4816_s13 = sphi %s4909_s13, %s7289_s13  }
  0x13   : > { %7182 = sst [smem:[#allocation29_spill]] %s4824_s15  ;;  %s308_s18 = sshll.u32 %s4830_s17, 4  ;;  %s4935_s18 = int_to_ptr.vmem [resolvable:$true] %s308_s18 }
  0x14   : > { %s4930_s19 = sadd.s32 4294967295, %s4828_s16   ;;  %p3717_p0 = scmp.ge.s32.totalorder %s4828_s16, 1 }
  0x15   : > { %p7121_p1 = scmp.eq.s32.totalorder %s4930_s19, 0  ;;  %p296_p2 = scmp.lt.s32.totalorder %s4828_s16, 3 }
  0x16   : > { %s4831_s21 = smov [#allocation11]   ;;  %s4832_s24 = smov [#allocation14]  }
  0x17   : > { %p4937_p3 = pnand %p3717_p0, %p296_p2  ;;  %s321_s22 = sshll.u32 %s4831_s21, 4  ;;  %s4950_s22 = int_to_ptr.vmem [resolvable:$true] %s321_s22 }
  0x18   : > { %s347_s25 = sshll.u32 %s4832_s24, 4  ;;  %s7186_s4 = sld [smem:[#allocation46_spill]]  ;;  %s4952_s25 = int_to_ptr.vmem [resolvable:$true] %s347_s25 }
  0x19   : > { %s7183_s20 = scalar_select %p4937_p3, 1, 0 }
  0x1a   : > { %p4154_p5 = pneg %p4937_p3 }
  0x1b   : > { %7184 = sst [smem:[#allocation30_spill]] %s7183_s20 }
  0x1c   : > { %p4946_p6 = pnand %p4154_p5, %p7121_p1 }
  0x1e   : > { %s7185_s23 = scalar_select %p4946_p6, 1, 0 }
  0x1f   : > { %s4450_s28 = scalar_lea.hbm %s7186_s4, 4096  ;;  %p4962_p8 = pneg %p4946_p6 }
  0x20   : > { %p4451_p7 = scmp.ne.s32.totalorder %s7186_s4, %s4450_s28  ;;  %p4457_p11 = scmp.lt.u32.totalorder %s4450_s28, %s7186_s4 }
  0x21   : > { %s7187_s11 = scalar_select %p4962_p8, 1, 0 }
  0x22   : > { %p4453_p9 = pnand %p4962_p8, %p4451_p7 }
  0x24   : > { %p4454_p10 = pneg %p4453_p9 }
  0x26   : > { %p4459_p12 = pnand %p4457_p11, %p4454_p10 }
  0x28   : > { %4462 = shalt.err (!%p4459_p12)
}
  0x29   : > { %s4463_s21 = scalar_lea.vmem %s4935_s18, 4096  ;;  %p4471_p5 = scmp.lt.s32.totalorder %s4935_s18, %s4935_s18 }
  0x2a   : > { %p4464_p13 = scmp.ne.s32.totalorder %s4935_s18, %s4463_s21  ;;  %p4472_p4 = scmp.lt.s32.totalorder %s4463_s21, %s4463_s21 }
  0x2c   : > { %p4466_p0 = pnand %p4464_p13, %p4962_p8  ;;  %p4473_p7 = por %p4472_p4, %p4471_p5 }
  0x2e   : > { %p4467_p2 = pneg %p4466_p0 }
  0x30   : > { %p4474_p9 = pnand %p4473_p7, %p4467_p2 }
  0x32   : > { %4477 = shalt.err (!%p4474_p9)
}
  0x33   : > { %s4833_s24 = smov 128   ;;  %s4834_s26 = smov 8  }
  0x34   : > { %4157 = dma.hbm_to_vmem [thread:$0]  (!%p4946_p6), %s7186_s4, 4096, %s4935_s18, [#allocation9], %s4833_s24, %s4833_s24, %s4834_s26  }
  0x35   : > { %s7188_s5 = sld [smem:[#allocation47_spill]] }
  0x3b   : > { %s4478_s12 = scalar_lea.hbm %s7188_s5, 4096 }
  0x3c   : > { %p4479_p4 = scmp.ne.s32.totalorder %s7188_s5, %s4478_s12  ;;  %p4485_p12 = scmp.lt.u32.totalorder %s4478_s12, %s7188_s5 }
  0x3e   : > { %p4481_p10 = pnand %p4479_p4, %p4962_p8 }
  0x40   : > { %p4482_p11 = pneg %p4481_p10 }
  0x42   : > { %p4487_p13 = pnand %p4485_p12, %p4482_p11 }
  0x44   : > { %4490 = shalt.err (!%p4487_p13)
}
  0x45   : > { %s4491_s18 = scalar_lea.vmem %s4950_s22, 4096  ;;  %p4499_p7 = scmp.lt.s32.totalorder %s4950_s22, %s4950_s22 }
  0x46   : > { %p4492_p0 = scmp.ne.s32.totalorder %s4950_s22, %s4491_s18  ;;  %p4500_p9 = scmp.lt.s32.totalorder %s4491_s18, %s4491_s18 }
  0x48   : > { %p4494_p2 = pnand %p4492_p0, %p4962_p8  ;;  %p4501_p4 = por %p4500_p9, %p4499_p7 }
  0x4a   : > { %p4495_p5 = pneg %p4494_p2 }
  0x4c   : > { %p4502_p10 = pnand %p4501_p4, %p4495_p5 }
  0x4e   : > { %4505 = shalt.err (!%p4502_p10)
}
  0x4f   : > { %4160 = dma.hbm_to_vmem [thread:$0]  (!%p4946_p6), %s7188_s5, 4096, %s4950_s22, [#allocation12], %s4833_s24, %s4833_s24, %s4834_s26  }
  0x50   : > { %s7189_s7 = sld [smem:[#allocation48_spill]] }
  0x56   : > { %s4506_s29 = scalar_lea.hbm %s7189_s7, 4096 }
  0x57   : > { %p4507_p11 = scmp.ne.s32.totalorder %s7189_s7, %s4506_s29  ;;  %p4513_p0 = scmp.lt.u32.totalorder %s4506_s29, %s7189_s7 }
  0x59   : > { %p4509_p12 = pnand %p4507_p11, %p4962_p8 }
  0x5b   : > { %p4510_p13 = pneg %p4509_p12 }
  0x5d   : > { %p4515_p2 = pnand %p4513_p0, %p4510_p13 }
  0x5f   : > { %4518 = shalt.err (!%p4515_p2)
}
  0x60   : > { %s4519_s22 = scalar_lea.vmem %s4952_s25, 4096  ;;  %p4527_p4 = scmp.lt.s32.totalorder %s4952_s25, %s4952_s25 }
  0x61   : > { %p4520_p5 = scmp.ne.s32.totalorder %s4952_s25, %s4519_s22  ;;  %p4528_p10 = scmp.lt.s32.totalorder %s4519_s22, %s4519_s22 }
  0x63   : > { %p4522_p7 = pnand %p4520_p5, %p4962_p8  ;;  %p4529_p11 = por %p4528_p10, %p4527_p4 }
  0x65   : > { %p4523_p9 = pneg %p4522_p7 }
  0x67   : > { %p4530_p12 = pnand %p4529_p11, %p4523_p9 }
  0x69   : > { %4533 = shalt.err (!%p4530_p12)
}
  0x6a   : > { %4166 = dma.hbm_to_vmem [thread:$0]  (!%p4946_p6), %s7189_s7, 4096, %s4952_s25, [#allocation15], %s4833_s24, %s4833_s24, %s4834_s26  }
  0x6b   : > { %s3716_s20 = sadd.s32 4294967294, %s4828_s16   ;;  %s5040_s27 = sadd.s32 1, %s4828_s16  }
  0x6c   : > { %7190 = sst [smem:[#allocation31_spill]] %s5040_s27  ;;  %s42_s28 = sadd.s32 1, %s4824_s15 }
  0x6d   : > { %s39_s29 = ssub.s32 %s4828_s16, %s5040_s27  ;;  %p49_p13 = scmp.ne.s32.totalorder %s4824_s15, %s4820_s14 }
  0x6e   : > { %p40_p0 = scmp.eq.s32.totalorder %s39_s29, 0  ;;  %p50_p2 = scmp.eq.s32.totalorder %s4828_s16, 0 }
  0x6f   : > { %p55_p5 = scmp.ne.s32.totalorder %s4820_s14, %s4816_s13  ;;  %p283_p7 = scmp.eq.s32.totalorder %s4930_s19, 1 }
  0x70   : > { %s5052_s30 = scalar_select %p40_p0, %s4824_s15, %s42_s28  }
  0x71   : > { %p51_p9 = por %p50_p2, %p49_p13  ;;  %p5056_p4 = por %p7121_p1, %p55_p5 }
  0x72   : > { %7191 = sst [smem:[#allocation32_spill]] %s5052_s30  ;;  %p5060_p10 = por %p283_p7, %p49_p13 }
  0x73   : > { %s7192_s25 = scalar_select %p5056_p4, 1, 0 }
  0x74   : > { %s7193_s24 = scalar_select %p5060_p10, 1, 0 }
  0x75   : > { %p289_p11 = scmp.eq.s32.totalorder %s3716_s20, 1  ;;  %p4196_p12 = scmp.lt.s32.totalorder %s4828_s16, 2 }
  0x76   : > { %7194 = sst [smem:[#allocation33_spill]] %s7193_s24  ;;  %s5066_s26 = sand.u32 1, %s4824_s15  }
  0x77   : > { %p5068_p3 = por %p289_p11, %p55_p5  ;;  %s7123_s17 = sand.u32 1, %s4828_s16  }
  0x78   : > { %p5073_p0 = pnand %p4196_p12, %p51_p9  ;;  %s5078_s22 = sshll.u32 %s4828_s16, 4 }
  0x79   : > { %s7195_s12 = scalar_select %p5068_p3, 1, 0 }
  0x7a   : > { %s7197_s21 = scalar_select %p5073_p0, 1, 0 }
  0x7b   : > { %7196 = sst [smem:[#allocation34_spill]] %s7195_s12  ;;  %s7198_s1 = sld [smem:[#allocation45_spill]] }
  0x7c   : > { %s404_s28 = scalar_lea.vmem [#allocation5], %s5066_s26  ;;  %s5091_s4 = scalar_lea.sflag [#allocation6], %s7123_s17 }
  0x7d   : > { %s411_s29 = sshll.u32 %s404_s28, 4  ;;  %p5097_p2 = pneg %p5073_p0  ;;  %s5087_s29 = int_to_ptr.vmem [resolvable:$true] %s411_s29 }
  0x7f   : > { %s7199_s7 = scalar_select %p5097_p2, 1, 0 }
  0x81   : > { %s5084_s20 = scalar_lea.hbm %s7198_s1, %s5078_s22  ;;  %s4539_s28 = scalar_lea.hbm %s7198_s1, 32 }
  0x82   : > { %s4534_s5 = scalar_lea.hbm %s5084_s20, 16  ;;  %p4540_p9 = scmp.lt.u32.totalorder %s5084_s20, %s7198_s1 }
  0x83   : > { %p4535_p13 = scmp.ne.s32.totalorder %s5084_s20, %s4534_s5  ;;  %p4541_p11 = scmp.lt.u32.totalorder %s4539_s28, %s4534_s5 }
  0x84   : > { %p4543_p1 = scmp.lt.u32.totalorder %s4534_s5, %s5084_s20 }
  0x85   : > { %p4537_p5 = pnand %p5097_p2, %p4535_p13  ;;  %p4542_p12 = por %p4541_p11, %p4540_p9 }
  0x87   : > { %p4538_p7 = pneg %p4537_p5  ;;  %p4544_p3 = por %p4543_p1, %p4542_p12 }
  0x89   : > { %p4545_p10 = pnand %p4544_p3, %p4538_p7 }
  0x8b   : > { %4548 = shalt.err (!%p4545_p10)
}
  0x8c   : > { %s4549_s17 = scalar_lea.vmem %s5087_s29, 16  ;;  %s4835_s18 = smov [#allocation5]  }
  0x8d   : > { %p4550_p13 = scmp.ne.s32.totalorder %s5087_s29, %s4549_s17  ;;  %s4554_s10 = sshll.u32 %s4835_s18, 4  ;;  %s4555_s10 = int_to_ptr.vmem [resolvable:$false] %s4554_s10 }
  0x8e   : > { %s4556_s15 = scalar_lea.vmem %s4555_s10, 32  ;;  %p4557_p6 = scmp.lt.s32.totalorder %s5087_s29, %s4555_s10 }
  0x8f   : > { %p4552_p5 = pnand %p4550_p13, %p5097_p2  ;;  %p4558_p8 = scmp.lt.s32.totalorder %s4556_s15, %s4549_s17 }
  0x91   : > { %p4553_p4 = pneg %p4552_p5  ;;  %p4559_p9 = por %p4558_p8, %p4557_p6 }
  0x93   : > { %p4560_p11 = pnand %p4559_p9, %p4553_p4 }
  0x95   : > { %4563 = shalt.err (!%p4560_p11)
}
  0x96   : > { %4179 = dma.hbm_to_vmem [thread:$0]  (!%p5073_p0), %s5084_s20, 16, %s5087_s29, %s5091_s4  }
  0x97   : > { %s4836_s5 = smov [#allocation13]   ;;  %s4564_s18 = scalar_lea.hbm %s7112_s6, 8192 }
  0x98   : > { %s334_s30 = sshll.u32 %s4836_s5, 4  ;;  %p4565_p1 = scmp.ne.s32.totalorder %s7112_s6, %s4564_s18  ;;  %s335_s30 = int_to_ptr.vmem [resolvable:$true] %s334_s30 }
  0x99   : > { %p7200_p3 = scmp.ne.s32.totalorder %s7187_s11, 0  ;;  %p4571_p4 = scmp.lt.u32.totalorder %s4564_s18, %s7112_s6 }
  0x9b   : > { %p4567_p6 = pnand %p4565_p1, %p7200_p3 }
  0x9d   : > { %p4568_p8 = pneg %p4567_p6 }
  0x9f   : > { %p4573_p10 = pnand %p4571_p4, %p4568_p8 }
  0xa1   : > { %4576 = shalt.err (!%p4573_p10)
}
  0xa2   : > { %s4577_s20 = scalar_lea.vmem %s335_s30, 8192  ;;  %p4585_p5 = scmp.lt.s32.totalorder %s335_s30, %s335_s30 }
  0xa3   : > { %p4578_p7 = scmp.ne.s32.totalorder %s335_s30, %s4577_s20  ;;  %p4586_p9 = scmp.lt.s32.totalorder %s4577_s20, %s4577_s20 }
  0xa5   : > { %p4580_p12 = pnand %p4578_p7, %p7200_p3  ;;  %p4587_p11 = por %p4586_p9, %p4585_p5 }
  0xa7   : > { %p4581_p13 = pneg %p4580_p12 }
  0xa9   : > { %p4588_p0 = pnand %p4587_p11, %p4581_p13 }
  0xab   : > { %4591 = shalt.err (!%p4588_p0)
}
  0xac   : > { %s4837_s1 = smov 256   ;;  %s4838_s27 = smov 16  }
  0xad   : > { %p7201_p1 = scmp.ne.s32.totalorder %s7185_s23, 0  ;;  %s4839_s28 = smov [#allocation16]  }
  0xae   : > { %s361_s18 = sshll.u32 %s4839_s28, 4  ;;  %s4840_s10 = smov [#allocation17]   ;;  %s362_s18 = int_to_ptr.vmem [resolvable:$true] %s361_s18 }
  0xaf   : > { %4163 = dma.hbm_to_vmem [thread:$0]  (!%p7201_p1), %s7112_s6, 8192, %s335_s30, [#allocation12], %s4837_s1, %s4837_s1, %s4838_s27  }
  0xb0   : > { %s372_s17 = sshll.u32 %s4840_s10, 4  ;;  %s4592_s12 = scalar_lea.hbm %s7114_s8, 64  ;;  %s5139_s17 = int_to_ptr.vmem [resolvable:$true] %s372_s17 }
  0xb1   : > { %p4593_p0 = scmp.ne.s32.totalorder %s7114_s8, %s4592_s12  ;;  %p4599_p4 = scmp.lt.u32.totalorder %s4592_s12, %s7114_s8 }
  0xb3   : > { %p4595_p6 = pnand %p4593_p0, %p7200_p3 }
  0xb5   : > { %p4596_p8 = pneg %p4595_p6 }
  0xb7   : > { %p4601_p10 = pnand %p4599_p4, %p4596_p8 }
  0xb9   : > { %4604 = shalt.err (!%p4601_p10)
}
  0xba   : > { %s4605_s1 = scalar_lea.vmem %s362_s18, 64  ;;  %p4613_p5 = scmp.lt.s32.totalorder %s362_s18, %s362_s18 }
  0xbb   : > { %p4606_p7 = scmp.ne.s32.totalorder %s362_s18, %s4605_s1  ;;  %p4614_p9 = scmp.lt.s32.totalorder %s4605_s1, %s4605_s1 }
  0xbd   : > { %p4608_p12 = pnand %p4606_p7, %p7200_p3  ;;  %p4615_p11 = por %p4614_p9, %p4613_p5 }
  0xbf   : > { %p4609_p13 = pneg %p4608_p12 }
  0xc1   : > { %p4616_p2 = pnand %p4615_p11, %p4609_p13 }
  0xc3   : > { %4619 = shalt.err (!%p4616_p2)
}
  0xc4   : > { %4169 = dma.hbm_to_vmem [thread:$0]  (!%p7201_p1), %s7114_s8, 64, %s362_s18, [#allocation15]  }
  0xc5   : > { %s4620_s5 = scalar_lea.hbm %s7115_s9, 32 }
  0xc6   : > { %p4621_p0 = scmp.ne.s32.totalorder %s7115_s9, %s4620_s5  ;;  %p4627_p2 = scmp.lt.u32.totalorder %s4620_s5, %s7115_s9 }
  0xc8   : > { %p4623_p6 = pnand %p4621_p0, %p7200_p3 }
  0xca   : > { %p4624_p8 = pneg %p4623_p6 }
  0xcc   : > { %p4629_p4 = pnand %p4627_p2, %p4624_p8 }
  0xce   : > { %4632 = shalt.err (!%p4629_p4)
}
  0xcf   : > { %s4633_s18 = scalar_lea.vmem %s5139_s17, 32  ;;  %p4641_p13 = scmp.lt.s32.totalorder %s5139_s17, %s5139_s17 }
  0xd0   : > { %p4634_p10 = scmp.ne.s32.totalorder %s5139_s17, %s4633_s18  ;;  %p4642_p5 = scmp.lt.s32.totalorder %s4633_s18, %s4633_s18 }
  0xd2   : > { %p4636_p7 = pnand %p4634_p10, %p7200_p3  ;;  %p4643_p9 = por %p4642_p5, %p4641_p13 }
  0xd4   : > { %p4637_p12 = pneg %p4636_p7 }
  0xd6   : > { %p4644_p11 = pnand %p4643_p9, %p4637_p12 }
  0xd8   : > { %4647 = shalt.err (!%p4644_p11)
}
  0xd9   : > { %4172 = dma.hbm_to_vmem [thread:$0]  (!%p7201_p1), %s7115_s9, 32, %s5139_s17, [#allocation18]  }
  0xda   : > { %s3725_s11 = sshll.u32 %s5066_s26, 1  ;;  %s3726_s1 = sshll.u32 %s4828_s16, 5 }
  0xdb   : > { %s5187_s12 = scalar_lea.hbm %s7106_s0, %s3726_s1  ;;  %s387_s23 = scalar_lea.vmem [#allocation2], %s3725_s11 }
  0xdc   : > { %s394_s27 = sshll.u32 %s387_s23, 4  ;;  %s384_s5 = scalar_lea.sflag [#allocation3], %s5066_s26  ;;  %s395_s27 = int_to_ptr.vmem [resolvable:$true] %s394_s27 }
  0xdd   : > { %s4648_s28 = scalar_lea.hbm %s5187_s12, 32  ;;  %p7202_p0 = scmp.ne.s32.totalorder %s7199_s7, 0 }
  0xde   : > { %p4649_p3 = scmp.ne.s32.totalorder %s5187_s12, %s4648_s28  ;;  %s4653_s15 = scalar_lea.hbm %s7106_s0, 64 }
  0xdf   : > { %p4654_p8 = scmp.lt.u32.totalorder %s5187_s12, %s7106_s0  ;;  %p4655_p2 = scmp.lt.u32.totalorder %s4653_s15, %s4648_s28 }
  0xe0   : > { %p4651_p6 = pnand %p4649_p3, %p7202_p0  ;;  %p4657_p10 = scmp.lt.u32.totalorder %s4648_s28, %s5187_s12 }
  0xe1   : > { %p4656_p4 = por %p4655_p2, %p4654_p8 }
  0xe2   : > { %p4652_p1 = pneg %p4651_p6 }
  0xe3   : > { %p4658_p7 = por %p4657_p10, %p4656_p4 }
  0xe5   : > { %p4659_p12 = pnand %p4658_p7, %p4652_p1 }
  0xe7   : > { %4662 = shalt.err (!%p4659_p12)
}
  0xe8   : > { %s4663_s29 = scalar_lea.vmem %s395_s27, 32  ;;  %s4841_s30 = smov [#allocation2]  }
  0xe9   : > { %p4664_p13 = scmp.ne.s32.totalorder %s395_s27, %s4663_s29  ;;  %s4668_s11 = sshll.u32 %s4841_s30, 4  ;;  %s4669_s11 = int_to_ptr.vmem [resolvable:$false] %s4668_s11 }
  0xea   : > { %s4670_s1 = scalar_lea.vmem %s4669_s11, 64  ;;  %p4671_p11 = scmp.lt.s32.totalorder %s395_s27, %s4669_s11 }
  0xeb   : > { %p4666_p5 = pnand %p4664_p13, %p7202_p0  ;;  %p4672_p3 = scmp.lt.s32.totalorder %s4670_s1, %s4663_s29 }
  0xed   : > { %p4667_p9 = pneg %p4666_p5  ;;  %p4673_p6 = por %p4672_p3, %p4671_p11 }
  0xef   : > { %p4674_p2 = pnand %p4673_p6, %p4667_p9 }
  0xf1   : > { %4677 = shalt.err (!%p4674_p2)
}
  0xf2   : > { %p7203_p8 = scmp.ne.s32.totalorder %s7197_s21, 0  ;;  %s5211_s23 = scalar_lea.hbm %s7108_s2, %s5078_s22 }
  0xf3   : > { %s421_s28 = scalar_lea.vmem [#allocation7], %s5066_s26  ;;  %s4678_s10 = scalar_lea.hbm %s5211_s23, 16 }
  0xf4   : > { %4176 = dma.hbm_to_vmem [thread:$0]  (!%p7203_p8), %s5187_s12, 32, %s395_s27, %s384_s5  }
  0xf5   : > { %s428_s17 = sshll.u32 %s421_s28, 4  ;;  %p4679_p1 = scmp.ne.s32.totalorder %s5211_s23, %s4678_s10  ;;  %s429_s17 = int_to_ptr.vmem [resolvable:$true] %s428_s17 }
  0xf6   : > { %s4683_s12 = scalar_lea.hbm %s7108_s2, 32  ;;  %p4684_p7 = scmp.lt.u32.totalorder %s5211_s23, %s7108_s2 }
  0xf7   : > { %p4681_p4 = pnand %p4679_p1, %p7202_p0  ;;  %p4685_p12 = scmp.lt.u32.totalorder %s4683_s12, %s4678_s10 }
  0xf8   : > { %p4687_p5 = scmp.lt.u32.totalorder %s4678_s10, %s5211_s23 }
  0xf9   : > { %p4682_p10 = pneg %p4681_p4  ;;  %p4686_p13 = por %p4685_p12, %p4684_p7 }
  0xfb   : > { %p4688_p9 = por %p4687_p5, %p4686_p13 }
  0xfd   : > { %p4689_p11 = pnand %p4688_p9, %p4682_p10 }
  0xff   : > { %4692 = shalt.err (!%p4689_p11)
}
 0x100   : > { %s4693_s18 = scalar_lea.vmem %s429_s17, 16  ;;  %s4842_s29 = smov [#allocation7]  }
 0x101   : > { %p4694_p3 = scmp.ne.s32.totalorder %s429_s17, %s4693_s18  ;;  %s4698_s30 = sshll.u32 %s4842_s29, 4  ;;  %s4699_s30 = int_to_ptr.vmem [resolvable:$false] %s4698_s30 }
 0x102   : > { %s4700_s11 = scalar_lea.vmem %s4699_s30, 32  ;;  %p4701_p1 = scmp.lt.s32.totalorder %s429_s17, %s4699_s30 }
 0x103   : > { %p4696_p6 = pnand %p4694_p3, %p7202_p0  ;;  %p4702_p4 = scmp.lt.s32.totalorder %s4700_s11, %s4693_s18 }
 0x105   : > { %p4697_p2 = pneg %p4696_p6  ;;  %p4703_p8 = por %p4702_p4, %p4701_p1 }
 0x107   : > { %p4704_p7 = pnand %p4703_p8, %p4697_p2 }
 0x109   : > { %4707 = shalt.err (!%p4704_p7)
}
 0x10a   : > { %p7204_p12 = scmp.ne.s32.totalorder %s7197_s21, 0  ;;  %s5236_s24 = scalar_lea.hbm %s7109_s3, %s5078_s22 }
 0x10b   : > { %s438_s28 = scalar_lea.vmem [#allocation8], %s5066_s26  ;;  %s7205_s15 = sand.u32 1, %s4828_s16  }
 0x10c   : > { %4182 = dma.hbm_to_vmem [thread:$0]  (!%p7204_p12), %s5211_s23, 16, %s429_s17, %s5091_s4  }
 0x10d   : > { %s445_s10 = sshll.u32 %s438_s28, 4  ;;  %s436_s20 = scalar_lea.sflag [#allocation9], %s7205_s15  ;;  %s446_s10 = int_to_ptr.vmem [resolvable:$true] %s445_s10 }
 0x10e   : > { %s4708_s12 = scalar_lea.hbm %s5236_s24, 16  ;;  %s4713_s17 = scalar_lea.hbm %s7109_s3, 32 }
 0x10f   : > { %p4709_p8 = scmp.ne.s32.totalorder %s5236_s24, %s4708_s12  ;;  %p4714_p5 = scmp.lt.u32.totalorder %s5236_s24, %s7109_s3 }
 0x110   : > { %p4715_p9 = scmp.lt.u32.totalorder %s4713_s17, %s4708_s12  ;;  %p4717_p3 = scmp.lt.u32.totalorder %s4708_s12, %s5236_s24 }
 0x111   : > { %p4711_p10 = pnand %p4709_p8, %p7202_p0 }
 0x112   : > { %p4716_p11 = por %p4715_p9, %p4714_p5 }
 0x113   : > { %p4712_p13 = pneg %p4711_p10 }
 0x114   : > { %p4718_p6 = por %p4717_p3, %p4716_p11 }
 0x116   : > { %p4719_p2 = pnand %p4718_p6, %p4712_p13 }
 0x118   : > { %4722 = shalt.err (!%p4719_p2)
}
 0x119   : > { %s4723_s26 = scalar_lea.vmem %s446_s10, 16  ;;  %s4843_s5 = smov [#allocation8]  }
 0x11a   : > { %p4724_p1 = scmp.ne.s32.totalorder %s446_s10, %s4723_s26  ;;  %s4728_s18 = sshll.u32 %s4843_s5, 4  ;;  %s4729_s18 = int_to_ptr.vmem [resolvable:$false] %s4728_s18 }
 0x11b   : > { %s4730_s29 = scalar_lea.vmem %s4729_s18, 32  ;;  %p4731_p8 = scmp.lt.s32.totalorder %s446_s10, %s4729_s18 }
 0x11c   : > { %p4726_p4 = pnand %p4724_p1, %p7202_p0  ;;  %p4732_p10 = scmp.lt.s32.totalorder %s4730_s29, %s4723_s26 }
 0x11e   : > { %p4727_p7 = pneg %p4726_p4  ;;  %p4733_p12 = por %p4732_p10, %p4731_p8 }
 0x120   : > { %p4734_p5 = pnand %p4733_p12, %p4727_p7 }
 0x122   : > { %4737 = shalt.err (!%p4734_p5)
}
 0x123   : > { %p7206_p9 = scmp.ne.s32.totalorder %s7197_s21, 0  ;;  %s7207_s30 = sld [smem:[#allocation30_spill]] }
 0x125   : > { %4185 = dma.hbm_to_vmem [thread:$0]  (!%p7206_p9), %s5236_s24, 16, %s446_s10, %s436_s20  }
 0x129   : > { %p7208_p13 = scmp.ne.s32.totalorder %s7207_s30, 0 }
 0x12b   : > { %454 = sbr.rel (%p7208_p13) target bundleno = 1355 (0x54b), region = 60 }
 0x132   : > { %s5261_s7 = sand.u32 1, %s4820_s14   ;;  %p7209_p0 = scmp.ne.s32.totalorder %s7192_s25, 0 }
 0x133   : > { %s3731_s11 = sshll.u32 %s5261_s7, 1  ;;  %s457_s1 = scalar_lea.sflag [#allocation3], %s5261_s7 }
 0x134   : > { %s5267_s13 = scalar_lea.vmem [#allocation2], %s3731_s11 }
 0x135   : > { %4783 = dma.done.wait (%p7209_p0), %s457_s1, 32  }
 0x136   : > { %4785 = vsyncadd (%p7209_p0), %s457_s1, 4294967264  ;;  %s465_s21 = sand.u32 1, %s4930_s19   ;;  %s468_s28 = scalar_lea.vmem [#allocation5], %s5261_s7 }
 0x137   : > { %s466_s24 = scalar_lea.sflag [#allocation6], %s465_s21 }
 0x138   : > { %4787 = dma.done.wait (%p7209_p0), %s466_s24, 32  }
 0x139   : > { %4789 = vsyncadd (%p7209_p0), %s466_s24, 4294967264  ;;  %s476_s10 = scalar_lea.vmem [#allocation7], %s5261_s7  ;;  %s482_s15 = scalar_lea.sflag [#allocation9], %s465_s21 }
 0x13a   : > { %s5281_s20 = scalar_lea.vmem [#allocation8], %s5261_s7 }
 0x13b   : > { %4791 = dma.done.wait (%p7209_p0), %s482_s15, 16  }
 0x13c   : > { %4793 = vsyncadd (%p7209_p0), %s482_s15, 4294967280  ;;  %p7210_p12 = scmp.eq.s32.totalorder %s4930_s19, 0 }
 0x13e   : > { %4795 = dma.done.wait (%p7210_p12), [#allocation9], 4096   ;;  %p7211_p11 = pmov %p7210_p12 }
 0x140   : > { %4797 = vsyncadd (%p7211_p11), [#allocation9], 4294963200  ;;  %p7212_p3 = pmov %p7211_p11 }
 0x142   : > { %4799 = dma.done.wait (%p7212_p3), [#allocation12], 12288   ;;  %p7213_p6 = pmov %p7212_p3 }
 0x143   : > { %p7214_p2 = pmov %p7212_p3 }
 0x144   : > { %4801 = vsyncadd (%p7213_p6), [#allocation12], 4294955008 }
 0x145   : > { %4803 = dma.done.wait (%p7214_p2), [#allocation15], 4160   ;;  %p7215_p1 = pmov %p7214_p2 }
 0x147   : > { %4805 = vsyncadd (%p7215_p1), [#allocation15], 4294963136  ;;  %p7216_p4 = pmov %p7215_p1 }
 0x148   : > { %p7217_p7 = pmov %p7215_p1 }
 0x149   : > { %4807 = dma.done.wait (%p7216_p4), [#allocation18], 32  }
 0x14a   : > { %4809 = vsyncadd (%p7217_p7), [#allocation18], 4294967264  ;;  %v4844_v0 = vmov 0   ;;  %v2337_v1 = vld [vmem:[#allocation11] sm:$0xff]  ;;  %v2339_v2 = vld [vmem:[#allocation11 + $0x10] sm:$0xff]  ;;  %vm2529_vm0 = vcmask 64512  }
 0x14b   : > { %4255 = vset.pattern.permute.xlu0 %v4844_v0  ;;  %4256 = vset.pattern.permute.xlu1 %v4844_v0  ;;  %v2338_v3 = vld [vmem:[#allocation11 + $0x8] sm:$0xff]  ;;  %v2340_v4 = vld [vmem:[#allocation11 + $0x18] sm:$0xff]  ;;  %v2341_v5 = vld [vmem:[#allocation11 + $0x20] sm:$0xff]  ;;  %v7156_v40 = vmov 683565275   ;;  %s7278_s25 = sld [smem:[#allocation33_spill]] }
 0x14c   : > { %2371 = vperm.xlu0 %4255, %v2337_v1   ;;  %2381 = vperm.xlu1 %4256, %v2339_v2   ;;  %v2342_v6 = vld [vmem:[#allocation11 + $0x28] sm:$0xff]  ;;  %v2305_v7 = vld [vmem:[#allocation10] sm:$0xff]  ;;  %v2343_v8 = vld [vmem:[#allocation11 + $0x30] sm:$0xff]  ;;  %v7154_v42 = vmov 2475754826   ;;  %s3834_s12 = sshll.u32 %s4930_s19, 5 }
 0x14d   : > { %v2344_v9 = vld [vmem:[#allocation11 + $0x38] sm:$0xff]  ;;  %3907 = vmatprep.mubr.msk.f32.mxu0 %vm2529_vm0, %v2305_v7  ;;  %v2345_v10 = vld [vmem:[#allocation11 + $0x40] sm:$0xff]  ;;  %v2346_v11 = vld [vmem:[#allocation11 + $0x48] sm:$0xff]  ;;  %v7151_v45 = vmov 2131351028   ;;  %s556_s4 = scalar_lea.vmem [#allocation19], %s3731_s11 }
 0x14e   : > { %v2347_v12 = vld [vmem:[#allocation11 + $0x50] sm:$0xff]  ;;  %v2348_v13 = vld [vmem:[#allocation11 + $0x58] sm:$0xff]  ;;  %v2349_v14 = vld [vmem:[#allocation11 + $0x60] sm:$0xff]  ;;  %v7143_v50 = vmov 2102212464   ;;  %s3532_s23 = sshll.u32 %s556_s4, 4  ;;  %s7063_s23 = int_to_ptr.vmem [resolvable:$true] %s3532_s23 }
 0x14f   : > { %v2350_v15 = vld [vmem:[#allocation11 + $0x68] sm:$0xff]  ;;  %v5306_v16 = vld [vmem:[%s468_s28] sm:$0x1]  ;;  %v2352_v18 = vld [vmem:[#allocation11 + $0x78] sm:$0xff]  ;;  %v7145_v54 = vmov 920167782  }
 0x150   : > { %2376 = vperm.xlu0 %4255, %v2338_v3   ;;  %2386 = vperm.xlu1 %4256, %v2340_v4   ;;  %v2351_v17 = vld [vmem:[#allocation11 + $0x70] sm:$0xff]  ;;  %v2069_v19 = vand.u32 2139095040, %v5306_v16  ;;  %v2353_v20 = vld [vmem:[#allocation11 + $0x80] sm:$0xff]  ;;  %v2354_v21 = vld [vmem:[#allocation11 + $0x88] sm:$0xff]  ;;  %v2066_v35 = vand.u32 2147483647, %v5306_v16 }
 0x151   : > { %v2355_v23 = vld [vmem:[#allocation11 + $0x90] sm:$0xff]  ;;  %v2356_v24 = vld [vmem:[#allocation11 + $0x98] sm:$0xff]  ;;  %v2357_v26 = vld [vmem:[#allocation11 + $0xa0] sm:$0xff]  ;;  %v7147_v63 = vmov 1326507024   ;;  %vm2068_vm8 = vcmp.lt.s32.totalorder %v5306_v16, 0 }
 0x152   : > { %v2070_v22 = vshrl.u32 %v2069_v19, 23  ;;  %v2358_v28 = vld [vmem:[#allocation11 + $0xa8] sm:$0xff]  ;;  %v2359_v29 = vld [vmem:[#allocation11 + $0xb0] sm:$0xff]  ;;  %v2360_v30 = vld [vmem:[#allocation11 + $0xb8] sm:$0xff]  ;;  %v2073_v39 = vand.u32 8388607, %v2066_v35 }
 0x153   : > { %v2361_v33 = vld [vmem:[#allocation11 + $0xc0] sm:$0xff]  ;;  %v2362_v34 = vld [vmem:[#allocation11 + $0xc8] sm:$0xff]  ;;  %v2363_v37 = vld [vmem:[#allocation11 + $0xd0] sm:$0xff]  ;;  %vm2067_vm9 = vcmp.le.f32.partialorder %v2066_v35, 0.7853982  ;;  %v2274_v35 = vlaneseq  ;;  %s7280_s27 = sld [smem:[#allocation49_spill]] }
 0x154   : > { %2391 = vperm.xlu0 %4255, %v2341_v5   ;;  %2396 = vperm.xlu1 %4256, %v2342_v6   ;;  %v3791_v25 = vadd.s32 4294967169, %v2070_v22  ;;  %v2364_v38 = vld [vmem:[#allocation11 + $0xd8] sm:$0xff]  ;;  %v2365_v47 = vld [vmem:[#allocation11 + $0xe0] sm:$0xff]  ;;  %v2366_v48 = vld [vmem:[#allocation11 + $0xe8] sm:$0xff]  ;;  %v2074_v57 = vor.u32 8388608, %v2073_v39  ;;  %s3519_s19 = scalar_lea.sflag [#allocation4], %s5261_s7 }
 0x155   : > { %v2367_v60 = vld [vmem:[#allocation11 + $0xf0] sm:$0xff]  ;;  %v2368_v61 = vld [vmem:[#allocation11 + $0xf8] sm:$0xff]  ;;  %v2963_v7 = vld [vmem:[#allocation14 + $0x80] sm:$0xff]  ;;  %s4738_s5 = scalar_lea.vmem %s7063_s23, 32  ;;  %p7281_p10 = scmp.ne.s32.totalorder %s7278_s25, 0 }
 0x156   : > { %v2076_v27 = vadd.s32 1, %v3791_v25  ;;  %v2114_v6 = vshll.u32 %v2074_v57, 8  ;;  %p4739_p8 = scmp.ne.s32.totalorder %s7063_s23, %s4738_s5  ;;  %s4853_s18 = smov [#allocation19]  }
 0x157   : > { %s4742_s29 = sshll.u32 %s4853_s18, 4  ;;  %s4743_s29 = int_to_ptr.vmem [resolvable:$false] %s4742_s29 }
 0x158   : > { %2401 = vperm.xlu0 %4255, %v2343_v8   ;;  %2406 = vperm.xlu1 %4256, %v2344_v9   ;;  %vm2077_vm1 = vcmp.gt.s32.totalorder %v2076_v27, 0  ;;  %v2964_v8 = vld [vmem:[#allocation14 + $0x88] sm:$0xff]  ;;  %p4740_p5 = pnand %p4739_p8, %p7281_p10  ;;  %s4744_s30 = scalar_lea.vmem %s4743_s29, 64 }
 0x159   : > { %v2078_v31 = vsel %vm2077_vm1, %v2076_v27, 0  ;;  %vm2158_vm1 = vweird.f32 %v5306_v16  ;;  %s7061_s26 = scalar_lea.hbm %s7280_s27, %s3834_s12  ;;  %p4745_p13 = scmp.lt.s32.totalorder %s7063_s23, %s4743_s29 }
 0x15a   : > { %v2080_v32 = vand.u32 31, %v2078_v31  ;;  %v2079_v49 = vshrl.u32 %v2078_v31, 5  ;;  %p4741_p9 = pneg %p4740_p5  ;;  %p4746_p0 = scmp.lt.s32.totalorder %s4744_s30, %s4738_s5 }
 0x15c   : > { %2411 = vperm.xlu0 %4255, %v2345_v10   ;;  %2416 = vperm.xlu1 %4256, %v2346_v11   ;;  %v2081_v36 = vsub.s32 32, %v2080_v32  ;;  %v2083_v41 = vshll.u32 %v7156_v40, %v2080_v32  ;;  %v2086_v44 = vshll.u32 %v7154_v42, %v2080_v32  ;;  %v2092_v51 = vshll.u32 %v7143_v50, %v2080_v32  ;;  %p4747_p12 = por %p4746_p0, %p4745_p13 }
 0x15d   : > { %v2089_v52 = vshll.u32 %v7151_v45, %v2080_v32  ;;  %v2095_v56 = vshll.u32 %v7145_v54, %v2080_v32  ;;  %vm2098_vm2 = vcmp.lt.s32.totalorder %v2079_v49, 1  ;;  %vm2101_vm3 = vcmp.lt.s32.totalorder %v2079_v49, 4  ;;  %v2949_v32 = vld [vmem:[#allocation14 + $0x10] sm:$0xff] }
 0x15e   : > { %v2084_v43 = vshrl.u32 %v7154_v42, %v2081_v36  ;;  %v2087_v46 = vshrl.u32 %v7151_v45, %v2081_v36  ;;  %v2090_v53 = vshrl.u32 %v7143_v50, %v2081_v36  ;;  %v2093_v55 = vshrl.u32 %v7145_v54, %v2081_v36  ;;  %p4748_p11 = pnand %p4747_p12, %p4741_p9 }
 0x15f   : > { %v2096_v0 = vshrl.u32 %v7147_v63, %v2081_v36  ;;  %v2082_v1 = vshrl.u32 %v7156_v40, %v2081_v36  ;;  %vm2100_vm4 = vcmp.lt.s32.totalorder %v2079_v49, 3  ;;  %vm2099_vm5 = vcmp.lt.s32.totalorder %v2079_v49, 2  ;;  %v2970_v49 = vld [vmem:[#allocation14 + $0xb8] sm:$0xff] }
 0x160   : > { %2421 = vperm.xlu0 %4255, %v2347_v12   ;;  %2426 = vperm.xlu1 %4256, %v2348_v13   ;;  %v2085_v58 = vor.u32 %v2084_v43, %v2083_v41  ;;  %v2088_v59 = vor.u32 %v2087_v46, %v2086_v44  ;;  %v2094_v62 = vor.u32 %v2093_v55, %v2092_v51  ;;  %v2951_v43 = vld [vmem:[#allocation14 + $0x20] sm:$0xff]  ;;  %v2952_v44 = vld [vmem:[#allocation14 + $0x28] sm:$0xff]  ;;  %v2954_v55 = vld [vmem:[#allocation14 + $0x38] sm:$0xff] }
 0x161   : > { %v2091_v2 = vor.u32 %v2090_v53, %v2089_v52  ;;  %v2097_v3 = vor.u32 %v2096_v0, %v2095_v56  ;;  %v2953_v53 = vld [vmem:[#allocation14 + $0x30] sm:$0xff] }
 0x162   : > { %v2106_v5 = vsel %vm2098_vm2, %v2085_v58, %v2088_v59  ;;  %v2107_v9 = vsel %vm2101_vm3, %v2094_v62, 920167782  ;;  %v2102_v10 = vsel %vm2098_vm2, %v2082_v1, %v2085_v58 }
 0x163   : > { %v2103_v4 = vsel %vm2101_vm3, %v2091_v2, 2102212464  ;;  %v2108_v12 = vsel %vm2100_vm4, %v2091_v2, %v2107_v9  ;;  %v2110_v13 = vsel %vm2098_vm2, %v2088_v59, %v2091_v2  ;;  %vm2291_vm2 = vcmask 1040384  }
 0x164   : > { %2431 = vperm.xlu0 %4255, %v2349_v14   ;;  %2436 = vperm.xlu1 %4256, %v2350_v15   ;;  %v2104_v11 = vsel %vm2100_vm4, %v2088_v59, %v2103_v4  ;;  %v2109_v14 = vsel %vm2099_vm5, %v2106_v5, %v2108_v12  ;;  %v2111_v15 = vsel %vm2101_vm3, %v2097_v3, 1326507024  ;;  %v2955_v4 = vld [vmem:[#allocation14 + $0x40] sm:$0xff]  ;;  %v2956_v5 = vld [vmem:[#allocation14 + $0x48] sm:$0xff]  ;;  %vm2293_vm3 = vcmask 1041408  }
 0x165   : > { %v2105_v22 = vsel %vm2099_vm5, %v2102_v10, %v2104_v11  ;;  %v2973_v10 = vld [vmem:[#allocation14 + $0xd0] sm:$0xff]  ;;  %v2974_v11 = vld [vmem:[#allocation14 + $0xd8] sm:$0xff] }
 0x168   : > { %2441 = vperm.xlu0 %4255, %v2351_v17   ;;  %2446 = vperm.xlu1 %4256, %v2352_v18   ;;  %v2112_v17 = vsel %vm2100_vm4, %v2094_v62, %v2111_v15  ;;  %v5333_v18 = vmul.u32.u64.low %v2114_v6, %v2109_v14  ;;  %v5334_v19 = vmul.u32.u64.high %v2114_v6, %v2109_v14, %v5333_v18  ;;  %v2972_v62 = vld [vmem:[#allocation14 + $0xc8] sm:$0xff]  ;;  %v2957_v15 = vld [vmem:[#allocation14 + $0x50] sm:$0xff]  ;;  %vm2295_vm4 = vcmask 1042432  }
 0x16a   : > { %v2124_v27 = vadd.s32 1, %v5334_v19 }
 0x16c   : > { %2451 = vperm.xlu0 %4255, %v2353_v20   ;;  %2456 = vperm.xlu1 %4256, %v2354_v21   ;;  %v2947_v20 = vld [vmem:[#allocation14] sm:$0xff]  ;;  %v2948_v21 = vld [vmem:[#allocation14 + $0x8] sm:$0xff] }
 0x170   : > { %2461 = vperm.xlu0 %4255, %v2355_v23   ;;  %2466 = vperm.xlu1 %4256, %v2356_v24   ;;  %v2113_v23 = vsel %vm2099_vm5, %v2110_v13, %v2112_v17  ;;  %v2958_v17 = vld [vmem:[#allocation14 + $0x58] sm:$0xff]  ;;  %vm2297_vm5 = vcmask 1043456  }
 0x171   : > { %v5338_v24 = vmul.u32.u64.low %v2114_v6, %v2113_v23  ;;  %v5339_v25 = vmul.u32.u64.high %v2114_v6, %v2113_v23, %v5338_v24 }
 0x172   : > { %v2959_v24 = vld [vmem:[#allocation14 + $0x60] sm:$0xff] }
 0x173   : > { %vm2123_vm6 = vc.u32 %v5339_v25, %v5333_v18  ;;  %v2122_v56 = vadd.s32 %v5333_v18, %v5339_v25  ;;  %v2960_v25 = vld [vmem:[#allocation14 + $0x68] sm:$0xff] }
 0x174   : > { %2471 = vperm.xlu0 %4255, %v2357_v26   ;;  %2476 = vperm.xlu1 %4256, %v2358_v28   ;;  %v2121_v26 = vmul.u32 %v2114_v6, %v2105_v22  ;;  %v2965_v28 = vld [vmem:[#allocation14 + $0x90] sm:$0xff]  ;;  %v2976_v22 = vld [vmem:[#allocation14 + $0xe8] sm:$0xff] }
 0x178   : > { %2481 = vperm.xlu0 %4255, %v2359_v29   ;;  %2486 = vperm.xlu1 %4256, %v2360_v30   ;;  %v2966_v29 = vld [vmem:[#allocation14 + $0x98] sm:$0xff]  ;;  %v2125_v30 = vsel %vm2123_vm6, %v2124_v27, %v5334_v19  ;;  %vm2299_vm6 = vcmask 1044480  }
 0x179   : > { %v2126_v31 = vadd.s32 %v2125_v30, %v2121_v26  ;;  %v5349_v30 = vshrl.u32 %v2274_v35, 7  ;;  %v2330_v35 = vld [vmem:[#allocation10 + $0xc8] sm:$0xff] }
 0x17b   : > { %7218 = vst [vmem:[#allocation35_spill] sm:$0xff] %v5349_v30 }
 0x17c   : > { %2491 = vperm.xlu0 %4255, %v2361_v33   ;;  %2496 = vperm.xlu1 %4256, %v2362_v34   ;;  %v2950_v33 = vld [vmem:[#allocation14 + $0x18] sm:$0xff]  ;;  %v2127_v34 = vadd.s32 536870912, %v2126_v31 }
 0x17e   : > { %v2128_v36 = vshrl.u32 %v2127_v34, 30 }
 0x180   : > { %2501 = vperm.xlu0 %4255, %v2363_v37   ;;  %2506 = vperm.xlu1 %4256, %v2364_v38   ;;  %v2967_v37 = vld [vmem:[#allocation14 + $0xa0] sm:$0xff]  ;;  %v2968_v38 = vld [vmem:[#allocation14 + $0xa8] sm:$0xff]  ;;  %v2129_v39 = vshll.u32 %v2128_v36, 30  ;;  %v2152_v9 = vsub.s32 4, %v2128_v36 }
 0x182   : > { %v2130_v41 = vsub.s32 %v2126_v31, %v2129_v39  ;;  %v2153_v14 = vsel %vm2068_vm8, %v2152_v9, %v2128_v36  ;;  %v2961_v36 = vld [vmem:[#allocation14 + $0x70] sm:$0xff]  ;;  %v2314_v9 = vld [vmem:[#allocation10 + $0x48] sm:$0xff] }
 0x184   : > { %2511 = vperm.xlu0 %4255, %v2365_v47   ;;  %2516 = vperm.xlu1 %4256, %v2366_v48   ;;  %v2132_v46 = vsub.s32 0, %v2130_v41  ;;  %v2969_v48 = vld [vmem:[#allocation14 + $0xb0] sm:$0xff] }
 0x186   : > { %v3792_v47 = vmin.u32 %v2132_v46, %v2130_v41 }
 0x188   : > { %2521 = vperm.xlu0 %4255, %v2367_v60   ;;  %2526 = vperm.xlu1 %4256, %v2368_v61   ;;  %v2134_v51 = vclz %v3792_v47  ;;  %v2971_v61 = vld [vmem:[#allocation14 + $0xc0] sm:$0xff] }
 0x18a   : > { %v3793_v52 = vadd.s32 4294967294, %v2134_v51 }
 0x18c   : > { %3061 = vperm.xlu0 %4255, %v2963_v7   ;;  %3066 = vperm.xlu1 %4256, %v2964_v8   ;;  %vm3794_vm7 = vcmp.lt.s32.totalorder %v3793_v52, 0 }
 0x18d   : > { %v2137_v57 = vsel %vm3794_vm7, 0, %v3793_v52  ;;  %vm2301_vm7 = vcmask 1045504  }
 0x18e   : > { %v2138_v58 = vsub.s32 32, %v2137_v57  ;;  %v2139_v59 = vshll.u32 %v2130_v41, %v2137_v57  ;;  %v2142_v60 = vsub.s32 4294967266, %v2137_v57 }
 0x190   : > { %2981 = vperm.xlu0 %4255, %v2947_v20   ;;  %2986 = vperm.xlu1 %4256, %v2948_v21   ;;  %v2140_v0 = vshrl.u32 %v2122_v56, %v2138_v58  ;;  %v2143_v1 = vadd.s32 127, %v2142_v60  ;;  %v2155_v20 = vsel %vm2067_vm9, 0, %v2153_v14  ;;  %v2975_v21 = vld [vmem:[#allocation14 + $0xe0] sm:$0xff]  ;;  %v2319_v14 = vld [vmem:[#allocation10 + $0x70] sm:$0xff] }
 0x191   : > { %v2262_v23 = vadd.s32 3, %v2155_v20  ;;  %v2159_v26 = vand.u32 3, %v2155_v20  ;;  %v3397_v56 = vld [vmem:[#allocation17] sm:$0x3]  ;;  %v2324_v20 = vld [vmem:[#allocation10 + $0x98] sm:$0xff] }
 0x192   : > { %v2141_v2 = vor.u32 %v2140_v0, %v2139_v59  ;;  %v2144_v3 = vshll.u32 %v2143_v1, 23  ;;  %v2306_v1 = vld [vmem:[#allocation10 + $0x8] sm:$0xff] }
 0x193   : > { %v2263_v27 = vand.u32 3, %v2262_v23  ;;  %vm2164_vm10 = vcmp.eq.s32.totalorder %v2159_v26, 2  ;;  %vm2161_vm12 = vcmp.eq.s32.totalorder %v2159_v26, 0  ;;  %vm2160_vm14 = vcmp.lt.s32.totalorder %v2159_v26, 2  ;;  %v2327_v23 = vld [vmem:[#allocation10 + $0xb0] sm:$0xff] }
 0x194   : > { %3071 = vperm.xlu0 %4255, %v2965_v28   ;;  %3076 = vperm.xlu1 %4256, %v2966_v29   ;;  %v2145_v6 = vor.u32 4788187, %v2144_v3  ;;  %v2148_v7 = vcvt.s32.f32 %v2141_v2  ;;  %v2977_v28 = vld [vmem:[#allocation14 + $0xf0] sm:$0xff]  ;;  %v2978_v29 = vld [vmem:[#allocation14 + $0xf8] sm:$0xff] }
 0x195   : > { %vm2268_vm11 = vcmp.eq.s32.totalorder %v2263_v27, 2  ;;  %vm2265_vm13 = vcmp.eq.s32.totalorder %v2263_v27, 0  ;;  %vm2264_vm15 = vcmp.lt.s32.totalorder %v2263_v27, 2  ;;  %v2307_v2 = vld [vmem:[#allocation10 + $0x10] sm:$0xff]  ;;  %v2308_v3 = vld [vmem:[#allocation10 + $0x18] sm:$0xff] }
 0x196   : > { %v2146_v8 = vand.u32 2147483647, %v2145_v6  ;;  %v2311_v6 = vld [vmem:[#allocation10 + $0x30] sm:$0xff]  ;;  %v2332_v27 = vld [vmem:[#allocation10 + $0xd8] sm:$0xff] }
 0x197   : > { %v2331_v26 = vld [vmem:[#allocation10 + $0xd0] sm:$0xff] }
 0x198   : > { %2991 = vperm.xlu0 %4255, %v2949_v32   ;;  %2996 = vperm.xlu1 %4256, %v2950_v33   ;;  %v2149_v12 = vmul.f32 %v2148_v7, %v2146_v8  ;;  %v2312_v7 = vld [vmem:[#allocation10 + $0x38] sm:$0xff]  ;;  %v2313_v8 = vld [vmem:[#allocation10 + $0x40] sm:$0xff] }
 0x19a   : > { %v2150_v13 = vxor.u32 2147483648, %v2149_v12 }
 0x19c   : > { %3081 = vperm.xlu0 %4255, %v2967_v37   ;;  %3086 = vperm.xlu1 %4256, %v2968_v38   ;;  %v2151_v18 = vsel %vm2068_vm8, %v2150_v13, %v2149_v12  ;;  %v2962_v37 = vld [vmem:[#allocation14 + $0x78] sm:$0xff]  ;;  %vm2303_vm8 = vcmask 1046528   ;;  %v2317_v12 = vld [vmem:[#allocation10 + $0x60] sm:$0xff]  ;;  %v2318_v13 = vld [vmem:[#allocation10 + $0x68] sm:$0xff] }
 0x19d   : > { %v2154_v19 = vsel %vm2067_vm9, %v5306_v16, %v2151_v18  ;;  %v5352_v38 = vld [vmem:[%s5267_s13] sm:$0x1]  ;;  %v2322_v18 = vld [vmem:[#allocation10 + $0x88] sm:$0xff] }
 0x19e   : > { %4257 = vcosq.f32 %v2154_v19 }
 0x19f   : > { %4259 = vsinq.f32 %v2154_v19  ;;  %v2323_v19 = vld [vmem:[#allocation10 + $0x90] sm:$0xff] }
 0x1a0   : > { %3001 = vperm.xlu0 %4255, %v2951_v43   ;;  %3006 = vperm.xlu1 %4256, %v2952_v44   ;;  %v7139_v43 = vsub.s32 0, %v5349_v30  ;;  %v558_v44 = vld [vmem:[%s5267_s13 + $0x1] sm:$0x1] }
 0x1a1   : > { %v2283_v57 = vrot.slane %v558_v44, 5 }
 0x1a4   : > { %3091 = vperm.xlu0 %4255, %v2969_v48   ;;  %3096 = vperm.xlu1 %4256, %v2970_v49   ;;  %v4449_v48 = vld [vmem:[%s5281_s20] ss:$0 sm:$0xff] }
 0x1a8   : > { %3011 = vperm.xlu0 %4255, %v2953_v53   ;;  %3016 = vperm.xlu1 %4256, %v2954_v55   ;;  %v4258_v31 = vpop.eup %4257  ;;  %v2280_v55 = vrot.slane %v5352_v38, 6 }
 0x1a9   : > { %v4260_v32 = vpop.eup %4259  ;;  %v2165_v33 = vxor.u32 2147483648, %v4258_v31 }
 0x1aa   : > { %v2162_v34 = vxor.u32 2147483648, %v4260_v32 }
 0x1ab   : > { %v2166_v39 = vsel %vm2164_vm10, %v2165_v33, %v4260_v32  ;;  %v2270_v41 = vsel %vm2268_vm11, %v2165_v33, %v4260_v32  ;;  %v2336_v32 = vld [vmem:[#allocation10 + $0xf8] sm:$0xff]  ;;  %v4851_v33 = vmov 0.0|0.0  }
 0x1ac   : > { %3101 = vperm.xlu0 %4255, %v2971_v61   ;;  %3106 = vperm.xlu1 %4256, %v2972_v62   ;;  %v2163_v46 = vsel %vm2161_vm12, %v4258_v31, %v2162_v34  ;;  %v2267_v47 = vsel %vm2265_vm13, %v4258_v31, %v2162_v34  ;;  %v2335_v31 = vld [vmem:[#allocation10 + $0xf0] sm:$0xff]  ;;  %v2884_v34 = vld [vmem:[#allocation13 + $0x8] sm:$0xff] }
 0x1ad   : > { %v2167_v49 = vsel %vm2160_vm14, %v2163_v46, %v2166_v39  ;;  %v2271_v51 = vsel %vm2264_vm15, %v2267_v47, %v2270_v41  ;;  %4035 = vmatprep.subr.bf16.mxu1 %v4851_v33 }
 0x1ae   : > { %v2168_v52 = vsel %vm2158_vm1, nan, %v2167_v49  ;;  %v2272_v53 = vsel %vm2158_vm1, nan, %v2271_v51 }
 0x1af   : > { %v2277_v16 = vrot.slane %v2272_v53, %v7139_v43 }
 0x1b0   : > { %3021 = vperm.xlu0 %4255, %v2955_v4   ;;  %3026 = vperm.xlu1 %4256, %v2956_v5   ;;  %v2309_v4 = vld [vmem:[#allocation10 + $0x20] sm:$0xff]  ;;  %v2310_v5 = vld [vmem:[#allocation10 + $0x28] sm:$0xff] }
 0x1b1   : > { %v2292_v58 = vsel %vm2291_vm2, %v2168_v52, %v2277_v16 }
 0x1b2   : > { %v2294_v59 = vsel %vm2293_vm3, %v2292_v58, %v2280_v55 }
 0x1b3   : > { %v2296_v60 = vsel %vm2295_vm4, %v2294_v59, %v2283_v57 }
 0x1b4   : > { %3111 = vperm.xlu0 %4255, %v2973_v10   ;;  %3116 = vperm.xlu1 %4256, %v2974_v11   ;;  %v2298_v61 = vsel %vm2297_vm5, %v2296_v60, %v4449_v48  ;;  %v2315_v10 = vld [vmem:[#allocation10 + $0x50] sm:$0xff]  ;;  %v2316_v11 = vld [vmem:[#allocation10 + $0x58] sm:$0xff] }
 0x1b5   : > { %v2300_v62 = vsel %vm2299_vm6, %v2298_v61, 0.0 }
 0x1b6   : > { %v2302_v0 = vsel %vm2301_vm7, %v2300_v62, 0.0 }
 0x1b7   : > { %3905 = vmatprep.subr.msk.mxu0 %vm2303_vm8, %v2302_v0 }
 0x1b8   : > { %3031 = vperm.xlu0 %4255, %v2957_v15   ;;  %3036 = vperm.xlu1 %4256, %v2958_v17   ;;  %v2320_v15 = vld [vmem:[#allocation10 + $0x78] sm:$0xff]  ;;  %v2321_v17 = vld [vmem:[#allocation10 + $0x80] sm:$0xff] }
 0x1b9   : > { %3906 = vmatpush3.msk.msra.mxu0 %vm2303_vm8, %v2302_v0 }
 0x1ba   : > { %3908 = vmatmul.mubr.msk.f32.vlgmr.msra.gmra.mrb[0].mxu0 %vm2529_vm0, %v2306_v1  ;;  %3955 = vmatprep.subr.bf16.mxu0 %v4851_v33 }
 0x1bb   : > { %3910 = vmatprep.mubr.msk.f32.mxu0 %vm2529_vm0, %v2307_v2 }
 0x1bc   : > { %3121 = vperm.xlu0 %4255, %v2975_v21   ;;  %3126 = vperm.xlu1 %4256, %v2976_v22   ;;  %v2325_v21 = vld [vmem:[#allocation10 + $0xa0] sm:$0xff]  ;;  %v2326_v22 = vld [vmem:[#allocation10 + $0xa8] sm:$0xff] }
 0x1be   : > { %3911 = vmatmul.mubr.msk.f32.gmra.mrb[2].mxu0 %vm2529_vm0, %v2308_v3 }
 0x1bf   : > { %3913 = vmatprep.mubr.msk.f32.mxu0 %vm2529_vm0, %v2309_v4 }
 0x1c0   : > { %3041 = vperm.xlu0 %4255, %v2959_v24   ;;  %3046 = vperm.xlu1 %4256, %v2960_v25   ;;  %v2328_v24 = vld [vmem:[#allocation10 + $0xb8] sm:$0xff]  ;;  %v2329_v25 = vld [vmem:[#allocation10 + $0xc0] sm:$0xff] }
 0x1c2   : > { %3914 = vmatmul.mubr.msk.f32.gmra.mrb[4].mxu0 %vm2529_vm0, %v2310_v5 }
 0x1c3   : > { %3916 = vmatprep.mubr.msk.f32.mxu0 %vm2529_vm0, %v2311_v6 }
 0x1c4   : > { %3131 = vperm.xlu0 %4255, %v2977_v28   ;;  %3136 = vperm.xlu1 %4256, %v2978_v29   ;;  %v2333_v28 = vld [vmem:[#allocation10 + $0xe0] sm:$0xff]  ;;  %v2334_v29 = vld [vmem:[#allocation10 + $0xe8] sm:$0xff] }
 0x1c6   : > { %3917 = vmatmul.mubr.msk.f32.gmra.mrb[6].mxu0 %vm2529_vm0, %v2312_v7 }
 0x1c7   : > { %3919 = vmatprep.mubr.msk.f32.mxu0 %vm2529_vm0, %v2313_v8 }
 0x1c8   : > { %3051 = vperm.xlu0 %4255, %v2961_v36   ;;  %3056 = vperm.xlu1 %4256, %v2962_v37   ;;  %v2914_v36 = vld [vmem:[#allocation13 + $0xf8] sm:$0xff] }
 0x1c9   : > { %3278 = vmatprep.mubr.f32.mxu1 %v2914_v36 }
 0x1ca   : > { %3920 = vmatmul.mubr.msk.f32.gmra.mrb[8].mxu0 %vm2529_vm0, %v2314_v9 }
 0x1cb   : > { %3922 = vmatprep.mubr.msk.f32.mxu0 %vm2529_vm0, %v2315_v10  ;;  %v2382_v37 = vpop.permute.xlu1 %2381  ;;  %v2372_v39 = vpop.permute.xlu0 %2371 }
 0x1cc   : > { %3400 = vperm.xlu0 %4255, %v3397_v56  }
 0x1ce   : > { %3923 = vmatmul.mubr.msk.f32.gmra.mrb[10].mxu0 %vm2529_vm0, %v2316_v11 }
 0x1cf   : > { %3925 = vmatprep.mubr.msk.f32.mxu0 %vm2529_vm0, %v2317_v12  ;;  %v2387_v41 = vpop.permute.xlu1 %2386  ;;  %v2377_v44 = vpop.permute.xlu0 %2376 }
 0x1d2   : > { %3926 = vmatmul.mubr.msk.f32.gmra.mrb[12].mxu0 %vm2529_vm0, %v2318_v13 }
 0x1d3   : > { %3928 = vmatprep.mubr.msk.f32.mxu0 %vm2529_vm0, %v2319_v14  ;;  %v2397_v46 = vpop.permute.xlu1 %2396  ;;  %v2392_v47 = vpop.permute.xlu0 %2391 }
 0x1d6   : > { %3929 = vmatmul.mubr.msk.f32.gmra.mrb[14].mxu0 %vm2529_vm0, %v2320_v15 }
 0x1d7   : > { %3931 = vmatprep.mubr.msk.f32.mxu0 %vm2529_vm0, %v2321_v17  ;;  %v2407_v48 = vpop.permute.xlu1 %2406  ;;  %v2402_v49 = vpop.permute.xlu0 %2401 }
 0x1da   : > { %3932 = vmatmul.mubr.msk.f32.gmra.mrb[16].mxu0 %vm2529_vm0, %v2322_v18 }
 0x1db   : > { %3934 = vmatprep.mubr.msk.f32.mxu0 %vm2529_vm0, %v2323_v19  ;;  %v2417_v51 = vpop.permute.xlu1 %2416  ;;  %v2412_v52 = vpop.permute.xlu0 %2411 }
 0x1de   : > { %3935 = vmatmul.mubr.msk.f32.gmra.mrb[18].mxu0 %vm2529_vm0, %v2324_v20 }
 0x1df   : > { %3937 = vmatprep.mubr.msk.f32.mxu0 %vm2529_vm0, %v2325_v21  ;;  %v2427_v53 = vpop.permute.xlu1 %2426  ;;  %v2422_v56 = vpop.permute.xlu0 %2421 }
 0x1e2   : > { %3938 = vmatmul.mubr.msk.f32.gmra.mrb[20].mxu0 %vm2529_vm0, %v2326_v22 }
 0x1e3   : > { %3940 = vmatprep.mubr.msk.f32.mxu0 %vm2529_vm0, %v2327_v23  ;;  %v2437_v62 = vpop.permute.xlu1 %2436  ;;  %v2432_v1 = vpop.permute.xlu0 %2431 }
 0x1e6   : > { %3941 = vmatmul.mubr.msk.f32.gmra.mrb[22].mxu0 %vm2529_vm0, %v2328_v24 }
 0x1e7   : > { %3943 = vmatprep.mubr.msk.f32.mxu0 %vm2529_vm0, %v2329_v25  ;;  %v2447_v6 = vpop.permute.xlu1 %2446  ;;  %v2442_v9 = vpop.permute.xlu0 %2441 }
 0x1ea   : > { %3944 = vmatmul.mubr.msk.f32.gmra.mrb[24].mxu0 %vm2529_vm0, %v2330_v35 }
 0x1eb   : > { %3946 = vmatprep.mubr.msk.f32.mxu0 %vm2529_vm0, %v2331_v26  ;;  %v2457_v21 = vpop.permute.xlu1 %2456  ;;  %v2452_v23 = vpop.permute.xlu0 %2451 }
 0x1ee   : > { %3947 = vmatmul.mubr.msk.f32.gmra.mrb[26].mxu0 %vm2529_vm0, %v2332_v27 }
 0x1ef   : > { %3949 = vmatprep.mubr.msk.f32.mxu0 %vm2529_vm0, %v2333_v28 }
 0x1f2   : > { %3950 = vmatmul.mubr.msk.f32.gmra.mrb[28].mxu0 %vm2529_vm0, %v2334_v29 }
 0x1f3   : > { %3952 = vmatprep.mubr.msk.f32.mxu0 %vm2529_vm0, %v2335_v31 }
 0x1f6   : > { %3953 = vmatmul.mubr.msk.f32.gmra.mrb[30].mxu0 %vm2529_vm0, %v2336_v32  ;;  %v2467_v32 = vpop.permute.xlu1 %2466 }
 0x1f7   : > { %3203 = vmatprep.mubr.f32.mxu0 %v2884_v34 }
 0x28d   : > { %v3909_v55 = vpop.f32.mrb[0].mxu0 }
 0x28e   : > { %v2698_v16 = vadd.f32 %v3909_v55, %v2377_v44  ;;  %v2692_v57 = vpop.f32.mrb[1].mxu0  ;;  %v2477_v55 = vpop.permute.xlu1 %2476 }
 0x28f   : > { %v2693_v58 = vadd.f32 %v2692_v57, %v2372_v39 }
 0x290   : > { %4261 = vtanh.f32 %v2698_v16 }
 0x291   : > { %4263 = vtanh.f32 %v2693_v58  ;;  %v3912_v59 = vpop.f32.mrb[2].mxu0 }
 0x292   : > { %v2708_v60 = vadd.f32 %v3912_v59, %v2387_v41  ;;  %v2702_v61 = vpop.f32.mrb[3].mxu0 }
 0x293   : > { %v2703_v0 = vadd.f32 %v2702_v61, %v2382_v37  ;;  %v2462_v37 = vpop.permute.xlu0 %2461 }
 0x294   : > { %4265 = vtanh.f32 %v2708_v60 }
 0x295   : > { %4267 = vtanh.f32 %v2703_v0  ;;  %v3915_v2 = vpop.f32.mrb[4].mxu0 }
 0x296   : > { %v2718_v3 = vadd.f32 %v3915_v2, %v2397_v46  ;;  %v2712_v4 = vpop.f32.mrb[5].mxu0  ;;  %v2487_v2 = vpop.permute.xlu1 %2486 }
 0x297   : > { %v2713_v5 = vadd.f32 %v2712_v4, %v2392_v47  ;;  %v2472_v16 = vpop.permute.xlu0 %2471 }
 0x298   : > { %4269 = vtanh.f32 %v2718_v3 }
 0x299   : > { %4271 = vtanh.f32 %v2713_v5  ;;  %v3918_v7 = vpop.f32.mrb[6].mxu0 }
 0x29a   : > { %v4262_v8 = vpop.eup %4261  ;;  %v2728_v10 = vadd.f32 %v3918_v7, %v2407_v48  ;;  %v2722_v11 = vpop.f32.mrb[7].mxu0 }
 0x29b   : > { %v4264_v12 = vpop.eup %4263  ;;  %v2723_v13 = vadd.f32 %v2722_v11, %v2402_v49  ;;  %v2482_v5 = vpop.permute.xlu0 %2481 }
 0x29c   : > { %4273 = vtanh.f32 %v2728_v10  ;;  %v3956_v14 = vpack.c.bf16 %v4262_v8, %v4264_v12 }
 0x29d   : > { %4275 = vtanh.f32 %v2723_v13  ;;  %v3921_v15 = vpop.f32.mrb[8].mxu0 }
 0x29e   : > { %v4266_v17 = vpop.eup %4265  ;;  %v2738_v18 = vadd.f32 %v3921_v15, %v2417_v51  ;;  %v2732_v19 = vpop.f32.mrb[9].mxu0  ;;  %3957 = vmatpush1.bf16.msra.mxu0 %v3956_v14  ;;  %4051 = vmatpush1.bf16.msra.mxu1 %v3956_v14 }
 0x29f   : > { %v4268_v20 = vpop.eup %4267  ;;  %v2733_v22 = vadd.f32 %v2732_v19, %v2412_v52  ;;  %3958 = vmatprep.subr.bf16.mxu0 %v4851_v33  ;;  %4036 = vmatprep.subr.bf16.mxu1 %v4851_v33  ;;  %v2492_v19 = vpop.permute.xlu0 %2491 }
 0x2a0   : > { %4277 = vtanh.f32 %v2738_v18  ;;  %v3959_v24 = vpack.c.bf16 %v4266_v17, %v4268_v20  ;;  %v2497_v17 = vpop.permute.xlu1 %2496 }
 0x2a1   : > { %4279 = vtanh.f32 %v2733_v22  ;;  %v3924_v25 = vpop.f32.mrb[10].mxu0 }
 0x2a2   : > { %v4270_v35 = vpop.eup %4269  ;;  %v2748_v26 = vadd.f32 %v3924_v25, %v2427_v53  ;;  %v2742_v27 = vpop.f32.mrb[11].mxu0  ;;  %3960 = vmatpush1.bf16.msra.mxu0 %v3959_v24  ;;  %4052 = vmatpush1.bf16.msra.mxu1 %v3959_v24 }
 0x2a3   : > { %v4272_v28 = vpop.eup %4271  ;;  %v2743_v29 = vadd.f32 %v2742_v27, %v2422_v56  ;;  %3961 = vmatprep.subr.bf16.mxu0 %v4851_v33  ;;  %4037 = vmatprep.subr.bf16.mxu1 %v4851_v33 }
 0x2a4   : > { %4281 = vtanh.f32 %v2748_v26  ;;  %v3962_v31 = vpack.c.bf16 %v4270_v35, %v4272_v28  ;;  %v2507_v27 = vpop.permute.xlu1 %2506 }
 0x2a5   : > { %4283 = vtanh.f32 %v2743_v29  ;;  %v3927_v34 = vpop.f32.mrb[12].mxu0 }
 0x2a6   : > { %v4274_v36 = vpop.eup %4273  ;;  %v2758_v39 = vadd.f32 %v3927_v34, %v2437_v62  ;;  %v2752_v41 = vpop.f32.mrb[13].mxu0  ;;  %3963 = vmatpush1.bf16.msra.mxu0 %v3962_v31  ;;  %4053 = vmatpush1.bf16.msra.mxu1 %v3962_v31 }
 0x2a7   : > { %v4276_v44 = vpop.eup %4275  ;;  %v2753_v46 = vadd.f32 %v2752_v41, %v2432_v1  ;;  %3964 = vmatprep.subr.bf16.mxu0 %v4851_v33  ;;  %4038 = vmatprep.subr.bf16.mxu1 %v4851_v33  ;;  %v2502_v31 = vpop.permute.xlu0 %2501 }
 0x2a8   : > { %4285 = vtanh.f32 %v2758_v39  ;;  %v3965_v47 = vpack.c.bf16 %v4274_v36, %v4276_v44 }
 0x2a9   : > { %4287 = vtanh.f32 %v2753_v46  ;;  %v3930_v48 = vpop.f32.mrb[14].mxu0 }
 0x2aa   : > { %v4278_v49 = vpop.eup %4277  ;;  %v2768_v51 = vadd.f32 %v3930_v48, %v2447_v6  ;;  %v2762_v52 = vpop.f32.mrb[15].mxu0  ;;  %3966 = vmatpush1.bf16.msra.mxu0 %v3965_v47  ;;  %4054 = vmatpush1.bf16.msra.mxu1 %v3965_v47 }
 0x2ab   : > { %v4280_v53 = vpop.eup %4279  ;;  %v2763_v56 = vadd.f32 %v2762_v52, %v2442_v9  ;;  %3967 = vmatprep.subr.bf16.mxu0 %v4851_v33  ;;  %4039 = vmatprep.subr.bf16.mxu1 %v4851_v33  ;;  %v2512_v52 = vpop.permute.xlu0 %2511 }
 0x2ac   : > { %4289 = vtanh.f32 %v2768_v51  ;;  %v3968_v57 = vpack.c.bf16 %v4278_v49, %v4280_v53  ;;  %v2517_v49 = vpop.permute.xlu1 %2516 }
 0x2ad   : > { %4291 = vtanh.f32 %v2763_v56  ;;  %v3933_v58 = vpop.f32.mrb[16].mxu0 }
 0x2ae   : > { %v4282_v59 = vpop.eup %4281  ;;  %v2778_v60 = vadd.f32 %v3933_v58, %v2457_v21  ;;  %v2772_v61 = vpop.f32.mrb[17].mxu0  ;;  %3969 = vmatpush1.bf16.msra.mxu0 %v3968_v57  ;;  %4055 = vmatpush1.bf16.msra.mxu1 %v3968_v57 }
 0x2af   : > { %v4284_v62 = vpop.eup %4283  ;;  %v2773_v0 = vadd.f32 %v2772_v61, %v2452_v23  ;;  %3970 = vmatprep.subr.bf16.mxu0 %v4851_v33  ;;  %4040 = vmatprep.subr.bf16.mxu1 %v4851_v33 }
 0x2b0   : > { %4293 = vtanh.f32 %v2778_v60  ;;  %v3971_v1 = vpack.c.bf16 %v4282_v59, %v4284_v62  ;;  %v2527_v61 = vpop.permute.xlu1 %2526 }
 0x2b1   : > { %4295 = vtanh.f32 %v2773_v0  ;;  %v3936_v3 = vpop.f32.mrb[18].mxu0 }
 0x2b2   : > { %v4286_v4 = vpop.eup %4285  ;;  %v2788_v6 = vadd.f32 %v3936_v3, %v2467_v32  ;;  %v2782_v7 = vpop.f32.mrb[19].mxu0  ;;  %3972 = vmatpush1.bf16.msra.mxu0 %v3971_v1  ;;  %4056 = vmatpush1.bf16.msra.mxu1 %v3971_v1 }
 0x2b3   : > { %v4288_v8 = vpop.eup %4287  ;;  %v2783_v9 = vadd.f32 %v2782_v7, %v2462_v37  ;;  %3973 = vmatprep.subr.bf16.mxu0 %v4851_v33  ;;  %4041 = vmatprep.subr.bf16.mxu1 %v4851_v33  ;;  %v2522_v1 = vpop.permute.xlu0 %2521 }
 0x2b4   : > { %4297 = vtanh.f32 %v2788_v6  ;;  %v3974_v10 = vpack.c.bf16 %v4286_v4, %v4288_v8 }
 0x2b5   : > { %4299 = vtanh.f32 %v2783_v9  ;;  %v3939_v11 = vpop.f32.mrb[20].mxu0 }
 0x2b6   : > { %v4290_v12 = vpop.eup %4289  ;;  %v2798_v13 = vadd.f32 %v3939_v11, %v2477_v55  ;;  %v2792_v14 = vpop.f32.mrb[21].mxu0  ;;  %3975 = vmatpush1.bf16.msra.mxu0 %v3974_v10  ;;  %4057 = vmatpush1.bf16.msra.mxu1 %v3974_v10 }
 0x2b7   : > { %v4292_v15 = vpop.eup %4291  ;;  %v2793_v18 = vadd.f32 %v2792_v14, %v2472_v16  ;;  %3976 = vmatprep.subr.bf16.mxu0 %v4851_v33  ;;  %4042 = vmatprep.subr.bf16.mxu1 %v4851_v33 }
 0x2b8   : > { %4301 = vtanh.f32 %v2798_v13  ;;  %v3977_v20 = vpack.c.bf16 %v4290_v12, %v4292_v15 }
 0x2b9   : > { %4303 = vtanh.f32 %v2793_v18  ;;  %v3942_v21 = vpop.f32.mrb[22].mxu0  ;;  %v2913_v18 = vld [vmem:[#allocation13 + $0xf0] sm:$0xff] }
 0x2ba   : > { %v4294_v22 = vpop.eup %4293  ;;  %v2808_v23 = vadd.f32 %v3942_v21, %v2487_v2  ;;  %v2802_v24 = vpop.f32.mrb[23].mxu0  ;;  %3978 = vmatpush1.bf16.msra.mxu0 %v3977_v20  ;;  %4058 = vmatpush1.bf16.msra.mxu1 %v3977_v20  ;;  %v2916_v20 = vld [vmem:[#allocation13 + $0x108] sm:$0xff]  ;;  %v2885_v21 = vld [vmem:[#allocation13 + $0x10] sm:$0xff] }
 0x2bb   : > { %v4296_v25 = vpop.eup %4295  ;;  %v2803_v35 = vadd.f32 %v2802_v24, %v2482_v5  ;;  %3979 = vmatprep.subr.bf16.mxu0 %v4851_v33  ;;  %4043 = vmatprep.subr.bf16.mxu1 %v4851_v33  ;;  %v2918_v24 = vld [vmem:[#allocation13 + $0x118] sm:$0xff] }
 0x2bc   : > { %4305 = vtanh.f32 %v2808_v23  ;;  %v3980_v26 = vpack.c.bf16 %v4294_v22, %v4296_v25  ;;  %v2915_v22 = vld [vmem:[#allocation13 + $0x100] sm:$0xff]  ;;  %v2888_v23 = vld [vmem:[#allocation13 + $0x28] sm:$0xff]  ;;  %v2917_v25 = vld [vmem:[#allocation13 + $0x110] sm:$0xff] }
 0x2bd   : > { %4307 = vtanh.f32 %v2803_v35  ;;  %v3945_v28 = vpop.f32.mrb[24].mxu0  ;;  %v2890_v35 = vld [vmem:[#allocation13 + $0x38] sm:$0xff] }
 0x2be   : > { %v4298_v29 = vpop.eup %4297  ;;  %v2818_v32 = vadd.f32 %v3945_v28, %v2497_v17  ;;  %v2812_v34 = vpop.f32.mrb[25].mxu0  ;;  %3981 = vmatpush1.bf16.msra.mxu0 %v3980_v26  ;;  %4059 = vmatpush1.bf16.msra.mxu1 %v3980_v26  ;;  %v2883_v17 = vld [vmem:[#allocation13] sm:$0xff]  ;;  %v2920_v26 = vld [vmem:[#allocation13 + $0x128] sm:$0xff] }
 0x2bf   : > { %v4300_v36 = vpop.eup %4299  ;;  %v2813_v37 = vadd.f32 %v2812_v34, %v2492_v19  ;;  %3982 = vmatprep.subr.bf16.mxu0 %v4851_v33  ;;  %4044 = vmatprep.subr.bf16.mxu1 %v4851_v33  ;;  %v2886_v19 = vld [vmem:[#allocation13 + $0x18] sm:$0xff]  ;;  %v2919_v28 = vld [vmem:[#allocation13 + $0x120] sm:$0xff]  ;;  %v2921_v34 = vld [vmem:[#allocation13 + $0x130] sm:$0xff] }
 0x2c0   : > { %4309 = vtanh.f32 %v2818_v32  ;;  %v3983_v39 = vpack.c.bf16 %v4298_v29, %v4300_v36  ;;  %v2892_v29 = vld [vmem:[#allocation13 + $0x48] sm:$0xff]  ;;  %v2891_v32 = vld [vmem:[#allocation13 + $0x40] sm:$0xff]  ;;  %v2894_v36 = vld [vmem:[#allocation13 + $0x58] sm:$0xff] }
 0x2c1   : > { %4311 = vtanh.f32 %v2813_v37  ;;  %v3948_v41 = vpop.f32.mrb[26].mxu0  ;;  %v2924_v37 = vld [vmem:[#allocation13 + $0x148] sm:$0xff] }
 0x2c2   : > { %v4302_v44 = vpop.eup %4301  ;;  %v2828_v46 = vadd.f32 %v3948_v41, %v2507_v27  ;;  %v2822_v47 = vpop.f32.mrb[27].mxu0  ;;  %3984 = vmatpush1.bf16.msra.mxu0 %v3983_v39  ;;  %4060 = vmatpush1.bf16.msra.mxu1 %v3983_v39  ;;  %v2889_v27 = vld [vmem:[#allocation13 + $0x30] sm:$0xff]  ;;  %v2923_v41 = vld [vmem:[#allocation13 + $0x140] sm:$0xff] }
 0x2c3   : > { %v4304_v48 = vpop.eup %4303  ;;  %v2823_v51 = vadd.f32 %v2822_v47, %v2502_v31  ;;  %3985 = vmatprep.subr.bf16.mxu0 %v4851_v33  ;;  %4045 = vmatprep.subr.bf16.mxu1 %v4851_v33  ;;  %v2922_v31 = vld [vmem:[#allocation13 + $0x138] sm:$0xff]  ;;  %v2893_v39 = vld [vmem:[#allocation13 + $0x50] sm:$0xff]  ;;  %v2895_v47 = vld [vmem:[#allocation13 + $0x60] sm:$0xff] }
 0x2c4   : > { %4313 = vtanh.f32 %v2828_v46  ;;  %v3986_v53 = vpack.c.bf16 %v4302_v44, %v4304_v48  ;;  %v2896_v44 = vld [vmem:[#allocation13 + $0x68] sm:$0xff]  ;;  %v2926_v46 = vld [vmem:[#allocation13 + $0x158] sm:$0xff]  ;;  %v2925_v48 = vld [vmem:[#allocation13 + $0x150] sm:$0xff] }
 0x2c5   : > { %4315 = vtanh.f32 %v2823_v51  ;;  %v3951_v55 = vpop.f32.mrb[28].mxu0  ;;  %v2928_v51 = vld [vmem:[#allocation13 + $0x168] sm:$0xff] }
 0x2c6   : > { %v4306_v56 = vpop.eup %4305  ;;  %v2838_v16 = vadd.f32 %v3951_v55, %v2517_v49  ;;  %v2832_v57 = vpop.f32.mrb[29].mxu0  ;;  %3987 = vmatpush1.bf16.msra.mxu0 %v3986_v53  ;;  %4061 = vmatpush1.bf16.msra.mxu1 %v3986_v53  ;;  %v2898_v49 = vld [vmem:[#allocation13 + $0x78] sm:$0xff]  ;;  %v2927_v53 = vld [vmem:[#allocation13 + $0x160] sm:$0xff]  ;;  %v2900_v55 = vld [vmem:[#allocation13 + $0x88] sm:$0xff] }
 0x2c7   : > { %v4308_v58 = vpop.eup %4307  ;;  %v2833_v59 = vadd.f32 %v2832_v57, %v2512_v52  ;;  %3988 = vmatprep.subr.bf16.mxu0 %v4851_v33  ;;  %4046 = vmatprep.subr.bf16.mxu1 %v4851_v33  ;;  %v2897_v52 = vld [vmem:[#allocation13 + $0x70] sm:$0xff] }
 0x2c8   : > { %4317 = vtanh.f32 %v2838_v16  ;;  %v3989_v60 = vpack.c.bf16 %v4306_v56, %v4308_v58  ;;  %v2930_v56 = vld [vmem:[#allocation13 + $0x178] sm:$0xff]  ;;  %v2899_v16 = vld [vmem:[#allocation13 + $0x80] sm:$0xff]  ;;  %v2929_v57 = vld [vmem:[#allocation13 + $0x170] sm:$0xff] }
 0x2c9   : > { %4319 = vtanh.f32 %v2833_v59  ;;  %v3954_v62 = vpop.f32.mrb[30].mxu0  ;;  %v2902_v58 = vld [vmem:[#allocation13 + $0x98] sm:$0xff]  ;;  %v2932_v59 = vld [vmem:[#allocation13 + $0x188] sm:$0xff] }
 0x2ca   : > { %v4310_v0 = vpop.eup %4309  ;;  %v2848_v2 = vadd.f32 %v3954_v62, %v2527_v61  ;;  %v2842_v3 = vpop.f32.mrb[31].mxu0  ;;  %3990 = vmatpush1.bf16.msra.mxu0 %v3989_v60  ;;  %4062 = vmatpush1.bf16.msra.mxu1 %v3989_v60  ;;  %v2901_v60 = vld [vmem:[#allocation13 + $0x90] sm:$0xff]  ;;  %v2931_v61 = vld [vmem:[#allocation13 + $0x180] sm:$0xff]  ;;  %v2904_v62 = vld [vmem:[#allocation13 + $0xa8] sm:$0xff] }
 0x2cb   : > { %v4312_v4 = vpop.eup %4311  ;;  %v2843_v5 = vadd.f32 %v2842_v3, %v2522_v1  ;;  %3991 = vmatprep.subr.bf16.mxu0 %v4851_v33  ;;  %4047 = vmatprep.subr.bf16.mxu1 %v4851_v33  ;;  %v2903_v1 = vld [vmem:[#allocation13 + $0xa0] sm:$0xff]  ;;  %v2906_v3 = vld [vmem:[#allocation13 + $0xb8] sm:$0xff] }
 0x2cc   : > { %4321 = vtanh.f32 %v2848_v2  ;;  %v3992_v6 = vpack.c.bf16 %v4310_v0, %v4312_v4  ;;  %v2934_v0 = vld [vmem:[#allocation13 + $0x198] sm:$0xff]  ;;  %v2933_v2 = vld [vmem:[#allocation13 + $0x190] sm:$0xff]  ;;  %v2936_v4 = vld [vmem:[#allocation13 + $0x1a8] sm:$0xff] }
 0x2cd   : > { %4323 = vtanh.f32 %v2843_v5  ;;  %v2905_v5 = vld [vmem:[#allocation13 + $0xb0] sm:$0xff] }
 0x2ce   : > { %v4314_v7 = vpop.eup %4313  ;;  %3993 = vmatpush1.bf16.msra.mxu0 %v3992_v6  ;;  %4063 = vmatpush1.bf16.msra.mxu1 %v3992_v6  ;;  %v2935_v6 = vld [vmem:[#allocation13 + $0x1a0] sm:$0xff] }
 0x2cf   : > { %v4316_v8 = vpop.eup %4315  ;;  %3994 = vmatprep.subr.bf16.mxu0 %v4851_v33  ;;  %4048 = vmatprep.subr.bf16.mxu1 %v4851_v33 }
 0x2d0   : > { %v3995_v9 = vpack.c.bf16 %v4314_v7, %v4316_v8  ;;  %v2908_v7 = vld [vmem:[#allocation13 + $0xc8] sm:$0xff]  ;;  %v2938_v8 = vld [vmem:[#allocation13 + $0x1b8] sm:$0xff] }
 0x2d2   : > { %v4318_v10 = vpop.eup %4317  ;;  %3996 = vmatpush1.bf16.msra.mxu0 %v3995_v9  ;;  %4064 = vmatpush1.bf16.msra.mxu1 %v3995_v9  ;;  %v2907_v9 = vld [vmem:[#allocation13 + $0xc0] sm:$0xff] }
 0x2d3   : > { %v4320_v11 = vpop.eup %4319  ;;  %3997 = vmatprep.subr.bf16.mxu0 %v4851_v33  ;;  %4049 = vmatprep.subr.bf16.mxu1 %v4851_v33 }
 0x2d4   : > { %v3998_v12 = vpack.c.bf16 %v4318_v10, %v4320_v11  ;;  %v2937_v10 = vld [vmem:[#allocation13 + $0x1b0] sm:$0xff]  ;;  %v2910_v11 = vld [vmem:[#allocation13 + $0xd8] sm:$0xff] }
 0x2d6   : > { %v4322_v13 = vpop.eup %4321  ;;  %3999 = vmatpush1.bf16.msra.mxu0 %v3998_v12  ;;  %4065 = vmatpush1.bf16.msra.mxu1 %v3998_v12  ;;  %v2940_v12 = vld [vmem:[#allocation13 + $0x1c8] sm:$0xff] }
 0x2d7   : > { %v4324_v14 = vpop.eup %4323  ;;  %4000 = vmatprep.subr.bf16.mxu0 %v4851_v33  ;;  %4050 = vmatprep.subr.bf16.mxu1 %v4851_v33  ;;  %v2887_v33 = vld [vmem:[#allocation13 + $0x20] sm:$0xff] }
 0x2d8   : > { %v4001_v15 = vpack.c.bf16 %v4322_v13, %v4324_v14  ;;  %v2909_v13 = vld [vmem:[#allocation13 + $0xd0] sm:$0xff]  ;;  %v2939_v14 = vld [vmem:[#allocation13 + $0x1c0] sm:$0xff] }
 0x2da   : > { %4002 = vmatpush1.bf16.msra.mxu0 %v4001_v15  ;;  %4066 = vmatpush1.bf16.msra.mxu1 %v4001_v15  ;;  %v2912_v15 = vld [vmem:[#allocation13 + $0xe8] sm:$0xff] }
 0x2dd   : > { %3204 = vmatmul.mubr.f32.vlgmr.msra.gmra.mrb[32].mxu0 %v2883_v17  ;;  %3279 = vmatmul.mubr.f32.vlgmr.msra.gmra.mrb[0].mxu1 %v2913_v18  ;;  %v2942_v17 = vld [vmem:[#allocation13 + $0x1d8] sm:$0xff]  ;;  %v2911_v18 = vld [vmem:[#allocation13 + $0xe0] sm:$0xff] }
 0x2de   : > { %3208 = vmatprep.mubr.f32.mxu0 %v2886_v19  ;;  %3283 = vmatprep.mubr.f32.mxu1 %v2916_v20  ;;  %v2941_v19 = vld [vmem:[#allocation13 + $0x1d0] sm:$0xff]  ;;  %v2944_v20 = vld [vmem:[#allocation13 + $0x1e8] sm:$0xff] }
 0x2e1   : > { %3209 = vmatmul.mubr.f32.gmra.mrb[34].mxu0 %v2885_v21  ;;  %3284 = vmatmul.mubr.f32.gmra.mrb[2].mxu1 %v2915_v22  ;;  %v2943_v21 = vld [vmem:[#allocation13 + $0x1e0] sm:$0xff]  ;;  %v2946_v22 = vld [vmem:[#allocation13 + $0x1f8] sm:$0xff] }
 0x2e2   : > { %3213 = vmatprep.mubr.f32.mxu0 %v2888_v23  ;;  %3288 = vmatprep.mubr.f32.mxu1 %v2918_v24  ;;  %v2945_v23 = vld [vmem:[#allocation13 + $0x1f0] sm:$0xff]  ;;  %v3067_v24 = vpop.permute.xlu1 %3066 }
 0x2e5   : > { %3214 = vmatmul.mubr.f32.gmra.mrb[36].mxu0 %v2887_v33  ;;  %3289 = vmatmul.mubr.f32.gmra.mrb[4].mxu1 %v2917_v25  ;;  %v3062_v33 = vpop.permute.xlu0 %3061  ;;  %v5426_v25 = vld.sshfl [vmem:[#allocation16] sm:$0x33 pattern:$0x76325410] }
 0x2e6   : > { %3218 = vmatprep.mubr.f32.mxu0 %v2890_v35  ;;  %3293 = vmatprep.mubr.f32.mxu1 %v2920_v26  ;;  %v3411_v35 = vcombine.high %v5426_v25, %v5426_v25  ;;  %v2987_v26 = vpop.permute.xlu1 %2986 }
 0x2e9   : > { %3219 = vmatmul.mubr.f32.gmra.mrb[38].mxu0 %v2889_v27  ;;  %3294 = vmatmul.mubr.f32.gmra.mrb[6].mxu1 %v2919_v28  ;;  %v2982_v27 = vpop.permute.xlu0 %2981 }
 0x2ea   : > { %3223 = vmatprep.mubr.f32.mxu0 %v2892_v29  ;;  %3298 = vmatprep.mubr.f32.mxu1 %v2922_v31  ;;  %v5430_v28 = vpop.permute.xlu1 %3076 }
 0x2ed   : > { %3224 = vmatmul.mubr.f32.gmra.mrb[40].mxu0 %v2891_v32  ;;  %3299 = vmatmul.mubr.f32.gmra.mrb[8].mxu1 %v2921_v34  ;;  %v3072_v29 = vpop.permute.xlu0 %3071 }
 0x2ee   : > { %3228 = vmatprep.mubr.f32.mxu0 %v2894_v36  ;;  %3303 = vmatprep.mubr.f32.mxu1 %v2924_v37  ;;  %v2997_v31 = vpop.permute.xlu1 %2996 }
 0x2f1   : > { %3229 = vmatmul.mubr.f32.gmra.mrb[42].mxu0 %v2893_v39  ;;  %3304 = vmatmul.mubr.f32.gmra.mrb[10].mxu1 %v2923_v41  ;;  %v2992_v32 = vpop.permute.xlu0 %2991 }
 0x2f2   : > { %3233 = vmatprep.mubr.f32.mxu0 %v2896_v44  ;;  %3308 = vmatprep.mubr.f32.mxu1 %v2926_v46  ;;  %v5432_v34 = vpop.permute.xlu1 %3086  ;;  %v565_v46 = vand.u32 2139095040, %v5352_v38 }
 0x2f5   : > { %3234 = vmatmul.mubr.f32.gmra.mrb[44].mxu0 %v2895_v47  ;;  %3309 = vmatmul.mubr.f32.gmra.mrb[12].mxu1 %v2925_v48  ;;  %v5434_v36 = vpop.permute.xlu0 %3081 }
 0x2f6   : > { %3238 = vmatprep.mubr.f32.mxu0 %v2898_v49  ;;  %3313 = vmatprep.mubr.f32.mxu1 %v2928_v51  ;;  %v5436_v37 = vpop.permute.xlu1 %3006  ;;  %v566_v49 = vshrl.u32 %v565_v46, 23 }
 0x2f9   : > { %3239 = vmatmul.mubr.f32.gmra.mrb[46].mxu0 %v2897_v52  ;;  %3314 = vmatmul.mubr.f32.gmra.mrb[14].mxu1 %v2927_v53  ;;  %v3002_v39 = vpop.permute.xlu0 %3001  ;;  %v3739_v52 = vadd.s32 4294967169, %v566_v49 }
 0x2fa   : > { %3243 = vmatprep.mubr.f32.mxu0 %v2900_v55  ;;  %3318 = vmatprep.mubr.f32.mxu1 %v2930_v56  ;;  %v5438_v41 = vpop.permute.xlu1 %3096 }
 0x2fd   : > { %3244 = vmatmul.mubr.f32.gmra.mrb[48].mxu0 %v2899_v16  ;;  %3319 = vmatmul.mubr.f32.gmra.mrb[16].mxu1 %v2929_v57  ;;  %v5440_v44 = vpop.permute.xlu0 %3091 }
 0x2fe   : > { %3248 = vmatprep.mubr.f32.mxu0 %v2902_v58  ;;  %3323 = vmatprep.mubr.f32.mxu1 %v2932_v59  ;;  %v5443_v47 = vpop.permute.xlu1 %3016  ;;  %v572_v58 = vadd.s32 1, %v3739_v52 }
 0x300   : > { %vm573_vm0 = vcmp.gt.s32.totalorder %v572_v58, 0 }
 0x301   : > { %3249 = vmatmul.mubr.f32.gmra.mrb[50].mxu0 %v2901_v60  ;;  %3324 = vmatmul.mubr.f32.gmra.mrb[18].mxu1 %v2931_v61  ;;  %v5445_v48 = vpop.permute.xlu0 %3011  ;;  %v5454_v60 = vmul.f32 2.0, %v5352_v38 }
 0x302   : > { %3253 = vmatprep.mubr.f32.mxu0 %v2904_v62  ;;  %3328 = vmatprep.mubr.f32.mxu1 %v2934_v0  ;;  %v5447_v51 = vpop.permute.xlu1 %3106 }
 0x305   : > { %3254 = vmatmul.mubr.f32.gmra.mrb[52].mxu0 %v2903_v1  ;;  %3329 = vmatmul.mubr.f32.gmra.mrb[20].mxu1 %v2933_v2  ;;  %v5449_v53 = vpop.permute.xlu0 %3101 }
 0x306   : > { %3258 = vmatprep.mubr.f32.mxu0 %v2906_v3  ;;  %3333 = vmatprep.mubr.f32.mxu1 %v2936_v4  ;;  %v5456_v61 = vpop.permute.xlu1 %3026  ;;  %v773_v4 = vand.u32 2139095040, %v5454_v60 }
 0x309   : > { %3259 = vmatmul.mubr.f32.gmra.mrb[54].mxu0 %v2905_v5  ;;  %3334 = vmatmul.mubr.f32.gmra.mrb[22].mxu1 %v2935_v6  ;;  %v5459_v5 = vpop.permute.xlu0 %3021 }
 0x30a   : > { %3263 = vmatprep.mubr.f32.mxu0 %v2908_v7  ;;  %3338 = vmatprep.mubr.f32.mxu1 %v2938_v8 }
 0x30d   : > { %3264 = vmatmul.mubr.f32.gmra.mrb[56].mxu0 %v2907_v9  ;;  %3339 = vmatmul.mubr.f32.gmra.mrb[24].mxu1 %v2937_v10  ;;  %v574_v9 = vsel %vm573_vm0, %v572_v58, 0 }
 0x30e   : > { %3268 = vmatprep.mubr.f32.mxu0 %v2910_v11  ;;  %3343 = vmatprep.mubr.f32.mxu1 %v2940_v12  ;;  %v5472_v58 = vshrl.u32 %v574_v9, 5 }
 0x310   : > { %vm597_vm9 = vcmp.lt.s32.totalorder %v5472_v58, 4  ;;  %vm594_vm10 = vcmp.lt.s32.totalorder %v5472_v58, 1  ;;  %vm596_vm12 = vcmp.lt.s32.totalorder %v5472_v58, 3  ;;  %vm595_vm13 = vcmp.lt.s32.totalorder %v5472_v58, 2 }
 0x311   : > { %3269 = vmatmul.mubr.f32.gmra.mrb[58].mxu0 %v2909_v13  ;;  %3344 = vmatmul.mubr.f32.gmra.mrb[26].mxu1 %v2939_v14  ;;  %v774_v13 = vshrl.u32 %v773_v4, 23  ;;  %v5461_v14 = vpop.permute.xlu1 %3116 }
 0x312   : > { %3273 = vmatprep.mubr.f32.mxu0 %v2912_v15  ;;  %3348 = vmatprep.mubr.f32.mxu1 %v2942_v17  ;;  %v576_v15 = vand.u32 31, %v574_v9 }
 0x314   : > { %v582_v4 = vshll.u32 %v7154_v42, %v576_v15 }
 0x315   : > { %3274 = vmatmul.mubr.f32.gmra.mrb[60].mxu0 %v2911_v18  ;;  %3349 = vmatmul.mubr.f32.gmra.mrb[28].mxu1 %v2941_v19 }
 0x316   : > { %3353 = vmatprep.mubr.f32.mxu1 %v2944_v20  ;;  %3478 = vmatprep.mubr.f32.mxu0 %v3411_v35  ;;  %v5465_v35 = vsub.s32 32, %v576_v15 }
 0x319   : > { %3354 = vmatmul.mubr.f32.gmra.mrb[30].mxu1 %v2943_v21 }
 0x31a   : > { %3358 = vmatprep.mubr.f32.mxu1 %v2946_v22  ;;  %v3747_v22 = vadd.s32 4294967169, %v774_v13  ;;  %v585_v13 = vshll.u32 %v7151_v45, %v576_v15 }
 0x31d   : > { %3359 = vmatmul.mubr.f32.gmra.mrb[32].mxu1 %v2945_v23  ;;  %v5463_v23 = vpop.permute.xlu0 %3111 }
 0x3b0   : > { %v3205_v55 = vpop.f32.mrb[32].mxu0  ;;  %v5451_v56 = vpop.f32.mrb[0].mxu1 }
 0x3b1   : > { %v3282_v16 = vpop.f32.mrb[1].mxu1  ;;  %v3207_v57 = vpop.f32.mrb[33].mxu0  ;;  %v3206_v59 = vadd.f32 %v3205_v55, %v2982_v27 }
 0x3b2   : > { %v5469_v16 = vld [vmem:[%s5267_s13] sm:$0x1] }
 0x3b3   : > { %4325 = vtanh.f32 %v3206_v59  ;;  %v562_v57 = vand.u32 2147483647, %v5469_v16  ;;  %v5476_v59 = vpop.permute.xlu1 %3036 }
 0x3b4   : > { %v3210_v62 = vpop.f32.mrb[34].mxu0  ;;  %v3285_v0 = vpop.f32.mrb[2].mxu1 }
 0x3b5   : > { %v3211_v1 = vadd.f32 %v3210_v62, %v2987_v26  ;;  %v3287_v2 = vpop.f32.mrb[3].mxu1  ;;  %v3212_v3 = vpop.f32.mrb[35].mxu0  ;;  %v3286_v6 = vadd.f32 %v3285_v0, %v3062_v33  ;;  %v579_v62 = vshll.u32 %v7156_v40, %v576_v15  ;;  %v589_v0 = vshrl.u32 %v7145_v54, %v5465_v35 }
 0x3b6   : > { %v5484_v3 = vld [vmem:[%s476_s10] sm:$0x1] }
 0x3b7   : > { %4327 = vtanh.f32 %v3211_v1 }
 0x3b8   : > { %v3215_v7 = vpop.f32.mrb[36].mxu0  ;;  %v3290_v8 = vpop.f32.mrb[4].mxu1  ;;  %4329 = vtanh.f32 %v3286_v6  ;;  %v591_v6 = vshll.u32 %v7145_v54, %v576_v15 }
 0x3b9   : > { %v3291_v38 = vadd.f32 %v3290_v8, %v3067_v24  ;;  %v3292_v10 = vpop.f32.mrb[5].mxu1  ;;  %v3217_v11 = vpop.f32.mrb[37].mxu0  ;;  %v3216_v12 = vadd.f32 %v3215_v7, %v2992_v32  ;;  %v592_v7 = vshrl.u32 %v7147_v63, %v5465_v35 }
 0x3ba   : > { %v580_v11 = vshrl.u32 %v7154_v42, %v5465_v35 }
 0x3bb   : > { %4331 = vtanh.f32 %v3291_v38 }
 0x3bc   : > { %v3220_v17 = vpop.f32.mrb[38].mxu0  ;;  %v3295_v18 = vpop.f32.mrb[6].mxu1  ;;  %4333 = vtanh.f32 %v3216_v12  ;;  %v583_v12 = vshrl.u32 %v7151_v45, %v5465_v35 }
 0x3bd   : > { %v3221_v19 = vadd.f32 %v3220_v17, %v2997_v31  ;;  %v3297_v20 = vpop.f32.mrb[7].mxu1  ;;  %v3222_v21 = vpop.f32.mrb[39].mxu0  ;;  %v3296_v24 = vadd.f32 %v3295_v18, %v3072_v29  ;;  %v5474_v29 = vadd.s32 1, %v3747_v22  ;;  %v586_v17 = vshrl.u32 %v7143_v50, %v5465_v35 }
 0x3be   : > { %v4326_v33 = vpop.eup %4325  ;;  %v5498_v18 = vpop.permute.xlu0 %3031  ;;  %v877_v22 = vmul.f32 6.2831855, %v5484_v3 }
 0x3bf   : > { %4335 = vtanh.f32 %v3221_v19  ;;  %vm781_vm11 = vcmp.gt.s32.totalorder %v5474_v29, 0 }
 0x3c0   : > { %v3225_v26 = vpop.f32.mrb[40].mxu0  ;;  %v3300_v27 = vpop.f32.mrb[8].mxu1  ;;  %4337 = vtanh.f32 %v3296_v24 }
 0x3c1   : > { %v4328_v32 = vpop.eup %4327  ;;  %v3301_v46 = vadd.f32 %v3300_v27, %v5430_v28  ;;  %v3302_v49 = vpop.f32.mrb[9].mxu1  ;;  %v3226_v31 = vadd.f32 %v3225_v26, %v3002_v39  ;;  %v588_v28 = vshll.u32 %v7143_v50, %v576_v15  ;;  %v569_v15 = vand.u32 8388607, %v562_v57 }
 0x3c2   : > { %v3227_v52 = vpop.f32.mrb[41].mxu0  ;;  %v4005_v55 = vpack.c.bf16 %v4328_v32, %v4326_v33  ;;  %v4330_v2 = vpop.eup %4329  ;;  %v593_v27 = vor.u32 %v592_v7, %v591_v6 }
 0x3c3   : > { %4339 = vtanh.f32 %v3301_v46  ;;  %v590_v21 = vor.u32 %v589_v0, %v588_v28  ;;  %v584_v52 = vor.u32 %v583_v12, %v582_v4  ;;  %v587_v0 = vor.u32 %v586_v17, %v585_v13 }
 0x3c4   : > { %v3230_v39 = vpop.f32.mrb[42].mxu0  ;;  %v3305_v1 = vpop.f32.mrb[10].mxu1  ;;  %4341 = vtanh.f32 %v3226_v31  ;;  %v578_v17 = vshrl.u32 %v7156_v40, %v5465_v35 }
 0x3c5   : > { %v3231_v8 = vadd.f32 %v3230_v39, %v5436_v37  ;;  %v3307_v9 = vpop.f32.mrb[11].mxu1  ;;  %v3232_v38 = vpop.f32.mrb[43].mxu0  ;;  %v3306_v37 = vadd.f32 %v3305_v1, %v5434_v36  ;;  %v581_v36 = vor.u32 %v580_v11, %v579_v62 }
 0x3c6   : > { %v4332_v10 = vpop.eup %4331  ;;  %v5509_v39 = vpop.permute.xlu1 %3126  ;;  %v782_v38 = vsel %vm781_vm11, %v5474_v29, 0 }
 0x3c7   : > { %4343 = vtanh.f32 %v3231_v8  ;;  %v4003_v19 = vpack.c.bf16 %v4332_v10, %v4330_v2  ;;  %v4334_v20 = vpop.eup %4333  ;;  %v602_v9 = vsel %vm594_vm10, %v581_v36, %v584_v52  ;;  %v5525_v11 = vpop.permute.xlu0 %3121 }
 0x3c8   : > { %v3235_v24 = vpop.f32.mrb[44].mxu0  ;;  %v3310_v33 = vpop.f32.mrb[12].mxu1  ;;  %4345 = vtanh.f32 %v3306_v37  ;;  %v606_v37 = vsel %vm594_vm10, %v584_v52, %v587_v0 }
 0x3c9   : > { %v4336_v26 = vpop.eup %4335  ;;  %v3311_v32 = vadd.f32 %v3310_v33, %v5432_v34  ;;  %4004 = vmatprep.subr.bf16.mxu0 %v4003_v19  ;;  %v3312_v46 = vpop.f32.mrb[13].mxu1  ;;  %v3236_v31 = vadd.f32 %v3235_v24, %v5445_v48  ;;  %v603_v34 = vsel %vm597_vm9, %v590_v21, 920167782  ;;  %v570_v48 = vor.u32 8388608, %v569_v15 }
 0x3ca   : > { %v3237_v49 = vpop.f32.mrb[45].mxu0  ;;  %4006 = vmatpush3.bf16.msra.mxu0 %v4005_v55  ;;  %v4009_v28 = vpack.c.bf16 %v4336_v26, %v4334_v20  ;;  %v4338_v2 = vpop.eup %4337  ;;  %v607_v55 = vsel %vm597_vm9, %v593_v27, 1326507024  ;;  %v604_v10 = vsel %vm596_vm12, %v587_v0, %v603_v34  ;;  %v599_v24 = vsel %vm597_vm9, %v587_v0, 2102212464 }
 0x3cb   : > { %4347 = vtanh.f32 %v3311_v32  ;;  %v608_v29 = vsel %vm596_vm12, %v590_v21, %v607_v55  ;;  %v5536_v33 = vshll.u32 %v570_v48, 8  ;;  %v605_v27 = vsel %vm595_vm13, %v602_v9, %v604_v10  ;;  %v5545_v49 = vpop.permute.xlu1 %3046 }
 0x3cc   : > { %v3240_v62 = vpop.f32.mrb[46].mxu0  ;;  %v3315_v1 = vpop.f32.mrb[14].mxu1  ;;  %4349 = vrcp.f32 %v877_v22  ;;  %v609_v46 = vsel %vm595_vm13, %v606_v37, %v608_v29  ;;  %v770_v0 = vand.u32 2147483647, %v5454_v60 }
 0x3cd   : > { %v3241_v4 = vadd.f32 %v3240_v62, %v5443_v47  ;;  %v3317_v6 = vpop.f32.mrb[15].mxu1  ;;  %v3242_v7 = vpop.f32.mrb[47].mxu0  ;;  %4351 = vtanh.f32 %v3236_v31  ;;  %v3316_v47 = vadd.f32 %v3315_v1, %v5440_v44  ;;  %v784_v44 = vand.u32 31, %v782_v38 }
 0x3ce   : > { %v4340_v8 = vpop.eup %4339  ;;  %v600_v31 = vsel %vm596_vm12, %v584_v52, %v599_v24  ;;  %v5564_v7 = vpop.permute.xlu0 %3041  ;;  %v4442_v24 = vld [vmem:[%s5281_s20] sm:$0x1] }
 0x3cf   : > { %4353 = vtanh.f32 %v3241_v4  ;;  %v4007_v12 = vpack.c.bf16 %v4340_v8, %v4338_v2  ;;  %v4342_v13 = vpop.eup %4341  ;;  %v5557_v1 = vsub.s32 32, %v784_v44  ;;  %v796_v29 = vshll.u32 %v7143_v50, %v784_v44 }
 0x3d0   : > { %v3245_v19 = vpop.f32.mrb[48].mxu0  ;;  %v3320_v20 = vpop.f32.mrb[16].mxu1  ;;  %4355 = vrcp.f32 %v5484_v3  ;;  %v5561_v52 = vmul.u32.u64.low %v5536_v33, %v609_v46  ;;  %v5562_v4 = vmul.u32.u64.high %v5536_v33, %v609_v46, %v5561_v52 }
 0x3d1   : > { %v4344_v22 = vpop.eup %4343  ;;  %v3321_v26 = vadd.f32 %v3320_v20, %v5438_v41  ;;  %4008 = vmatprep.subr.bf16.mxu0 %v4007_v12  ;;  %v3322_v15 = vpop.f32.mrb[17].mxu1  ;;  %v3246_v21 = vadd.f32 %v3245_v19, %v5459_v5  ;;  %4357 = vtanh.f32 %v3316_v47  ;;  %v598_v41 = vsel %vm594_vm10, %v578_v17, %v581_v36 }
 0x3d2   : > { %v3247_v35 = vpop.f32.mrb[49].mxu0  ;;  %4010 = vmatpush3.bf16.msra.mxu0 %v4009_v28  ;;  %v4013_v32 = vpack.c.bf16 %v4344_v22, %v4342_v13  ;;  %v4346_v5 = vpop.eup %4345  ;;  %v5553_v28 = vmul.u32.u64.low %v5536_v33, %v605_v27  ;;  %v5554_v62 = vmul.u32.u64.high %v5536_v33, %v605_v27, %v5553_v28  ;;  %v5575_v47 = vand.u32 8388607, %v770_v0 }
 0x3d3   : > { %4359 = vtanh.f32 %v3321_v26  ;;  %v5577_v12 = vshrl.u32 %v782_v38, 5  ;;  %v797_v19 = vshrl.u32 %v7145_v54, %v5557_v1  ;;  %v788_v38 = vshrl.u32 %v7154_v42, %v5557_v1  ;;  %v5596_v46 = vpop.permute.xlu1 %3136 }
 0x3d4   : > { %v3250_v3 = vpop.f32.mrb[50].mxu0  ;;  %v3325_v34 = vpop.f32.mrb[18].mxu1  ;;  %4361 = vtanh.f32 %v3246_v21  ;;  %v790_v27 = vshll.u32 %v7154_v42, %v784_v44  ;;  %v791_v21 = vshrl.u32 %v7151_v45, %v5557_v1  ;;  %vm619_vm15 = vc.u32 %v5562_v4, %v5553_v28 }
 0x3d5   : > { %v3251_v2 = vadd.f32 %v3250_v3, %v5456_v61  ;;  %v3327_v48 = vpop.f32.mrb[19].mxu1  ;;  %v3252_v36 = vpop.f32.mrb[51].mxu0  ;;  %v3326_v8 = vadd.f32 %v3325_v34, %v5449_v53  ;;  %v5571_v61 = vsel %vm595_vm13, %v598_v41, %v600_v31  ;;  %v787_v53 = vshll.u32 %v7156_v40, %v784_v44 }
 0x3d6   : > { %v4348_v55 = vpop.eup %4347  ;;  %v794_v31 = vshrl.u32 %v7143_v50, %v5557_v1  ;;  %v798_v48 = vor.u32 %v797_v19, %v796_v29  ;;  %vm802_vm14 = vcmp.lt.s32.totalorder %v5577_v12, 1  ;;  %vm805_vm1 = vcmp.lt.s32.totalorder %v5577_v12, 4 }
 0x3d7   : > { %v4350_v6 = vpop.eup %4349  ;;  %4363 = vtanh.f32 %v3251_v2  ;;  %v4011_v9 = vpack.c.bf16 %v4348_v55, %v4346_v5  ;;  %v620_v2 = vadd.s32 1, %v5554_v62  ;;  %vm804_vm3 = vcmp.lt.s32.totalorder %v5577_v12, 3 }
 0x3d8   : > { %v5567_v10 = vpop.eup %4351  ;;  %v3255_v13 = vpop.f32.mrb[52].mxu0  ;;  %v879_v26 = vmul.f32 %v4442_v24, %v4350_v6  ;;  %4365 = vtanh.f32 %v3326_v8  ;;  %v617_v8 = vmul.u32 %v5536_v33, %v5571_v61  ;;  %vm803_vm4 = vcmp.lt.s32.totalorder %v5577_v12, 2 }
 0x3d9   : > { %v3330_v17 = vpop.f32.mrb[20].mxu1  ;;  %v5579_v37 = vpop.eup %4353  ;;  %4012 = vmatprep.subr.bf16.mxu0 %v4011_v9  ;;  %v3256_v15 = vadd.f32 %v3255_v13, %v5498_v18  ;;  %v799_v18 = vshll.u32 %v7145_v54, %v784_v44  ;;  %v621_v33 = vsel %vm619_vm15, %v620_v2, %v5554_v62  ;;  %v4443_v2 = vld [vmem:[%s468_s28] sm:$0x1] }
 0x3da   : > { %v3331_v58 = vadd.f32 %v3330_v17, %v5447_v51  ;;  %v3332_v20 = vpop.f32.mrb[21].mxu1  ;;  %v3257_v22 = vpop.f32.mrb[53].mxu0  ;;  %4014 = vmatpush3.bf16.msra.mxu0 %v4013_v32  ;;  %v4017_v35 = vpack.c.bf16 %v5579_v37, %v5567_v10  ;;  %v793_v51 = vshll.u32 %v7151_v45, %v784_v44  ;;  %v800_v32 = vshrl.u32 %v7147_v63, %v5557_v1 }
 0x3db   : > { %v4356_v41 = vpop.eup %4355  ;;  %v4075_v44 = vround.rtne.f32 %v879_v26  ;;  %v5611_v9 = vpop.permute.xlu0 %3131  ;;  %v5614_v17 = vor.u32 %v788_v38, %v787_v53  ;;  %v5616_v37 = vor.u32 %v791_v21, %v790_v27 }
 0x3dc   : > { %4367 = vtanh.f32 %v3331_v58  ;;  %v3260_v3 = vpop.f32.mrb[54].mxu0  ;;  %v3335_v34 = vpop.f32.mrb[22].mxu1  ;;  %v5618_v29 = vor.u32 %v794_v31, %v793_v51  ;;  %v801_v19 = vor.u32 %v800_v32, %v799_v18  ;;  %v778_v51 = vor.u32 8388608, %v5575_v47 }
 0x3dd   : > { %v4358_v5 = vpop.eup %4357  ;;  %v3261_v36 = vadd.f32 %v3260_v3, %v5476_v59  ;;  %v3337_v55 = vpop.f32.mrb[23].mxu1  ;;  %4369 = vtanh.f32 %v3256_v15  ;;  %v3336_v10 = vadd.f32 %v3335_v34, %v5463_v23  ;;  %v811_v23 = vsel %vm805_vm1, %v798_v48, 920167782 }
 0x3de   : > { %v3262_v52 = vpop.f32.mrb[55].mxu0  ;;  %v4360_v6 = vpop.eup %4359  ;;  %v881_v26 = vmul.f32 6.2831855, %v4075_v44  ;;  %v884_v15 = vmul.f32 %v4442_v24, %v4356_v41  ;;  %v815_v62 = vsel %vm805_vm1, %v801_v19, 1326507024  ;;  %v5637_v41 = vadd.s32 %v621_v33, %v617_v8 }
 0x3df   : > { %4371 = vtanh.f32 %v3261_v36  ;;  %v4015_v13 = vpack.c.bf16 %v4360_v6, %v4358_v5  ;;  %v4362_v59 = vpop.eup %4361  ;;  %v3057_v31 = vpop.permute.xlu1 %3056  ;;  %v812_v47 = vsel %vm804_vm3, %v5618_v29, %v811_v23  ;;  %v814_v6 = vsel %vm802_vm14, %v5616_v37, %v5618_v29 }
 0x3e0   : > { %v3265_v58 = vpop.f32.mrb[56].mxu0  ;;  %v3340_v20 = vpop.f32.mrb[24].mxu1  ;;  %4373 = vtanh.f32 %v3336_v10  ;;  %v3281_v18 = vadd.f32 %v5451_v56, %v3057_v31  ;;  %v882_v36 = vadd.f32 %v4443_v2, %v881_v26  ;;  %v885_v55 = vadd.f32 %v4443_v2, %v884_v15 }
 0x3e1   : > { %v4364_v22 = vpop.eup %4363  ;;  %v3341_v61 = vadd.f32 %v3340_v20, %v5461_v14  ;;  %4016 = vmatprep.subr.bf16.mxu0 %v4015_v13  ;;  %v3342_v53 = vpop.f32.mrb[25].mxu1  ;;  %v3266_v27 = vadd.f32 %v3265_v58, %v5564_v7  ;;  %v810_v14 = vsel %vm802_vm14, %v5614_v17, %v5616_v37  ;;  %v816_v56 = vsel %vm804_vm3, %v798_v48, %v815_v62 }
 0x3e2   : > { %v3267_v38 = vpop.f32.mrb[57].mxu0  ;;  %4018 = vmatpush3.bf16.msra.mxu0 %v4017_v35  ;;  %v4021_v21 = vpack.c.bf16 %v4364_v22, %v4362_v59  ;;  %v4366_v35 = vpop.eup %4365  ;;  %v5653_v10 = vshll.u32 %v778_v51, 8  ;;  %v817_v48 = vsel %vm803_vm4, %v814_v6, %v816_v56  ;;  %v886_v23 = vsub.f32 %v885_v55, %v882_v36 }
 0x3e3   : > { %4375 = vtanh.f32 %v3341_v61  ;;  %v3052_v44 = vpop.permute.xlu0 %3051  ;;  %v623_v53 = vadd.s32 536870912, %v5637_v41  ;;  %v888_v15 = vadd.f32 %v885_v55, %v882_v36  ;;  %v786_v51 = vshrl.u32 %v7156_v40, %v5557_v1 }
 0x3e4   : > { %v3270_v24 = vpop.f32.mrb[58].mxu0  ;;  %v3345_v7 = vpop.f32.mrb[26].mxu1  ;;  %4377 = vtanh.f32 %v3266_v27 }
 0x3e5   : > { %v3271_v32 = vadd.f32 %v3270_v24, %v5545_v49  ;;  %v3347_v3 = vpop.f32.mrb[27].mxu1  ;;  %v3272_v34 = vpop.f32.mrb[59].mxu0  ;;  %v3346_v52 = vadd.f32 %v3345_v7, %v5525_v11  ;;  %v813_v11 = vsel %vm803_vm4, %v810_v14, %v812_v47  ;;  %v807_v24 = vsel %vm805_vm1, %v5618_v29, 2102212464 }
 0x3e6   : > { %v4368_v5 = vpop.eup %4367  ;;  %v5662_v38 = vmul.u32.u64.low %v5653_v10, %v813_v11  ;;  %v5663_v26 = vmul.u32.u64.high %v5653_v10, %v813_v11, %v5662_v38  ;;  %v5669_v31 = vmul.u32.u64.low %v5653_v10, %v817_v48  ;;  %v5670_v14 = vmul.u32.u64.high %v5653_v10, %v817_v48, %v5669_v31 }
 0x3e7   : > { %4379 = vtanh.f32 %v3271_v32  ;;  %v4019_v49 = vpack.c.bf16 %v4368_v5, %v4366_v35  ;;  %v4370_v8 = vpop.eup %4369  ;;  %v5675_v7 = vmul.f32 0.5, %v886_v23  ;;  %v5678_v47 = vshrl.u32 %v623_v53, 30 }
 0x3e8   : > { %v3275_v13 = vpop.f32.mrb[60].mxu0  ;;  %v3350_v59 = vpop.f32.mrb[28].mxu1  ;;  %4381 = vtanh.f32 %v3281_v18  ;;  %v5680_v3 = vmul.f32 0.5, %v888_v15  ;;  %v806_v5 = vsel %vm802_vm14, %v786_v51, %v5614_v17  ;;  %v808_v29 = vsel %vm804_vm3, %v5616_v37, %v807_v24 }
 0x3e9   : > { %v4372_v19 = vpop.eup %4371  ;;  %v3276_v58 = vadd.f32 %v3275_v13, %v3052_v44  ;;  %v3351_v20 = vadd.f32 %v3350_v59, %v5509_v39  ;;  %4020 = vmatprep.subr.bf16.mxu0 %v4019_v49  ;;  %v3352_v22 = vpop.f32.mrb[29].mxu1  ;;  %4383 = vtanh.f32 %v3346_v52  ;;  %v891_v55 = vmul.f32 -0.9739065, %v5675_v7 }
 0x3ea   : > { %v3277_v33 = vpop.f32.mrb[61].mxu0  ;;  %4022 = vmatpush3.bf16.msra.mxu0 %v4021_v21  ;;  %v4025_v61 = vpack.c.bf16 %v4372_v19, %v4370_v8  ;;  %v4374_v27 = vpop.eup %4373  ;;  %v1009_v52 = vmul.f32 -0.86506337, %v5675_v7  ;;  %v625_v56 = vshll.u32 %v5678_v47, 30  ;;  %v809_v44 = vsel %vm803_vm4, %v806_v5, %v808_v29 }
 0x3eb   : > { %4385 = vtanh.f32 %v3276_v58  ;;  %v828_v37 = vadd.s32 1, %v5663_v26  ;;  %vm827_vm5 = vc.u32 %v5670_v14, %v5662_v38  ;;  %v825_v58 = vmul.u32 %v5653_v10, %v809_v44 }
 0x3ec   : > { %4387 = vtanh.f32 %v3351_v20  ;;  %v3355_v39 = vpop.f32.mrb[30].mxu1  ;;  %v5699_v49 = vadd.f32 %v1009_v52, %v5680_v3  ;;  %v5706_v12 = vsub.s32 %v5637_v41, %v625_v56 }
 0x3ed   : > { %v3357_v21 = vpop.f32.mrb[31].mxu1  ;;  %v4376_v62 = vpop.eup %4375  ;;  %v3356_v35 = vadd.f32 %v3355_v39, %v5611_v9  ;;  %v829_v22 = vsel %vm827_vm5, %v828_v37, %v5663_v26 }
 0x3ee   : > { %v4023_v18 = vpack.c.bf16 %v4376_v62, %v4374_v27  ;;  %v4378_v32 = vpop.eup %4377  ;;  %v1014_v11 = vand.u32 2139095040, %v5699_v49  ;;  %v628_v53 = vsub.s32 0, %v5706_v12  ;;  %v5711_v15 = vadd.s32 %v829_v22, %v825_v58 }
 0x3ef   : > { %4389 = vtanh.f32 %v3356_v35 }
 0x3f0   : > { %v3360_v1 = vpop.f32.mrb[32].mxu1  ;;  %4024 = vmatprep.subr.bf16.mxu0 %v4023_v18  ;;  %v1015_v48 = vshrl.u32 %v1014_v11, 23  ;;  %v5714_v10 = vmin.u32 %v628_v53, %v5706_v12  ;;  %v831_v26 = vadd.s32 536870912, %v5711_v15  ;;  %v1127_v18 = vmul.f32 -0.67940956, %v5675_v7 }
 0x3f1   : > { %v4380_v34 = vpop.eup %4379  ;;  %v3361_v2 = vadd.f32 %v3360_v1, %v5596_v46  ;;  %v3362_v9 = vpop.f32.mrb[33].mxu1  ;;  %4026 = vmatpush3.bf16.msra.mxu0 %v4025_v61  ;;  %v5696_v46 = vadd.f32 %v891_v55, %v5680_v3 }
 0x3f2   : > { %v4029_v36 = vpack.c.bf16 %v4380_v34, %v4378_v32  ;;  %v4382_v6 = vpop.eup %4381  ;;  %v3755_v61 = vadd.s32 4294967169, %v1015_v48  ;;  %v630_v1 = vclz %v5714_v10  ;;  %v5721_v34 = vshrl.u32 %v831_v26, 30 }
 0x3f3   : > { %4391 = vtanh.f32 %v3361_v2  ;;  %v4384_v17 = vpop.eup %4383  ;;  %v896_v19 = vand.u32 2139095040, %v5696_v46  ;;  %v893_v5 = vand.u32 2147483647, %v5696_v46 }
 0x3f4   : > { %v1021_v51 = vadd.s32 1, %v3755_v61  ;;  %v1011_v61 = vand.u32 2147483647, %v5699_v49 }
 0x3f5   : > { %v4386_v8 = vpop.eup %4385  ;;  %v897_v33 = vshrl.u32 %v896_v19, 23  ;;  %v900_v55 = vand.u32 8388607, %v893_v5 }
 0x3f6   : > { %v4388_v13 = vpop.eup %4387  ;;  %v4033_v59 = vpack.c.bf16 %v4382_v6, %v4386_v8  ;;  %vm1022_vm7 = vcmp.gt.s32.totalorder %v1021_v51, 0 }
 0x3f7   : > { %v4027_v20 = vpack.c.bf16 %v4388_v13, %v4384_v17  ;;  %v3751_v23 = vadd.s32 4294967169, %v897_v33  ;;  %v1023_v62 = vsel %vm1022_vm7, %v1021_v51, 0  ;;  %v901_v8 = vor.u32 8388608, %v900_v55 }
 0x3f8   : > { %v5717_v35 = vand.u32 31, %v1023_v62 }
 0x3f9   : > { %4028 = vmatprep.subr.bf16.mxu0 %v4027_v20  ;;  %v4390_v39 = vpop.eup %4389  ;;  %v903_v27 = vadd.s32 1, %v3751_v23  ;;  %v941_v22 = vshll.u32 %v901_v8, 8 }
 0x3fa   : > { %4030 = vmatpush3.bf16.msra.mxu0 %v4029_v36  ;;  %v5728_v9 = vsub.s32 32, %v5717_v35  ;;  %v5731_v36 = vadd.f32 %v1127_v18, %v5680_v3 }
 0x3fb   : > { %vm904_vm6 = vcmp.gt.s32.totalorder %v903_v27, 0 }
 0x3fc   : > { %v905_v21 = vsel %vm904_vm6, %v903_v27, 0  ;;  %v1037_v27 = vshll.u32 %v7143_v50, %v5717_v35  ;;  %v1038_v51 = vshrl.u32 %v7145_v54, %v5728_v9  ;;  %v1132_v10 = vand.u32 2139095040, %v5731_v36 }
 0x3fd   : > { %v4392_v41 = vpop.eup %4391  ;;  %v907_v24 = vand.u32 31, %v905_v21  ;;  %v906_v52 = vshrl.u32 %v905_v21, 5  ;;  %v1028_v21 = vshll.u32 %v7156_v40, %v5717_v35  ;;  %vm564_vm6 = vcmp.lt.s32.totalorder %v5469_v16, 0 }
 0x3fe   : > { %v4031_v31 = vpack.c.bf16 %v4392_v41, %v4390_v39 }
 0x3ff   : > { %v908_v32 = vsub.s32 32, %v907_v24  ;;  %v919_v29 = vshll.u32 %v7143_v50, %v907_v24  ;;  %v910_v6 = vshll.u32 %v7156_v40, %v907_v24  ;;  %v916_v44 = vshll.u32 %v7151_v45, %v907_v24 }
 0x400   : > { %4032 = vmatprep.subr.bf16.mxu0 %v4031_v31  ;;  %v922_v19 = vshll.u32 %v7145_v54, %v907_v24  ;;  %vm925_vm8 = vcmp.lt.s32.totalorder %v906_v52, 1  ;;  %vm926_vm0 = vcmp.lt.s32.totalorder %v906_v52, 2  ;;  %vm927_vm9 = vcmp.lt.s32.totalorder %v906_v52, 3 }
 0x401   : > { %4034 = vmatpush3.bf16.msra.mxu0 %v4033_v59  ;;  %v920_v2 = vshrl.u32 %v7145_v54, %v908_v32  ;;  %v911_v56 = vshrl.u32 %v7154_v42, %v908_v32  ;;  %v914_v17 = vshrl.u32 %v7151_v45, %v908_v32  ;;  %v917_v37 = vshrl.u32 %v7143_v50, %v908_v32 }
 0x402   : > { %v923_v20 = vshrl.u32 %v7147_v63, %v908_v32  ;;  %vm928_vm10 = vcmp.lt.s32.totalorder %v906_v52, 4  ;;  %v909_v41 = vshrl.u32 %v7156_v40, %v908_v32  ;;  %v1024_v32 = vshrl.u32 %v1023_v62, 5 }
 0x403   : > { %v912_v13 = vor.u32 %v911_v56, %v910_v6  ;;  %v921_v59 = vor.u32 %v920_v2, %v919_v29  ;;  %v918_v58 = vor.u32 %v917_v37, %v916_v44  ;;  %v1018_v44 = vand.u32 8388607, %v1011_v61 }
 0x404   : > { %3479 = vmatmul.mubr.f32.vlgmr.msra.gmra.mrb[62].mxu0 %v5426_v25  ;;  %v913_v25 = vshll.u32 %v7154_v42, %v907_v24  ;;  %v924_v33 = vor.u32 %v923_v20, %v922_v19  ;;  %v1029_v37 = vshrl.u32 %v7154_v42, %v5728_v9  ;;  %v1034_v62 = vshll.u32 %v7151_v45, %v5717_v35 }
 0x405   : > { %v934_v23 = vsel %vm928_vm10, %v921_v59, 920167782  ;;  %v930_v24 = vsel %vm928_vm10, %v918_v58, 2102212464  ;;  %v929_v55 = vsel %vm925_vm8, %v909_v41, %v912_v13  ;;  %v1039_v20 = vor.u32 %v1038_v51, %v1037_v27 }
 0x406   : > { %v915_v11 = vor.u32 %v914_v17, %v913_v25  ;;  %v935_v53 = vsel %vm927_vm9, %v918_v58, %v934_v23  ;;  %v938_v26 = vsel %vm928_vm10, %v924_v33, 1326507024  ;;  %v1040_v52 = vshll.u32 %v7145_v54, %v5717_v35 }
 0x407   : > { %v939_v18 = vsel %vm927_vm9, %v921_v59, %v938_v26  ;;  %v1031_v59 = vshll.u32 %v7154_v42, %v5717_v35  ;;  %vm1043_vm11 = vcmp.lt.s32.totalorder %v1024_v32, 1  ;;  %v1019_v23 = vor.u32 8388608, %v1018_v44 }
 0x408   : > { %v933_v48 = vsel %vm925_vm8, %v912_v13, %v915_v11  ;;  %v937_v39 = vsel %vm925_vm8, %v915_v11, %v918_v58  ;;  %v931_v6 = vsel %vm927_vm9, %v915_v11, %v930_v24  ;;  %v1032_v13 = vshrl.u32 %v7151_v45, %v5728_v9 }
 0x409   : > { %v936_v31 = vsel %vm926_vm0, %v933_v48, %v935_v53  ;;  %v940_v56 = vsel %vm926_vm0, %v937_v39, %v939_v18  ;;  %v932_v8 = vsel %vm926_vm0, %v929_v55, %v931_v6  ;;  %v1030_v11 = vor.u32 %v1029_v37, %v1028_v21 }
 0x40a   : > { %v5756_v29 = vmul.u32.u64.low %v941_v22, %v936_v31  ;;  %v5757_v2 = vmul.u32.u64.high %v941_v22, %v936_v31, %v5756_v29  ;;  %v5763_v25 = vmul.u32.u64.low %v941_v22, %v940_v56  ;;  %v5764_v17 = vmul.u32.u64.high %v941_v22, %v940_v56, %v5763_v25 }
 0x40b   : > { %v1035_v58 = vshrl.u32 %v7143_v50, %v5728_v9  ;;  %v1033_v33 = vor.u32 %v1032_v13, %v1031_v59  ;;  %v1041_v48 = vshrl.u32 %v7147_v63, %v5728_v9  ;;  %vm1045_vm13 = vcmp.lt.s32.totalorder %v1024_v32, 3 }
 0x40c   : > { %v951_v19 = vadd.s32 1, %v5757_v2  ;;  %vm950_vm12 = vc.u32 %v5764_v17, %v5756_v29  ;;  %v948_v39 = vmul.u32 %v941_v22, %v932_v8  ;;  %vm1044_vm14 = vcmp.lt.s32.totalorder %v1024_v32, 2 }
 0x40d   : > { %v1036_v53 = vor.u32 %v1035_v58, %v1034_v62  ;;  %v1042_v41 = vor.u32 %v1041_v48, %v1040_v52  ;;  %vm1046_vm15 = vcmp.lt.s32.totalorder %v1024_v32, 4  ;;  %v3741_v27 = vadd.s32 4294967294, %v630_v1 }
 0x40e   : > { %v952_v51 = vsel %vm950_vm12, %v951_v19, %v5757_v2  ;;  %v1051_v35 = vsel %vm1043_vm11, %v1030_v11, %v1033_v33  ;;  %v1052_v31 = vsel %vm1046_vm15, %v1039_v20, 920167782  ;;  %v833_v26 = vshll.u32 %v5721_v34, 30 }
 0x40f   : > { %v1053_v21 = vsel %vm1045_vm13, %v1036_v53, %v1052_v31  ;;  %v1055_v24 = vsel %vm1043_vm11, %v1033_v33, %v1036_v53  ;;  %v1056_v22 = vsel %vm1046_vm15, %v1042_v41, 1326507024  ;;  %v953_v1 = vadd.s32 %v952_v51, %v948_v39 }
 0x410   : > { %v1054_v18 = vsel %vm1044_vm14, %v1051_v35, %v1053_v21  ;;  %v1057_v55 = vsel %vm1045_vm13, %v1039_v20, %v1056_v22  ;;  %v1059_v6 = vshll.u32 %v1019_v23, 8  ;;  %vm3742_vm1 = vcmp.lt.s32.totalorder %v3741_v27, 0 }
 0x411   : > { %v1058_v2 = vsel %vm1044_vm14, %v1055_v24, %v1057_v55  ;;  %v5800_v56 = vsub.s32 %v5711_v15, %v833_v26  ;;  %v1027_v37 = vshrl.u32 %v7156_v40, %v5728_v9  ;;  %v1133_v13 = vshrl.u32 %v1132_v10, 23 }
 0x412   : > { %v5802_v25 = vmul.u32.u64.low %v1059_v6, %v1054_v18  ;;  %v5803_v44 = vmul.u32.u64.high %v1059_v6, %v1054_v18, %v5802_v25  ;;  %v5808_v8 = vmul.u32.u64.low %v1059_v6, %v1058_v2  ;;  %v5809_v59 = vmul.u32.u64.high %v1059_v6, %v1058_v2, %v5808_v8 }
 0x413   : > { %v954_v62 = vadd.s32 536870912, %v953_v1  ;;  %v1048_v19 = vsel %vm1046_vm15, %v1036_v53, 2102212464  ;;  %v633_v58 = vsel %vm3742_vm1, 0, %v3741_v27  ;;  %v836_v20 = vsub.s32 0, %v5800_v56 }
 0x414   : > { %v1047_v15 = vsel %vm1043_vm11, %v1027_v37, %v1030_v11  ;;  %v1049_v52 = vsel %vm1045_vm13, %v1033_v33, %v1048_v19  ;;  %v3759_v48 = vadd.s32 4294967169, %v1133_v13  ;;  %v638_v23 = vsub.s32 4294967266, %v633_v58 }
 0x415   : > { %v5815_v39 = vshrl.u32 %v954_v62, 30  ;;  %v1050_v9 = vsel %vm1044_vm14, %v1047_v15, %v1049_v52  ;;  %v1069_v41 = vadd.s32 1, %v5803_v44  ;;  %v3748_v51 = vmin.u32 %v836_v20, %v5800_v56 }
 0x416   : > { %vm1068_vm3 = vc.u32 %v5809_v59, %v5802_v25  ;;  %v1139_v53 = vadd.s32 1, %v3759_v48  ;;  %v618_v27 = vadd.s32 %v5553_v28, %v5562_v4  ;;  %v634_v11 = vsub.s32 32, %v633_v58 }
 0x417   : > { %v639_v35 = vadd.s32 127, %v638_v23  ;;  %v956_v33 = vshll.u32 %v5815_v39, 30  ;;  %v1066_v31 = vmul.u32 %v1059_v6, %v1050_v9  ;;  %v1070_v26 = vsel %vm1068_vm3, %v1069_v41, %v5803_v44 }
 0x418   : > { %v838_v32 = vclz %v3748_v51  ;;  %vm1140_vm4 = vcmp.gt.s32.totalorder %v1139_v53, 0  ;;  %v635_v21 = vshll.u32 %v5706_v12, %v633_v58  ;;  %v636_v24 = vshrl.u32 %v618_v27, %v634_v11 }
 0x419   : > { %v640_v22 = vshll.u32 %v639_v35, 23  ;;  %v5827_v18 = vsub.s32 %v953_v1, %v956_v33  ;;  %v1071_v55 = vadd.s32 %v1070_v26, %v1066_v31  ;;  %v1141_v10 = vsel %vm1140_vm4, %v1139_v53, 0 }
 0x41a   : > { %v3749_v2 = vadd.s32 4294967294, %v838_v32  ;;  %v1245_v28 = vmul.f32 -0.4333954, %v5675_v7  ;;  %v637_v4 = vor.u32 %v636_v24, %v635_v21  ;;  %v1143_v13 = vand.u32 31, %v1141_v10 }
 0x41b   : > { %v641_v37 = vor.u32 4788187, %v640_v22  ;;  %v959_v8 = vsub.s32 0, %v5827_v18  ;;  %v1072_v6 = vadd.s32 536870912, %v1071_v55  ;;  %v826_v48 = vadd.s32 %v5662_v38, %v5670_v14 }
 0x41c   : > { %vm3750_vm5 = vcmp.lt.s32.totalorder %v3749_v2, 0  ;;  %v5832_v44 = vadd.f32 %v1245_v28, %v5680_v3  ;;  %v644_v62 = vcvt.s32.f32 %v637_v4  ;;  %v5837_v58 = vsub.s32 32, %v1143_v13 }
 0x41d   : > { %v642_v12 = vand.u32 2147483647, %v641_v37  ;;  %v3752_v1 = vmin.u32 %v959_v8, %v5827_v18  ;;  %v5835_v19 = vshrl.u32 %v1072_v6, 30  ;;  %v841_v20 = vsel %vm3750_vm5, 0, %v3749_v2 }
 0x41e   : > { %v1250_v15 = vand.u32 2139095040, %v5832_v44  ;;  %v842_v23 = vsub.s32 32, %v841_v20  ;;  %v846_v41 = vsub.s32 4294967266, %v841_v20  ;;  %v1155_v53 = vshll.u32 %v7143_v50, %v1143_v13 }
 0x41f   : > { %v645_v52 = vmul.f32 %v644_v62, %v642_v12  ;;  %v961_v9 = vclz %v3752_v1  ;;  %v1074_v51 = vshll.u32 %v5835_v19, 30  ;;  %v1156_v27 = vshrl.u32 %v7145_v54, %v5837_v58 }
 0x420   : > { %v7142_v11 = vand.u32 2147483647, %v5731_v36  ;;  %v5847_v35 = vshrl.u32 %v1141_v10, 5  ;;  %v1158_v33 = vshll.u32 %v7145_v54, %v1143_v13  ;;  %v1159_v31 = vshrl.u32 %v7147_v63, %v5837_v58 }
 0x421   : > { %v1146_v38 = vshll.u32 %v7156_v40, %v1143_v13  ;;  %v1147_v14 = vshrl.u32 %v7154_v42, %v5837_v58  ;;  %v1149_v26 = vshll.u32 %v7154_v42, %v1143_v13  ;;  %v1251_v32 = vshrl.u32 %v1250_v15, 23 }
 0x422   : > { %v3753_v21 = vadd.s32 4294967294, %v961_v9  ;;  %v1150_v24 = vshrl.u32 %v7151_v45, %v5837_v58  ;;  %v1152_v22 = vshll.u32 %v7151_v45, %v1143_v13  ;;  %v1153_v10 = vshrl.u32 %v7143_v50, %v5837_v58 }
 0x423   : > { %v648_v2 = vsub.s32 4, %v5678_v47  ;;  %v5863_v28 = vsub.s32 %v1071_v55, %v1074_v51  ;;  %v1157_v4 = vor.u32 %v1156_v27, %v1155_v53  ;;  %v843_v37 = vshll.u32 %v5800_v56, %v841_v20 }
 0x424   : > { %v1136_v8 = vand.u32 8388607, %v7142_v11  ;;  %v1160_v6 = vor.u32 %v1159_v31, %v1158_v33  ;;  %vm1164_vm7 = vcmp.lt.s32.totalorder %v5847_v35, 4  ;;  %v646_v12 = vxor.u32 2147483648, %v645_v52 }
 0x425   : > { %v844_v13 = vshrl.u32 %v826_v48, %v842_v23  ;;  %v847_v62 = vadd.s32 127, %v846_v41  ;;  %v3763_v1 = vadd.s32 4294967169, %v1251_v32  ;;  %vm3754_vm8 = vcmp.lt.s32.totalorder %v3753_v21, 0 }
 0x426   : > { %v1148_v15 = vor.u32 %v1147_v14, %v1146_v38  ;;  %v1151_v9 = vor.u32 %v1150_v24, %v1149_v26  ;;  %v1154_v43 = vor.u32 %v1153_v10, %v1152_v22  ;;  %v1077_v55 = vsub.s32 0, %v5863_v28 }
 0x427   : > { %vm1161_vm0 = vcmp.lt.s32.totalorder %v5847_v35, 1  ;;  %vm1163_vm9 = vcmp.lt.s32.totalorder %v5847_v35, 3  ;;  %v1170_v56 = vsel %vm1164_vm7, %v1157_v4, 920167782  ;;  %vm5876_vm10 = vcmp.le.f32.partialorder %v562_v57, 0.7853982 }
 0x428   : > { %v1137_v48 = vor.u32 8388608, %v1136_v8  ;;  %v1174_v23 = vsel %vm1164_vm7, %v1160_v6, 1326507024  ;;  %v649_v41 = vsel %vm564_vm6, %v648_v2, %v5678_v47  ;;  %v848_v51 = vshll.u32 %v847_v62, 23 }
 0x429   : > { %v964_v53 = vsel %vm3754_vm8, 0, %v3753_v21  ;;  %v1257_v27 = vadd.s32 1, %v3763_v1  ;;  %v647_v33 = vsel %vm564_vm6, %v646_v12, %v645_v52  ;;  %vm1162_vm11 = vcmp.lt.s32.totalorder %v5847_v35, 2 }
 0x42a   : > { %v1169_v57 = vsel %vm1161_vm0, %v1148_v15, %v1151_v9  ;;  %v1171_v31 = vsel %vm1163_vm9, %v1154_v43, %v1170_v56  ;;  %v845_v38 = vor.u32 %v844_v13, %v843_v37  ;;  %v3756_v14 = vmin.u32 %v1077_v55, %v5863_v28 }
 0x42b   : > { %v1173_v47 = vsel %vm1161_vm0, %v1151_v9, %v1154_v43  ;;  %v1175_v26 = vsel %vm1163_vm9, %v1157_v4, %v1174_v23  ;;  %v969_v32 = vsub.s32 4294967266, %v964_v53  ;;  %v5897_v21 = vshll.u32 %v1137_v48, 8 }
 0x42c   : > { %v849_v52 = vor.u32 4788187, %v848_v51  ;;  %v1172_v24 = vsel %vm1162_vm11, %v1169_v57, %v1171_v31  ;;  %vm1258_vm12 = vcmp.gt.s32.totalorder %v1257_v27, 0  ;;  %v650_v22 = vsel %vm5876_vm10, %v5469_v16, %v647_v33 }
 0x42d   : > { %v651_v10 = vsel %vm5876_vm10, 0, %v649_v41  ;;  %v1176_v2 = vsel %vm1162_vm11, %v1173_v47, %v1175_v26  ;;  %v1363_v4 = vmul.f32 -0.14887434, %v5675_v7  ;;  %v852_v37 = vcvt.s32.f32 %v845_v38 }
 0x42e   : > { %v949_v8 = vadd.s32 %v5756_v29, %v5764_v17  ;;  %v965_v6 = vsub.s32 32, %v964_v53  ;;  %v1079_v12 = vclz %v3756_v14  ;;  %v970_v13 = vadd.s32 127, %v969_v32 }
 0x42f   : > { %v5912_v62 = vmul.u32.u64.low %v5897_v21, %v1172_v24  ;;  %v5913_v1 = vmul.u32.u64.high %v5897_v21, %v1172_v24, %v5912_v62  ;;  %v1259_v16 = vsel %vm1258_vm12, %v1257_v27, 0  ;;  %v850_v55 = vand.u32 2147483647, %v849_v52 }
 0x430   : > { %v1145_v56 = vshrl.u32 %v7156_v40, %v5837_v58  ;;  %v5919_v20 = vmul.u32.u64.low %v5897_v21, %v1176_v2  ;;  %v5920_v48 = vmul.u32.u64.high %v5897_v21, %v1176_v2, %v5919_v20  ;;  %v856_v23 = vsub.s32 4, %v5721_v34 }
 0x431   : > { %v1166_v29 = vsel %vm1164_vm7, %v1154_v43, 2102212464  ;;  %v5926_v17 = vadd.f32 %v1363_v4, %v5680_v3  ;;  %v966_v41 = vshll.u32 %v5827_v18, %v964_v53  ;;  %v967_v51 = vshrl.u32 %v949_v8, %v965_v6 }
 0x432   : > { %v3757_v27 = vadd.s32 4294967294, %v1079_v12  ;;  %v1261_v33 = vand.u32 31, %v1259_v16  ;;  %4393 = vcosq.f32 %v650_v22  ;;  %v655_v57 = vadd.s32 3, %v651_v10 }
 0x433   : > { %vm772_vm13 = vcmp.lt.s32.totalorder %v5454_v60, 0  ;;  %v971_v58 = vshll.u32 %v970_v13, 23  ;;  %4395 = vsinq.f32 %v650_v22  ;;  %v853_v31 = vmul.f32 %v852_v37, %v850_v55 }
 0x434   : > { %v1165_v38 = vsel %vm1161_vm0, %v1145_v56, %v1148_v15  ;;  %v1167_v43 = vsel %vm1163_vm9, %v1151_v9, %v1166_v29  ;;  %v857_v18 = vsel %vm772_vm13, %v856_v23, %v5721_v34  ;;  %v1368_v53 = vand.u32 2139095040, %v5926_v17 }
 0x435   : > { %v5938_v14 = vand.u32 3, %v651_v10  ;;  %v968_v47 = vor.u32 %v967_v51, %v966_v41  ;;  %vm3758_vm14 = vcmp.lt.s32.totalorder %v3757_v27, 0  ;;  %v5940_v26 = vsub.s32 32, %v1261_v33 }
 0x436   : > { %vm5944_vm15 = vcmp.le.f32.partialorder %v770_v0, 0.7853982  ;;  %v972_v15 = vor.u32 4788187, %v971_v58  ;;  %v1168_v9 = vsel %vm1162_vm11, %v1165_v38, %v1167_v43  ;;  %v1187_v34 = vadd.s32 1, %v5913_v1 }
 0x437   : > { %v5951_v52 = vand.u32 3, %v655_v57  ;;  %v854_v24 = vxor.u32 2147483648, %v853_v31  ;;  %v859_v22 = vsel %vm5944_vm15, 0, %v857_v18  ;;  %vm1186_vm1 = vc.u32 %v5920_v48, %v5912_v62 }
 0x438   : > { %v5957_v10 = vsel %vm3758_vm14, 0, %v3757_v27  ;;  %v7141_v0 = vand.u32 2147483647, %v5832_v44  ;;  %v5960_v2 = vshrl.u32 %v1259_v16, 5  ;;  %v1369_v4 = vshrl.u32 %v1368_v53, 23 }
 0x439   : > { %vm764_vm3 = vcmp.eq.s32.totalorder %v5938_v14, 2  ;;  %v975_v35 = vcvt.s32.f32 %v968_v47  ;;  %v1184_v37 = vmul.u32 %v5897_v21, %v1168_v9  ;;  %v1273_v8 = vshll.u32 %v7143_v50, %v1261_v33 }
 0x43a   : > { %v1274_v6 = vshrl.u32 %v7145_v54, %v5940_v26  ;;  %vm761_vm4 = vcmp.eq.s32.totalorder %v5938_v14, 0  ;;  %v973_v12 = vand.u32 2147483647, %v972_v15  ;;  %v1188_v13 = vsel %vm1186_vm1, %v1187_v34, %v5913_v1 }
 0x43b   : > { %v1276_v55 = vshll.u32 %v7145_v54, %v1261_v33  ;;  %v1277_v16 = vshrl.u32 %v7147_v63, %v5940_v26  ;;  %v5972_v56 = vadd.s32 3, %v859_v22  ;;  %v1087_v20 = vsub.s32 4294967266, %v5957_v10 }
 0x43c   : > { %v1264_v21 = vshll.u32 %v7156_v40, %v1261_v33  ;;  %v1265_v23 = vshrl.u32 %v7154_v42, %v5940_v26  ;;  %v5978_v29 = vpop.eup %4393  ;;  %v1267_v41 = vshll.u32 %v7154_v42, %v1261_v33  ;;  %v1268_v1 = vshrl.u32 %v7151_v45, %v5940_v26 }
 0x43d   : > { %v1270_v51 = vshll.u32 %v7151_v45, %v1261_v33  ;;  %v1271_v27 = vshrl.u32 %v7143_v50, %v5940_v26  ;;  %v5986_v57 = vpop.eup %4395  ;;  %vm760_vm5 = vcmp.lt.s32.totalorder %v5938_v14, 2  ;;  %v855_v58 = vsel %vm772_vm13, %v854_v24, %v853_v31 }
 0x43e   : > { %v5991_v38 = vadd.s32 %v1188_v13, %v1184_v37  ;;  %v1275_v43 = vor.u32 %v1274_v6, %v1273_v8  ;;  %v3767_v18 = vadd.s32 4294967169, %v1369_v4  ;;  %v976_v53 = vmul.f32 %v975_v35, %v973_v12 }
 0x43f   : > { %v1254_v47 = vand.u32 8388607, %v7141_v0  ;;  %v1278_v15 = vor.u32 %v1277_v16, %v1276_v55  ;;  %vm1282_vm6 = vcmp.lt.s32.totalorder %v5960_v2, 4  ;;  %v662_v33 = vxor.u32 2147483648, %v5978_v29 }
 0x440   : > { %v1067_v9 = vadd.s32 %v5802_v25, %v5809_v59  ;;  %v1083_v34 = vsub.s32 32, %v5957_v10  ;;  %v1088_v22 = vadd.s32 127, %v1087_v20  ;;  %v659_v31 = vxor.u32 2147483648, %v5986_v57 }
 0x441   : > { %v6001_v24 = vor.u32 %v1265_v23, %v1264_v21  ;;  %v6003_v4 = vor.u32 %v1268_v1, %v1267_v41  ;;  %v1272_v35 = vor.u32 %v1271_v27, %v1270_v51  ;;  %vm658_vm7 = vcmp.eq.s32.totalorder %v5951_v52, 0  ;;  %v6028_v41 = vld [vmem:[%s5267_s13] sm:$0x1] }
 0x442   : > { %vm661_vm8 = vcmp.eq.s32.totalorder %v5951_v52, 2  ;;  %v1190_v37 = vadd.s32 536870912, %v5991_v38  ;;  %vm1279_vm0 = vcmp.lt.s32.totalorder %v5960_v2, 1  ;;  %vm1281_vm9 = vcmp.lt.s32.totalorder %v5960_v2, 3 }
 0x443   : > { %v1288_v25 = vsel %vm1282_vm6, %v1275_v43, 920167782  ;;  %v977_v59 = vxor.u32 2147483648, %v976_v53  ;;  %v1255_v8 = vor.u32 8388608, %v1254_v47  ;;  %v1292_v6 = vsel %vm1282_vm6, %v1278_v15, 1326507024 }
 0x444   : > { %v1375_v12 = vadd.s32 1, %v3767_v18  ;;  %vm895_vm10 = vcmp.lt.s32.totalorder %v5696_v46, 0  ;;  %v1084_v13 = vshll.u32 %v5863_v28, %v5957_v10  ;;  %v1085_v55 = vshrl.u32 %v1067_v9, %v1083_v34 }
 0x445   : > { %v1089_v16 = vshll.u32 %v1088_v22, 23  ;;  %v766_v20 = vsel %vm764_vm3, %v662_v33, %v5986_v57  ;;  %vm1280_vm11 = vcmp.lt.s32.totalorder %v5960_v2, 2  ;;  %v1287_v21 = vsel %vm1279_vm0, %v6001_v24, %v6003_v4 }
 0x446   : > { %v1289_v23 = vsel %vm1281_vm9, %v1272_v35, %v1288_v25  ;;  %vm654_vm12 = vweird.f32 %v6028_v41  ;;  %v763_v28 = vsel %vm761_vm4, %v5978_v29, %v659_v31  ;;  %v6034_v10 = vshrl.u32 %v1190_v37, 30 }
 0x447   : > { %v1291_v1 = vsel %vm1279_vm0, %v6003_v4, %v1272_v35  ;;  %v1293_v51 = vsel %vm1281_vm9, %v1275_v43, %v1292_v6  ;;  %vm6043_vm13 = vcmp.le.f32.partialorder %v893_v5, 0.7853982  ;;  %v978_v18 = vsel %vm895_vm10, %v977_v59, %v976_v53 }
 0x448   : > { %v979_v47 = vsub.s32 4, %v5815_v39  ;;  %v6050_v15 = vshll.u32 %v1255_v8, 8  ;;  %vm657_vm14 = vcmp.lt.s32.totalorder %v5951_v52, 2  ;;  %v1086_v9 = vor.u32 %v1085_v55, %v1084_v13 }
 0x449   : > { %v1090_v34 = vor.u32 4788187, %v1089_v16  ;;  %v1290_v43 = vsel %vm1280_vm11, %v1287_v21, %v1289_v23  ;;  %vm1376_vm1 = vcmp.gt.s32.totalorder %v1375_v12, 0  ;;  %v767_v5 = vsel %vm760_vm5, %v763_v28, %v766_v20 }
 0x44a   : > { %v858_v22 = vsel %vm5944_vm15, %v5454_v60, %v855_v58  ;;  %v1294_v53 = vsel %vm1280_vm11, %v1291_v1, %v1293_v51  ;;  %v1481_v37 = vmul.f32 0.14887434, %v5675_v7  ;;  %v981_v25 = vsel %vm6043_vm13, %v5696_v46, %v978_v18 }
 0x44b   : > { %v1097_v59 = vsub.s32 4, %v5835_v19  ;;  %v1192_v8 = vshll.u32 %v6034_v10, 30  ;;  %v1263_v14 = vshrl.u32 %v7156_v40, %v5940_v26  ;;  %v980_v32 = vsel %vm895_vm10, %v979_v47, %v5815_v39 }
 0x44c   : > { %v6074_v58 = vmul.u32.u64.low %v6050_v15, %v1290_v43  ;;  %v6075_v6 = vmul.u32.u64.high %v6050_v15, %v1290_v43, %v6074_v58  ;;  %v1377_v13 = vsel %vm1376_vm1, %v1375_v12, 0  ;;  %v1091_v55 = vand.u32 2147483647, %v1090_v34  ;;  %v4445_v34 = vld [vmem:[%s5267_s13 + $0x1] sm:$0x1] }
 0x44d   : > { %v1093_v16 = vcvt.s32.f32 %v1086_v9  ;;  %v6079_v20 = vmul.u32.u64.low %v6050_v15, %v1294_v53  ;;  %v6080_v21 = vmul.u32.u64.high %v6050_v15, %v1294_v53, %v6079_v20  ;;  %v660_v26 = vsel %vm658_vm7, %v5978_v29, %v659_v31 }
 0x44e   : > { %v663_v39 = vsel %vm661_vm8, %v662_v33, %v5986_v57  ;;  %v1284_v23 = vsel %vm1282_vm6, %v1272_v35, 2102212464  ;;  %v6091_v28 = vadd.f32 %v1481_v37, %v5680_v3  ;;  %v982_v12 = vsel %vm6043_vm13, 0, %v980_v32 }
 0x44f   : > { %4397 = vcosq.f32 %v981_v25  ;;  %vm1013_vm15 = vcmp.lt.s32.totalorder %v5699_v49, 0  ;;  %v1379_v1 = vand.u32 31, %v1377_v13  ;;  %v768_v29 = vsel %vm654_vm12, nan, %v767_v5 }
 0x450   : > { %4399 = vsinq.f32 %v981_v25  ;;  %v1098_v57 = vsel %vm1013_vm15, %v1097_v59, %v5835_v19  ;;  %v1598_v33 = vmul.f32 0.4333954, %v5675_v7  ;;  %v1094_v31 = vmul.f32 %v1093_v16, %v1091_v55 }
 0x451   : > { %v6103_v35 = vsub.s32 %v5991_v38, %v1192_v8  ;;  %v1283_v51 = vsel %vm1279_vm0, %v1263_v14, %v6001_v24  ;;  %v1285_v27 = vsel %vm1281_vm9, %v6003_v4, %v1284_v23  ;;  %4401 = vcosq.f32 %v858_v22 }
 0x452   : > { %v986_v18 = vadd.s32 3, %v982_v12  ;;  %vm6113_vm3 = vcmp.le.f32.partialorder %v1011_v61, 0.7853982  ;;  %v1486_v47 = vand.u32 2139095040, %v6091_v28  ;;  %4403 = vsinq.f32 %v858_v22 }
 0x453   : > { %v6119_v38 = vand.u32 3, %v5972_v56  ;;  %v1100_v24 = vsel %vm6113_vm3, 0, %v1098_v57  ;;  %v6123_v9 = vsub.s32 32, %v1379_v1  ;;  %v6127_v4 = vsel %vm657_vm14, %v660_v26, %v663_v39 }
 0x454   : > { %v6130_v61 = vmul.f32 %v4445_v34, %v768_v29  ;;  %v1286_v43 = vsel %vm1280_vm11, %v1283_v51, %v1285_v27  ;;  %v1305_v5 = vadd.s32 1, %v6075_v6  ;;  %v1095_v22 = vxor.u32 2147483648, %v1094_v31 }
 0x455   : > { %v1195_v56 = vsub.s32 0, %v6103_v35  ;;  %vm1304_vm4 = vc.u32 %v6080_v21, %v6074_v58  ;;  %v6139_v53 = vadd.f32 %v1598_v33, %v5680_v3  ;;  %v6141_v52 = vand.u32 3, %v986_v18 }
 0x456   : > { %v6143_v37 = vadd.s32 3, %v1100_v24  ;;  %v6147_v25 = vadd.s32 %v5912_v62, %v5920_v48  ;;  %v1487_v2 = vshrl.u32 %v1486_v47, 23  ;;  %v1302_v59 = vmul.u32 %v6050_v15, %v1286_v43 }
 0x457   : > { %7227 = vst [vmem:[#allocation36_spill] sm:$0xff] %v6139_v53  ;;  %v7140_v8 = vand.u32 2147483647, %v5926_v17  ;;  %v1391_v14 = vshll.u32 %v7143_v50, %v1379_v1  ;;  %v1392_v32 = vshrl.u32 %v7145_v54, %v6123_v9  ;;  %v1306_v55 = vsel %vm1304_vm4, %v1305_v5, %v6075_v6 }
 0x458   : > { %v6155_v16 = vshrl.u32 %v1377_v13, 5  ;;  %v1394_v20 = vshll.u32 %v7145_v54, %v1379_v1  ;;  %v1395_v62 = vshrl.u32 %v7147_v63, %v6123_v9  ;;  %v1096_v15 = vsel %vm1013_vm15, %v1095_v22, %v1094_v31 }
 0x459   : > { %v4398_v48 = vpop.eup %4397  ;;  %v3760_v26 = vmin.u32 %v1195_v56, %v6103_v35  ;;  %v1382_v39 = vshll.u32 %v7156_v40, %v1379_v1  ;;  %v1385_v23 = vshll.u32 %v7154_v42, %v1379_v1  ;;  %v1383_v6 = vshrl.u32 %v7154_v42, %v6123_v9 }
 0x45a   : > { %v4400_v12 = vpop.eup %4399  ;;  %v1386_v13 = vshrl.u32 %v7151_v45, %v6123_v9  ;;  %v1388_v29 = vshll.u32 %v7151_v45, %v1379_v1  ;;  %v1389_v57 = vshrl.u32 %v7143_v50, %v6123_v9  ;;  %vm989_vm5 = vcmp.eq.s32.totalorder %v6141_v52, 0 }
 0x45b   : > { %vm992_vm6 = vcmp.eq.s32.totalorder %v6141_v52, 2  ;;  %v6174_v33 = vadd.s32 %v1306_v55, %v1302_v59  ;;  %v1393_v31 = vor.u32 %v1392_v32, %v1391_v14  ;;  %v6176_v51 = vpop.eup %4401  ;;  %vm988_vm7 = vcmp.lt.s32.totalorder %v6141_v52, 2 }
 0x45c   : > { %v1372_v27 = vand.u32 8388607, %v7140_v8  ;;  %v1396_v18 = vor.u32 %v1395_v62, %v1394_v20  ;;  %vm1400_vm8 = vcmp.lt.s32.totalorder %v6155_v16, 4  ;;  %v6182_v1 = vpop.eup %4403  ;;  %v990_v47 = vxor.u32 2147483648, %v4400_v12 }
 0x45d   : > { %v993_v24 = vxor.u32 2147483648, %v4398_v48  ;;  %v1099_v34 = vsel %vm6113_vm3, %v5699_v49, %v1096_v15  ;;  %v1197_v43 = vclz %v3760_v26  ;;  %v1384_v5 = vor.u32 %v1383_v6, %v1382_v39 }
 0x45e   : > { %v1387_v22 = vor.u32 %v1386_v13, %v1385_v23  ;;  %v1390_v56 = vor.u32 %v1389_v57, %v1388_v29  ;;  %v3771_v59 = vadd.s32 4294967169, %v1487_v2  ;;  %v1308_v14 = vadd.s32 536870912, %v6174_v33 }
 0x45f   : > { %vm1397_vm0 = vcmp.lt.s32.totalorder %v6155_v16, 1  ;;  %vm1399_vm9 = vcmp.lt.s32.totalorder %v6155_v16, 3  ;;  %v1406_v32 = vsel %vm1400_vm8, %v1393_v31, 920167782  ;;  %4405 = vcosq.f32 %v1099_v34 }
 0x460   : > { %v1373_v55 = vor.u32 8388608, %v1372_v27  ;;  %v1410_v19 = vsel %vm1400_vm8, %v1396_v18, 1326507024  ;;  %v1493_v20 = vadd.s32 1, %v3771_v59  ;;  %v867_v62 = vxor.u32 2147483648, %v6182_v1 }
 0x461   : > { %v991_v2 = vsel %vm989_vm5, %v4398_v48, %v990_v47  ;;  %v994_v15 = vsel %vm992_vm6, %v993_v24, %v4400_v12  ;;  %v3761_v26 = vadd.s32 4294967294, %v1197_v43  ;;  %vm1398_vm10 = vcmp.lt.s32.totalorder %v6155_v16, 2 }
 0x462   : > { %v1405_v39 = vsel %vm1397_vm0, %v1384_v5, %v1387_v22  ;;  %v1407_v23 = vsel %vm1399_vm9, %v1390_v56, %v1406_v32  ;;  %vm1494_vm11 = vcmp.gt.s32.totalorder %v1493_v20, 0  ;;  %v6204_v6 = vshrl.u32 %v1308_v14, 30 }
 0x463   : > { %v1409_v13 = vsel %vm1397_vm0, %v1387_v22, %v1390_v56  ;;  %v1411_v48 = vsel %vm1399_vm9, %v1393_v31, %v1410_v19  ;;  %v1495_v29 = vsel %vm1494_vm11, %v1493_v20, 0  ;;  %vm866_vm13 = vcmp.eq.s32.totalorder %v6119_v38, 0 }
 0x464   : > { %v1381_v12 = vshrl.u32 %v7156_v40, %v6123_v9  ;;  %v6213_v57 = vshll.u32 %v1373_v55, 8  ;;  %v1497_v27 = vand.u32 31, %v1495_v29  ;;  %4407 = vsinq.f32 %v1099_v34 }
 0x465   : > { %v6216_v18 = vand.u32 3, %v6143_v37  ;;  %v1215_v47 = vsub.s32 4, %v6034_v10  ;;  %v1408_v24 = vsel %vm1398_vm10, %v1405_v39, %v1407_v23  ;;  %vm869_vm14 = vcmp.eq.s32.totalorder %v6119_v38, 2 }
 0x466   : > { %v870_v31 = vxor.u32 2147483648, %v6176_v51  ;;  %vm985_vm1 = vweird.f32 %v5696_v46  ;;  %vm3762_vm15 = vcmp.lt.s32.totalorder %v3761_v26, 0  ;;  %v1412_v9 = vsel %vm1398_vm10, %v1409_v13, %v1411_v48 }
 0x467   : > { %v868_v34 = vsel %vm866_vm13, %v6176_v51, %v867_v62  ;;  %v995_v37 = vsel %vm988_vm7, %v991_v2, %v994_v15  ;;  %v1310_v43 = vshll.u32 %v6204_v6, 30  ;;  %v6230_v59 = vsub.s32 32, %v1497_v27 }
 0x468   : > { %v1401_v14 = vsel %vm1397_vm0, %v1381_v12, %v1384_v5  ;;  %v1402_v32 = vsel %vm1400_vm8, %v1390_v56, 2102212464  ;;  %v6237_v55 = vmul.u32.u64.low %v6213_v57, %v1408_v24  ;;  %v6238_v19 = vmul.u32.u64.high %v6213_v57, %v1408_v24, %v6237_v55 }
 0x469   : > { %v6242_v51 = vmul.u32.u64.low %v6213_v57, %v1412_v9  ;;  %v6243_v20 = vmul.u32.u64.high %v6213_v57, %v1412_v9, %v6242_v51  ;;  %v7150_v52 = vand.u32 2147483647, %v6091_v28  ;;  %v1603_v62 = vand.u32 2139095040, %v6139_v53  ;;  %v6247_v2 = vpop.eup %4405 }
 0x46a   : > { %vm865_vm3 = vcmp.lt.s32.totalorder %v6119_v38, 2  ;;  %v6250_v5 = vshrl.u32 %v1495_v29, 5  ;;  %v1500_v56 = vshll.u32 %v7156_v40, %v1497_v27  ;;  %v1503_v15 = vshll.u32 %v7154_v42, %v1497_v27 }
 0x46b   : > { %v1509_v39 = vshll.u32 %v7143_v50, %v1497_v27  ;;  %v1501_v23 = vshrl.u32 %v7154_v42, %v6230_v59  ;;  %v1504_v13 = vshrl.u32 %v7151_v45, %v6230_v59  ;;  %v1506_v48 = vshll.u32 %v7151_v45, %v1497_v27 }
 0x46c   : > { %v1507_v12 = vshrl.u32 %v7143_v50, %v6230_v59  ;;  %vm1131_vm4 = vcmp.lt.s32.totalorder %v5731_v36, 0  ;;  %v1403_v29 = vsel %vm1399_vm9, %v1387_v22, %v1402_v32  ;;  %v1510_v24 = vshrl.u32 %v7145_v54, %v6230_v59 }
 0x46d   : > { %v1512_v9 = vshll.u32 %v7145_v54, %v1497_v27  ;;  %v1513_v51 = vshrl.u32 %v7147_v63, %v6230_v59  ;;  %v871_v8 = vsel %vm869_vm14, %v870_v31, %v6182_v1  ;;  %v6274_v0 = vsel %vm3762_vm15, 0, %v3761_v26 }
 0x46e   : > { %v6277_v11 = vsub.s32 %v6174_v33, %v1310_v43  ;;  %v1490_v22 = vand.u32 8388607, %v7150_v52  ;;  %v1511_v32 = vor.u32 %v1510_v24, %v1509_v39  ;;  %vm1518_vm5 = vcmp.lt.s32.totalorder %v6250_v5, 4  ;;  %v6282_v54 = vpop.eup %4407 }
 0x46f   : > { %v1514_v50 = vor.u32 %v1513_v51, %v1512_v9  ;;  %v1604_v27 = vshrl.u32 %v1603_v62, 23  ;;  %v1404_v63 = vsel %vm1398_vm10, %v1401_v14, %v1403_v29  ;;  %v1502_v1 = vor.u32 %v1501_v23, %v1500_v56 }
 0x470   : > { %v1505_v31 = vor.u32 %v1504_v13, %v1503_v15  ;;  %v1508_v26 = vor.u32 %v1507_v12, %v1506_v48  ;;  %vm862_vm6 = vweird.f32 %v5454_v60  ;;  %v1423_v33 = vadd.s32 1, %v6238_v19 }
 0x471   : > { %vm1515_vm7 = vcmp.lt.s32.totalorder %v6250_v5, 1  ;;  %vm1517_vm8 = vcmp.lt.s32.totalorder %v6250_v5, 3  ;;  %v1524_v43 = vsel %vm1518_vm5, %v1511_v32, 920167782  ;;  %v6294_v62 = vsel %vm985_vm1, nan, %v995_v37 }
 0x472   : > { %vm1422_vm0 = vc.u32 %v6243_v20, %v6237_v55  ;;  %v1491_v16 = vor.u32 8388608, %v1490_v22  ;;  %v1528_v14 = vsel %vm1518_vm5, %v1514_v50, 1326507024  ;;  %v1201_v56 = vsub.s32 32, %v6274_v0 }
 0x473   : > { %v1205_v15 = vsub.s32 4294967266, %v6274_v0  ;;  %v1313_v39 = vsub.s32 0, %v6277_v11  ;;  %v3775_v23 = vadd.s32 4294967169, %v1604_v27  ;;  %v1420_v13 = vmul.u32 %v6213_v57, %v1404_v63 }
 0x474   : > { %vm1516_vm9 = vcmp.lt.s32.totalorder %v6250_v5, 2  ;;  %v1523_v46 = vsel %vm1515_vm7, %v1502_v1, %v1505_v31  ;;  %v1525_v37 = vsel %vm1517_vm8, %v1508_v26, %v1524_v43  ;;  %v1424_v48 = vsel %vm1422_vm0, %v1423_v33, %v6238_v19 }
 0x475   : > { %v1527_v50 = vsel %vm1515_vm7, %v1505_v31, %v1508_v26  ;;  %v1529_v12 = vsel %vm1517_vm8, %v1511_v32, %v1528_v14  ;;  %v1610_v29 = vadd.s32 1, %v3775_v23  ;;  %v872_v63 = vsel %vm865_vm3, %v868_v34, %v871_v8 }
 0x476   : > { %vm1107_vm10 = vcmp.eq.s32.totalorder %v6216_v18, 0  ;;  %v6322_v57 = vsel %vm1131_vm4, %v1215_v47, %v6034_v10  ;;  %v6324_v19 = vshll.u32 %v1491_v16, 8  ;;  %v1001_v24 = vmul.f32 %v6294_v62, %v6294_v62 }
 0x477   : > { %v1202_v9 = vshll.u32 %v6103_v35, %v6274_v0  ;;  %v1526_v38 = vsel %vm1516_vm9, %v1523_v46, %v1525_v37  ;;  %vm1611_vm11 = vcmp.gt.s32.totalorder %v1610_v29, 0  ;;  %v3764_v8 = vmin.u32 %v1313_v39, %v6277_v11 }
 0x478   : > { %v6333_v34 = vadd.s32 %v1424_v48, %v1420_v13  ;;  %v1530_v10 = vsel %vm1516_vm9, %v1527_v50, %v1529_v12  ;;  %v1612_v47 = vsel %vm1611_vm11, %v1610_v29, 0  ;;  %v1111_v51 = vxor.u32 2147483648, %v6247_v2 }
 0x479   : > { %v1203_v22 = vshrl.u32 %v6147_v25, %v1201_v56  ;;  %v1206_v32 = vadd.s32 127, %v1205_v15  ;;  %v7149_v27 = vand.u32 2147483647, %v6139_v53  ;;  %v1499_v0 = vshrl.u32 %v7156_v40, %v6230_v59 }
 0x47a   : > { %v6343_v35 = vmul.u32.u64.low %v6324_v19, %v1526_v38  ;;  %v6344_v33 = vmul.u32.u64.high %v6324_v19, %v1526_v38, %v6343_v35  ;;  %v1614_v43 = vand.u32 31, %v1612_v47  ;;  %vm1110_vm13 = vcmp.eq.s32.totalorder %v6216_v18, 2 }
 0x47b   : > { %v1520_v16 = vsel %vm1518_vm5, %v1508_v26, 2102212464  ;;  %v6351_v14 = vmul.u32.u64.low %v6324_v19, %v1530_v10  ;;  %v6352_v25 = vmul.u32.u64.high %v6324_v19, %v1530_v10, %v6351_v14  ;;  %v6356_v56 = vsel %vm862_vm6, nan, %v872_v63 }
 0x47c   : > { %7228 = vst [vmem:[#allocation37_spill] sm:$0xff] %v6356_v56  ;;  %v1315_v59 = vclz %v3764_v8  ;;  %v1426_v15 = vadd.s32 536870912, %v6333_v34  ;;  %v1615_v39 = vsub.s32 32, %v1614_v43  ;;  %v6359_v23 = vmul.f32 0.5, %v1001_v24 }
 0x47d   : > { %vm1106_vm14 = vcmp.lt.s32.totalorder %v6216_v18, 2  ;;  %v1108_v13 = vxor.u32 2147483648, %v6282_v54  ;;  %v6363_v46 = vor.u32 %v1203_v22, %v1202_v9  ;;  %v1607_v26 = vand.u32 8388607, %v7149_v27 }
 0x47e   : > { %v1112_v37 = vsel %vm1110_vm13, %v1111_v51, %v6282_v54  ;;  %v1207_v60 = vshll.u32 %v1206_v32, 23  ;;  %v1519_v48 = vsel %vm1515_vm7, %v1499_v0, %v1502_v1  ;;  %v1521_v50 = vsel %vm1517_vm8, %v1505_v31, %v1520_v16 }
 0x47f   : > { %v1617_v12 = vshll.u32 %v7156_v40, %v1614_v43  ;;  %v1618_v29 = vshrl.u32 %v7154_v42, %v1615_v39  ;;  %v1620_v63 = vshll.u32 %v7154_v42, %v1614_v43  ;;  %v1621_v24 = vshrl.u32 %v7151_v45, %v1615_v39 }
 0x480   : > { %v3765_v9 = vadd.s32 4294967294, %v1315_v59  ;;  %v6376_v38 = vshrl.u32 %v1426_v15, 30  ;;  %v1613_v8 = vshrl.u32 %v1612_v47, 5  ;;  %v7229_v54 = vmov 2102212464  }
 0x481   : > { %v1626_v10 = vshll.u32 %v7229_v54, %v1614_v43  ;;  %v1109_v1 = vsel %vm1107_vm10, %v6247_v2, %v1108_v13  ;;  %v1608_v51 = vor.u32 8388608, %v1607_v26  ;;  %v1623_v31 = vshll.u32 %v7151_v45, %v1614_v43 }
 0x482   : > { %v1624_v22 = vshrl.u32 %v7229_v54, %v1615_v39  ;;  %v1522_v32 = vsel %vm1516_vm9, %v1519_v48, %v1521_v50  ;;  %v1541_v0 = vadd.s32 1, %v6344_v33  ;;  %v7230_v16 = vmov 920167782  }
 0x483   : > { %v1627_v14 = vshrl.u32 %v7230_v16, %v1615_v39  ;;  %v1629_v47 = vshll.u32 %v7230_v16, %v1614_v43  ;;  %vm1103_vm1 = vweird.f32 %v5699_v49  ;;  %vm1540_vm15 = vc.u32 %v6352_v25, %v6343_v35 }
 0x484   : > { %v1619_v2 = vor.u32 %v1618_v29, %v1617_v12  ;;  %v1622_v59 = vor.u32 %v1621_v24, %v1620_v63  ;;  %v7231_v15 = vmov 1326507024   ;;  %vm3766_vm3 = vcmp.lt.s32.totalorder %v3765_v9, 0 }
 0x485   : > { %v1630_v13 = vshrl.u32 %v7231_v15, %v1615_v39  ;;  %v1428_v26 = vshll.u32 %v6376_v38, 30  ;;  %v1628_v5 = vor.u32 %v1627_v14, %v1626_v10  ;;  %vm1632_vm5 = vcmp.lt.s32.totalorder %v1613_v8, 1 }
 0x486   : > { %v1538_v48 = vmul.u32 %v6324_v19, %v1522_v32  ;;  %v1625_v50 = vor.u32 %v1624_v22, %v1623_v31  ;;  %vm1635_vm6 = vcmp.lt.s32.totalorder %v1613_v8, 4  ;;  %v1208_v43 = vor.u32 4788187, %v1207_v60 }
 0x487   : > { %v1631_v27 = vor.u32 %v1630_v13, %v1629_v47  ;;  %v1542_v52 = vsel %vm1540_vm15, %v1541_v0, %v6344_v33  ;;  %v1616_v45 = vshrl.u32 %v7156_v40, %v1615_v39  ;;  %vm1634_vm7 = vcmp.lt.s32.totalorder %v1613_v8, 3 }
 0x488   : > { %vm1633_vm8 = vcmp.lt.s32.totalorder %v1613_v8, 2  ;;  %v1637_v12 = vsel %vm1635_vm6, %v1625_v50, 2102212464  ;;  %v1640_v29 = vsel %vm1632_vm5, %v1619_v2, %v1622_v59  ;;  %v1648_v63 = vshll.u32 %v1608_v51, 8 }
 0x489   : > { %v1113_v24 = vsel %vm1106_vm14, %v1109_v1, %v1112_v37  ;;  %v6402_v19 = vsel %vm3766_vm3, 0, %v3765_v9  ;;  %v6405_v10 = vsub.s32 %v6333_v34, %v1428_v26  ;;  %v1641_v33 = vsel %vm1635_vm6, %v1628_v5, 920167782 }
 0x48a   : > { %v6408_v60 = vadd.s32 %v1542_v52, %v1538_v48  ;;  %v1642_v39 = vsel %vm1634_vm7, %v1625_v50, %v1641_v33  ;;  %v1644_v31 = vsel %vm1632_vm5, %v1622_v59, %v1625_v50  ;;  %v1645_v22 = vsel %vm1635_vm6, %v1631_v27, 1326507024  ;;  %v4446_v50 = vld [vmem:[%s476_s10] sm:$0x1] }
 0x48b   : > { %v1636_v51 = vsel %vm1632_vm5, %v1616_v45, %v1619_v2  ;;  %v1638_v18 = vsel %vm1634_vm7, %v1622_v59, %v1637_v12  ;;  %v1643_v37 = vsel %vm1633_vm8, %v1640_v29, %v1642_v39  ;;  %v1646_v9 = vsel %vm1634_vm7, %v1628_v5, %v1645_v22 }
 0x48c   : > { %v1647_v34 = vsel %vm1633_vm8, %v1644_v31, %v1646_v9  ;;  %v6418_v1 = vmul.u32.u64.low %v1648_v63, %v1643_v37  ;;  %v6419_v52 = vmul.u32.u64.high %v1648_v63, %v1643_v37, %v6418_v1  ;;  %v1715_v32 = vmul.f32 0.67940956, %v5675_v7 }
 0x48d   : > { %v1003_v0 = vsub.f32 0.25, %v6359_v23  ;;  %v1209_v27 = vand.u32 2147483647, %v1208_v43  ;;  %v1211_v45 = vcvt.s32.f32 %v6363_v46  ;;  %v1431_v14 = vsub.s32 0, %v6405_v10 }
 0x48e   : > { %v1639_v47 = vsel %vm1633_vm8, %v1636_v51, %v1638_v18  ;;  %v6427_v2 = vmul.u32.u64.low %v1648_v63, %v1647_v34  ;;  %v6428_v59 = vmul.u32.u64.high %v1648_v63, %v1647_v34, %v6427_v2  ;;  %v6431_v13 = vadd.f32 %v1715_v32, %v5680_v3 }
 0x48f   : > { %v1114_v26 = vsel %vm1103_vm1, nan, %v1113_v24  ;;  %v7233_v5 = vand.u32 2147483647, %v5731_v36  ;;  %v1323_v46 = vsub.s32 4294967266, %v6402_v19  ;;  %v1544_v8 = vadd.s32 536870912, %v6408_v60 }
 0x490   : > { %7232 = vst [vmem:[#allocation38_spill] sm:$0xff] %v6431_v13  ;;  %v6446_v48 = vsel %vm654_vm12, nan, %v6127_v4  ;;  %v6451_v49 = vmul.f32 %v4446_v50, %v5675_v7  ;;  %v1658_v12 = vadd.s32 1, %v6419_v52  ;;  %v1004_v29 = vmul.f32 %v1003_v0, %v6356_v56 }
 0x491   : > { %vm6437_vm0 = vcmp.le.f32.partialorder %v7233_v5, 0.7853982  ;;  %v1005_v24 = vmul.f32 %v6294_v62, %v6130_v61  ;;  %v1212_v33 = vmul.f32 %v1211_v45, %v1209_v27  ;;  %v1655_v41 = vmul.u32 %v1648_v63, %v1639_v47 }
 0x492   : > { %7236 = vst [vmem:[#allocation39_spill] sm:$0xff] %v6451_v49  ;;  %v1218_v43 = vsel %vm6437_vm0, 0, %v6322_v57  ;;  %v1119_v4 = vmul.f32 %v1114_v26, %v1114_v26  ;;  %v3768_v39 = vmin.u32 %v1431_v14, %v6405_v10  ;;  %vm1657_vm12 = vc.u32 %v6428_v59, %v6418_v1 }
 0x493   : > { %v1720_v31 = vand.u32 2139095040, %v6431_v13  ;;  %v1303_v57 = vadd.s32 %v6074_v58, %v6080_v21  ;;  %v1319_v22 = vsub.s32 32, %v6402_v19  ;;  %v1324_v51 = vadd.s32 127, %v1323_v46 }
 0x494   : > { %v6467_v18 = vshrl.u32 %v1544_v8, 30  ;;  %v1222_v37 = vadd.s32 3, %v1218_v43  ;;  %v1659_v9 = vsel %vm1657_vm12, %v1658_v12, %v6419_v52  ;;  %v6471_v63 = vmul.f32 0.06667134, %v6451_v49 }
 0x495   : > { %v998_v34 = vmul.f32 %v6294_v62, %v6446_v48  ;;  %v1213_v32 = vxor.u32 2147483648, %v1212_v33  ;;  %v1660_v0 = vadd.s32 %v1659_v9, %v1655_v41  ;;  %v1006_v27 = vsub.f32 %v1004_v29, %v1005_v24 }
 0x496   : > { %7237 = vst [vmem:[#allocation40_spill] sm:$0xff] %v6467_v18  ;;  %7238 = vst [vmem:[#allocation41_spill] sm:$0xff] %v6471_v63  ;;  %v1120_v45 = vmul.f32 0.5, %v1119_v4  ;;  %v1433_v14 = vclz %v3768_v39  ;;  %v1721_v58 = vshrl.u32 %v1720_v31, 23  ;;  %v1320_v21 = vshll.u32 %v6277_v11, %v6402_v19 }
 0x497   : > { %v1321_v47 = vshrl.u32 %v1303_v57, %v1319_v22  ;;  %v1325_v2 = vshll.u32 %v1324_v51, 23  ;;  %v1546_v5 = vshll.u32 %v6467_v18, 30  ;;  %v6478_v52 = vand.u32 3, %v1222_v37 }
 0x498   : > { %v3779_v46 = vadd.s32 4294967169, %v1721_v58  ;;  %v6481_v8 = vmul.f32 %v998_v34, %v6471_v63  ;;  %v6484_v62 = vmul.f32 0.14945135, %v6451_v49  ;;  %v1214_v50 = vsel %vm1131_vm4, %v1213_v32, %v1212_v33 }
 0x499   : > { %v1661_v43 = vadd.s32 536870912, %v1660_v0  ;;  %v1121_v12 = vsub.f32 0.25, %v1120_v45  ;;  %v6489_v11 = vmul.f32 0.21908636, %v6451_v49  ;;  %v3769_v19 = vadd.s32 4294967294, %v1433_v14 }
 0x49a   : > { %v1727_v29 = vadd.s32 1, %v3779_v46  ;;  %v6492_v24 = vmul.f32 %v1006_v27, %v6471_v63  ;;  %v1322_v41 = vor.u32 %v1321_v47, %v1320_v21  ;;  %v1326_v4 = vor.u32 4788187, %v1325_v2 }
 0x49b   : > { %7239 = vst [vmem:[#allocation42_spill] sm:$0xff] %v6489_v11  ;;  %v6495_v39 = vsub.s32 %v6408_v60, %v1546_v5  ;;  %v1217_v31 = vsel %vm6437_vm0, %v5731_v36, %v1214_v50  ;;  %v7153_v33 = vand.u32 2147483647, %v6431_v13  ;;  %v1832_v57 = vmul.f32 0.86506337, %v5675_v7 }
 0x49c   : > { %vm1728_vm4 = vcmp.gt.s32.totalorder %v1727_v29, 0  ;;  %v6503_v22 = vmul.f32 %v1114_v26, %v6446_v48  ;;  %v6506_v51 = vmul.f32 0.26926672, %v6451_v49  ;;  %v6508_v37 = vshrl.u32 %v1661_v43, 30 }
 0x49d   : > { %v1729_v9 = vsel %vm1728_vm4, %v1727_v29, 0  ;;  %v6511_v60 = vmul.f32 %v1121_v12, %v6356_v56  ;;  %v6514_v23 = vmul.f32 %v1114_v26, %v6130_v61  ;;  %vm3770_vm9 = vcmp.lt.s32.totalorder %v3769_v19, 0 }
 0x49e   : > { %7240 = vst [vmem:[#allocation43_spill] sm:$0xff] %v6506_v51  ;;  %7241 = vst [vmem:[#allocation44_spill] sm:$0xff] %v6508_v37  ;;  %v1731_v34 = vand.u32 31, %v1729_v9  ;;  %4409 = vcosq.f32 %v1217_v31  ;;  %v1327_v32 = vand.u32 2147483647, %v1326_v4  ;;  %v1329_v27 = vcvt.s32.f32 %v1322_v41 }
 0x49f   : > { %v1549_v45 = vsub.s32 0, %v6495_v39  ;;  %4411 = vsinq.f32 %v1217_v31  ;;  %v1724_v14 = vand.u32 8388607, %v7153_v33  ;;  %v6520_v21 = vadd.f32 %v1832_v57, %v5680_v3 }
 0x4a0   : > { %v1732_v58 = vsub.s32 32, %v1731_v34  ;;  %v1421_v26 = vadd.s32 %v6237_v55, %v6243_v20  ;;  %v6525_v2 = vsel %vm3770_vm9, 0, %v3769_v19  ;;  %v1663_v5 = vshll.u32 %v6508_v37, 30 }
 0x4a1   : > { %v1734_v46 = vshll.u32 %v7156_v40, %v1731_v34  ;;  %v1737_v43 = vshll.u32 %v7154_v42, %v1731_v34  ;;  %v7242_v12 = vmov 2131351028   ;;  %v6532_v41 = vmul.f32 %v1329_v27, %v1327_v32 }
 0x4a2   : > { %v1735_v50 = vshrl.u32 %v7154_v42, %v1732_v58  ;;  %v1738_v29 = vshrl.u32 %v7242_v12, %v1732_v58  ;;  %v3772_v4 = vmin.u32 %v1549_v45, %v6495_v39  ;;  %v1730_v31 = vshrl.u32 %v1729_v9, 5 }
 0x4a3   : > { %v1740_v57 = vshll.u32 %v7242_v12, %v1731_v34  ;;  %v1437_v55 = vsub.s32 32, %v6525_v2  ;;  %v1441_v20 = vsub.s32 4294967266, %v6525_v2  ;;  %v1725_v19 = vor.u32 8388608, %v1724_v14 }
 0x4a4   : > { %v1837_v33 = vand.u32 2139095040, %v6520_v21  ;;  %v6539_v47 = vsub.s32 %v1660_v0, %v1663_v5  ;;  %v1741_v42 = vshrl.u32 %v7229_v54, %v1732_v58  ;;  %v1743_v40 = vshll.u32 %v7229_v54, %v1731_v34 }
 0x4a5   : > { %v1744_v32 = vshrl.u32 %v7230_v16, %v1732_v58  ;;  %vm1249_vm10 = vcmp.lt.s32.totalorder %v5832_v44, 0  ;;  %v1736_v9 = vor.u32 %v1735_v50, %v1734_v46  ;;  %v1739_v27 = vor.u32 %v1738_v29, %v1737_v43 }
 0x4a6   : > { %v1746_v45 = vshll.u32 %v7230_v16, %v1731_v34  ;;  %v1747_v63 = vshrl.u32 %v7231_v15, %v1732_v58  ;;  %v1551_v30 = vclz %v3772_v4  ;;  %v1742_v14 = vor.u32 %v1741_v42, %v1740_v57 }
 0x4a7   : > { %v1745_v51 = vor.u32 %v1744_v32, %v1743_v40  ;;  %vm1749_vm11 = vcmp.lt.s32.totalorder %v1730_v31, 1  ;;  %vm1751_vm13 = vcmp.lt.s32.totalorder %v1730_v31, 3  ;;  %vm1752_vm14 = vcmp.lt.s32.totalorder %v1730_v31, 4 }
 0x4a8   : > { %v1748_v0 = vor.u32 %v1747_v63, %v1746_v45  ;;  %v1838_v5 = vshrl.u32 %v1837_v33, 23  ;;  %v4410_v56 = vpop.eup %4409  ;;  %vm1228_vm1 = vcmp.eq.s32.totalorder %v6478_v52, 2  ;;  %v1442_v11 = vadd.s32 127, %v1441_v20 }
 0x4a9   : > { %v7243_v49 = vmov 683565275   ;;  %vm1750_vm15 = vcmp.lt.s32.totalorder %v1730_v31, 2  ;;  %v1765_v46 = vshll.u32 %v1725_v19, 8  ;;  %v4412_v50 = vpop.eup %4411  ;;  %vm1225_vm3 = vcmp.eq.s32.totalorder %v6478_v52, 0 }
 0x4aa   : > { %v1733_v13 = vshrl.u32 %v7243_v49, %v1732_v58  ;;  %v1666_v34 = vsub.s32 0, %v6539_v47  ;;  %v1754_v40 = vsel %vm1752_vm14, %v1742_v14, 2102212464  ;;  %v1757_v42 = vsel %vm1749_vm11, %v1736_v9, %v1739_v27 }
 0x4ab   : > { %v1758_v63 = vsel %vm1752_vm14, %v1745_v51, 920167782  ;;  %v7244_v33 = vand.u32 2147483647, %v5832_v44  ;;  %v1438_v58 = vshll.u32 %v6405_v10, %v6525_v2  ;;  %v1439_v29 = vshrl.u32 %v1421_v26, %v1437_v55 }
 0x4ac   : > { %v1759_v4 = vsel %vm1751_vm13, %v1742_v14, %v1758_v63  ;;  %v1761_v57 = vsel %vm1749_vm11, %v1739_v27, %v1742_v14  ;;  %v3773_v20 = vadd.s32 4294967294, %v1551_v30  ;;  %v1762_v32 = vsel %vm1752_vm14, %v1748_v0, 1326507024 }
 0x4ad   : > { %vm6556_vm5 = vcmp.le.f32.partialorder %v7244_v33, 0.7853982  ;;  %v1760_v19 = vsel %vm1750_vm15, %v1757_v42, %v1759_v4  ;;  %v3783_v45 = vadd.s32 4294967169, %v1838_v5  ;;  %v1443_v37 = vshll.u32 %v1442_v11, 23 }
 0x4ae   : > { %v1753_v33 = vsel %vm1749_vm11, %v1733_v13, %v1736_v9  ;;  %v1755_v53 = vsel %vm1751_vm13, %v1739_v27, %v1754_v40  ;;  %v1763_v18 = vsel %vm1751_vm13, %v1745_v51, %v1762_v32  ;;  %v3776_v10 = vmin.u32 %v1666_v34, %v6539_v47 }
 0x4af   : > { %v1764_v26 = vsel %vm1750_vm15, %v1761_v57, %v1763_v18  ;;  %v6571_v2 = vmul.u32.u64.low %v1765_v46, %v1760_v19  ;;  %v6572_v55 = vmul.u32.u64.high %v1765_v46, %v1760_v19, %v6571_v2  ;;  %v1124_v30 = vsub.f32 %v6511_v60, %v6514_v23 }
 0x4b0   : > { %v1229_v14 = vxor.u32 2147483648, %v4410_v56  ;;  %v7247_v11 = vsub.s32 4, %v6204_v6  ;;  %v1844_v51 = vadd.s32 1, %v3783_v45  ;;  %vm3774_vm6 = vcmp.lt.s32.totalorder %v3773_v20, 0 }
 0x4b1   : > { %v1756_v9 = vsel %vm1750_vm15, %v1753_v33, %v1755_v53  ;;  %v6585_v18 = vmul.u32.u64.low %v1765_v46, %v1764_v26  ;;  %v6586_v27 = vmul.u32.u64.high %v1765_v46, %v1764_v26, %v6585_v18  ;;  %v1226_v0 = vxor.u32 2147483648, %v4412_v50 }
 0x4b2   : > { %v6582_v13 = vsel %vm1249_vm10, %v7247_v11, %v6204_v6  ;;  %v1331_v5 = vxor.u32 2147483648, %v6532_v41  ;;  %v6589_v34 = vor.u32 %v1439_v29, %v1438_v58  ;;  %vm1845_vm7 = vcmp.gt.s32.totalorder %v1844_v51, 0 }
 0x4b3   : > { %v6591_v60 = vor.u32 4788187, %v1443_v37  ;;  %v1668_v23 = vclz %v3776_v10  ;;  %v1775_v40 = vadd.s32 1, %v6572_v55  ;;  %v1846_v6 = vsel %vm1845_vm7, %v1844_v51, 0 }
 0x4b4   : > { %v6594_v42 = vsel %vm3774_vm6, 0, %v3773_v20  ;;  %v1772_v63 = vmul.u32 %v1765_v46, %v1756_v9  ;;  %v7175_v53 = vand.u32 2147483647, %v6520_v21  ;;  %v1848_v31 = vand.u32 31, %v1846_v6 }
 0x4b5   : > { %v6599_v4 = vmul.f32 %v6503_v22, %v6484_v62  ;;  %v6602_v58 = vmul.f32 %v1124_v30, %v6484_v62  ;;  %v6606_v37 = vsel %vm1228_vm1, %v1229_v14, %v4412_v50  ;;  %v6613_v46 = vsel %vm1225_vm3, %v4410_v56, %v1226_v0 }
 0x4b6   : > { %v6618_v22 = vsel %vm1249_vm10, %v1331_v5, %v6532_v41  ;;  %vm1774_vm8 = vc.u32 %v6586_v27, %v6571_v2  ;;  %v1849_v57 = vsub.s32 32, %v1848_v31  ;;  %v1559_v20 = vsub.s32 4294967266, %v6594_v42 }
 0x4b7   : > { %v3777_v19 = vadd.s32 4294967294, %v1668_v23  ;;  %v1776_v32 = vsel %vm1774_vm8, %v1775_v40, %v6572_v55  ;;  %v1445_v45 = vand.u32 2147483647, %v6591_v60  ;;  %v1539_v56 = vadd.s32 %v6343_v35, %v6352_v25 }
 0x4b8   : > { %v1777_v33 = vadd.s32 %v1776_v32, %v1772_v63  ;;  %v1841_v41 = vand.u32 8388607, %v7175_v53  ;;  %v1851_v10 = vshll.u32 %v7243_v49, %v1848_v31  ;;  %v7248_v26 = vmov 2475754826  }
 0x4b9   : > { %v1852_v30 = vshrl.u32 %v7248_v26, %v1849_v57  ;;  %v1854_v14 = vshll.u32 %v7248_v26, %v1848_v31  ;;  %v1855_v11 = vshrl.u32 %v7242_v12, %v1849_v57  ;;  %v1555_v51 = vsub.s32 32, %v6594_v42 }
 0x4ba   : > { %v1778_v55 = vadd.s32 536870912, %v1777_v33  ;;  %v6635_v9 = vshrl.u32 %v1846_v6, 5  ;;  %v1949_v18 = vmul.f32 0.9739065, %v5675_v7  ;;  %v1560_v35 = vadd.s32 127, %v1559_v20 }
 0x4bb   : > { %vm3778_vm0 = vcmp.lt.s32.totalorder %v3777_v19, 0  ;;  %v1857_v25 = vshll.u32 %v7242_v12, %v1848_v31  ;;  %v1858_v0 = vshrl.u32 %v7229_v54, %v1849_v57  ;;  %v1860_v60 = vshll.u32 %v7229_v54, %v1848_v31 }
 0x4bc   : > { %v6640_v5 = vshrl.u32 %v1778_v55, 30  ;;  %v1861_v23 = vshrl.u32 %v7230_v16, %v1849_v57  ;;  %v1863_v40 = vshll.u32 %v7230_v16, %v1848_v31  ;;  %v1842_v63 = vor.u32 8388608, %v1841_v41 }
 0x4bd   : > { %v1853_v32 = vor.u32 %v1852_v30, %v1851_v10  ;;  %v1856_v6 = vor.u32 %v1855_v11, %v1854_v14  ;;  %v1864_v53 = vshrl.u32 %v7231_v15, %v1849_v57  ;;  %vm1224_vm12 = vcmp.lt.s32.totalorder %v6478_v52, 2 }
 0x4be   : > { %v1556_v7 = vshll.u32 %v6495_v39, %v6594_v42  ;;  %v1780_v20 = vshll.u32 %v6640_v5, 30  ;;  %v1862_v55 = vor.u32 %v1861_v23, %v1860_v60  ;;  %vm1866_vm4 = vcmp.lt.s32.totalorder %v6635_v9, 1 }
 0x4bf   : > { %v6652_v29 = vsel %vm3778_vm0, 0, %v3777_v19  ;;  %v1859_v50 = vor.u32 %v1858_v0, %v1857_v25  ;;  %v1865_v31 = vor.u32 %v1864_v53, %v1863_v40  ;;  %vm1869_vm9 = vcmp.lt.s32.totalorder %v6635_v9, 4 }
 0x4c0   : > { %v1557_v41 = vshrl.u32 %v1539_v56, %v1555_v51  ;;  %v6655_v10 = vsub.s32 %v1777_v33, %v1780_v20  ;;  %v1850_v30 = vshrl.u32 %v7243_v49, %v1849_v57  ;;  %vm1868_vm10 = vcmp.lt.s32.totalorder %v6635_v9, 3 }
 0x4c1   : > { %v1561_v39 = vshll.u32 %v1560_v35, 23  ;;  %vm1867_vm11 = vcmp.lt.s32.totalorder %v6635_v9, 2  ;;  %v1874_v42 = vsel %vm1866_vm4, %v1853_v32, %v1856_v6  ;;  %v1882_v14 = vshll.u32 %v1842_v63, 8 }
 0x4c2   : > { %vm1221_vm13 = vweird.f32 %v5731_v36  ;;  %v1676_v53 = vsub.s32 4294967266, %v6652_v29  ;;  %v1783_v19 = vsub.s32 0, %v6655_v10  ;;  %v1871_v56 = vsel %vm1869_vm9, %v1859_v50, 2102212464 }
 0x4c3   : > { %v1875_v57 = vsel %vm1869_vm9, %v1862_v55, 920167782  ;;  %v1878_v11 = vsel %vm1866_vm4, %v1856_v6, %v1859_v50  ;;  %v1879_v51 = vsel %vm1869_vm9, %v1865_v31, 1326507024  ;;  %v6676_v35 = vadd.f32 %v1949_v18, %v5680_v3 }
 0x4c4   : > { %v1876_v33 = vsel %vm1868_vm10, %v1859_v50, %v1875_v57  ;;  %v3780_v0 = vmin.u32 %v1783_v19, %v6655_v10  ;;  %v1870_v60 = vsel %vm1866_vm4, %v1850_v30, %v1853_v32  ;;  %v1880_v40 = vsel %vm1868_vm10, %v1862_v55, %v1879_v51 }
 0x4c5   : > { %v1877_v23 = vsel %vm1867_vm11, %v1874_v42, %v1876_v33  ;;  %v1872_v50 = vsel %vm1868_vm10, %v1856_v6, %v1871_v56  ;;  %v1881_v63 = vsel %vm1867_vm11, %v1878_v11, %v1880_v40  ;;  %v7249_v31 = vcvt.s32.f32 %v6589_v34 }
 0x4c6   : > { %v6689_v3 = vmul.u32.u64.low %v1882_v14, %v1877_v23  ;;  %v6690_v18 = vmul.u32.u64.high %v1882_v14, %v1877_v23, %v6689_v3  ;;  %v1558_v30 = vor.u32 %v1557_v41, %v1556_v7  ;;  %v1656_v42 = vadd.s32 %v6418_v1, %v6428_v59 }
 0x4c7   : > { %v1448_v32 = vmul.f32 %v7249_v31, %v1445_v45  ;;  %v1785_v19 = vclz %v3780_v0  ;;  %v1562_v55 = vor.u32 4788187, %v1561_v39  ;;  %v1672_v57 = vsub.s32 32, %v6652_v29 }
 0x4c8   : > { %v6698_v6 = vmul.u32.u64.low %v1882_v14, %v1881_v63  ;;  %v6699_v56 = vmul.u32.u64.high %v1882_v14, %v1881_v63, %v6698_v6  ;;  %v7250_v33 = vsel %vm6556_vm5, 0, %v6582_v13  ;;  %v7251_v51 = vand.u32 2147483647, %v5926_v17 }
 0x4c9   : > { %v1340_v11 = vadd.s32 3, %v7250_v33  ;;  %v1677_v45 = vadd.s32 127, %v1676_v53  ;;  %v3781_v1 = vadd.s32 4294967294, %v1785_v19  ;;  %v1873_v59 = vsel %vm1867_vm11, %v1870_v60, %v1872_v50 }
 0x4ca   : > { %vm6707_vm14 = vcmp.le.f32.partialorder %v7251_v51, 0.7853982  ;;  %v1231_v7 = vsel %vm1224_vm12, %v6613_v46, %v6606_v37  ;;  %v1335_v13 = vsel %vm6556_vm5, %v5832_v44, %v6618_v22  ;;  %vm1367_vm1 = vcmp.lt.s32.totalorder %v5926_v17, 0 }
 0x4cb   : > { %v1954_v41 = vand.u32 2139095040, %v6676_v35  ;;  %v1449_v39 = vxor.u32 2147483648, %v1448_v32  ;;  %v1565_v53 = vcvt.s32.f32 %v1558_v30  ;;  %vm3782_vm15 = vcmp.lt.s32.totalorder %v3781_v1, 0 }
 0x4cc   : > { %v1892_v9 = vadd.s32 1, %v6690_v18  ;;  %v1563_v0 = vand.u32 2147483647, %v1562_v55  ;;  %v1673_v60 = vshll.u32 %v6539_v47, %v6652_v29  ;;  %v1674_v52 = vshrl.u32 %v1656_v42, %v1672_v57 }
 0x4cd   : > { %v1889_v37 = vmul.u32 %v1882_v14, %v1873_v59  ;;  %v6728_v46 = vadd.f32 %v6599_v4, %v6481_v8  ;;  %v6732_v43 = vadd.f32 %v6602_v58, %v6492_v24  ;;  %v6734_v22 = vand.u32 3, %v1340_v11 }
 0x4ce   : > { %v1678_v23 = vshll.u32 %v1677_v45, 23  ;;  %v1232_v40 = vsel %vm1221_vm13, nan, %v1231_v7  ;;  %v1788_v50 = vsel %vm3782_vm15, 0, %v3781_v1  ;;  %vm1891_vm3 = vc.u32 %v6699_v56, %v6689_v3 }
 0x4cf   : > { %v1955_v47 = vshrl.u32 %v1954_v41, 23  ;;  %4413 = vcosq.f32 %v1335_v13  ;;  %v1450_v8 = vsel %vm1367_vm1, %v1449_v39, %v1448_v32  ;;  %v1451_v4 = vsub.s32 4, %v6376_v38 }
 0x4d0   : > { %v1893_v24 = vsel %vm1891_vm3, %v1892_v9, %v6690_v18  ;;  %v1566_v58 = vmul.f32 %v1565_v53, %v1563_v0  ;;  %v1675_v29 = vor.u32 %v1674_v52, %v1673_v60  ;;  %v1679_v31 = vor.u32 4788187, %v1678_v23  ;;  %v7257_v60 = vld [vmem:[#allocation40_spill] sm:$0xff] }
 0x4d1   : > { %v1894_v14 = vadd.s32 %v1893_v24, %v1889_v37  ;;  %v3787_v63 = vadd.s32 4294967169, %v1955_v47  ;;  %v1773_v36 = vadd.s32 %v6571_v2, %v6586_v27  ;;  %v1793_v30 = vsub.s32 4294967266, %v1788_v50 }
 0x4d2   : > { %v1789_v19 = vsub.s32 32, %v1788_v50  ;;  %v1951_v57 = vand.u32 2147483647, %v6676_v35  ;;  %v6750_v6 = vmul.f32 %v1232_v40, %v6446_v48  ;;  %v6752_v18 = vmul.f32 %v1232_v40, %v1232_v40 }
 0x4d3   : > { %v1895_v55 = vadd.s32 536870912, %v1894_v14  ;;  %v1961_v32 = vadd.s32 1, %v3787_v63  ;;  %4415 = vsinq.f32 %v1335_v13  ;;  %v6757_v33 = vsel %vm1367_vm1, %v1451_v4, %v6376_v38 }
 0x4d4   : > { %v1453_v2 = vsel %vm6707_vm14, %v5926_v17, %v1450_v8  ;;  %v1567_v27 = vxor.u32 2147483648, %v1566_v58  ;;  %v1682_v11 = vcvt.s32.f32 %v1675_v29  ;;  %v1794_v51 = vadd.s32 127, %v1793_v30 }
 0x4d5   : > { %vm1962_vm5 = vcmp.gt.s32.totalorder %v1961_v32, 0  ;;  %v1790_v1 = vshll.u32 %v6655_v10, %v1788_v50  ;;  %v1791_v59 = vshrl.u32 %v1773_v36, %v1789_v19  ;;  %v1958_v38 = vand.u32 8388607, %v1951_v57 }
 0x4d6   : > { %v1963_v45 = vsel %vm1962_vm5, %v1961_v32, 0  ;;  %v6769_v13 = vmul.f32 %v1232_v40, %v6130_v61  ;;  %4417 = vcosq.f32 %v1453_v2  ;;  %vm1485_vm6 = vcmp.lt.s32.totalorder %v6091_v28, 0 }
 0x4d7   : > { %v3902_v25 = vpop.f32.mrb[62].mxu0  ;;  %v1965_v41 = vand.u32 31, %v1963_v45  ;;  %v1454_v39 = vsel %vm6707_vm14, 0, %v6757_v33  ;;  %4419 = vsinq.f32 %v1453_v2  ;;  %v7254_v10 = vand.u32 2147483647, %v6091_v28 }
 0x4d8   : > { %v3903_v20 = vpop.f32.mrb[63].mxu0  ;;  %v1569_v52 = vsub.s32 4, %v7257_v60  ;;  %v1795_v23 = vshll.u32 %v1794_v51, 23  ;;  %v1568_v50 = vsel %vm1485_vm6, %v1567_v27, %v1566_v58  ;;  %v1792_v47 = vor.u32 %v1791_v59, %v1790_v1  ;;  %v7258_v27 = vld [vmem:[#allocation36_spill] sm:$0xff] }
 0x4d9   : > { %v6746_v42 = vadd.f32 %v3903_v20, %v3902_v25  ;;  %v6762_v25 = vshrl.u32 %v1895_v55, 30  ;;  %v1680_v20 = vand.u32 2147483647, %v1679_v31  ;;  %vm6777_vm7 = vcmp.le.f32.partialorder %v7254_v10, 0.7853982  ;;  %v6783_v0 = vpop.eup %4413 }
 0x4da   : > { %v1966_v40 = vsub.s32 32, %v1965_v41  ;;  %v1959_v4 = vor.u32 8388608, %v1958_v38  ;;  %v1968_v24 = vshll.u32 %v7243_v49, %v1965_v41  ;;  %v1964_v36 = vshrl.u32 %v1963_v45, 5 }
 0x4db   : > { %v1897_v7 = vshll.u32 %v6762_v25, 30  ;;  %v6786_v37 = vmul.f32 %v1682_v11, %v1680_v20  ;;  %v1974_v30 = vshll.u32 %v7242_v12, %v1965_v41  ;;  %v1571_v55 = vsel %vm6777_vm7, %v6091_v28, %v1568_v50 }
 0x4dc   : > { %v1969_v29 = vshrl.u32 %v7248_v26, %v1966_v40  ;;  %v1972_v63 = vshrl.u32 %v7242_v12, %v1966_v40  ;;  %v1975_v19 = vshrl.u32 %v7229_v54, %v1966_v40  ;;  %v1796_v2 = vor.u32 4788187, %v1795_v23 }
 0x4dd   : > { %v6781_v9 = vsub.s32 %v1894_v14, %v1897_v7  ;;  %v1971_v14 = vshll.u32 %v7248_v26, %v1965_v41  ;;  %v6798_v58 = vpop.eup %4415  ;;  %v1684_v32 = vxor.u32 2147483648, %v6786_v37  ;;  %v1977_v26 = vshll.u32 %v7229_v54, %v1965_v41 }
 0x4de   : > { %vm1602_vm8 = vcmp.lt.s32.totalorder %v7258_v27, 0  ;;  %v1799_v20 = vcvt.s32.f32 %v1792_v47  ;;  %v1890_v11 = vadd.s32 %v6689_v3, %v6699_v56  ;;  %v6808_v51 = vshll.u32 %v1959_v4, 8 }
 0x4df   : > { %v1900_v8 = vsub.s32 0, %v6781_v9  ;;  %v1970_v45 = vor.u32 %v1969_v29, %v1968_v24  ;;  %v1973_v1 = vor.u32 %v1972_v63, %v1971_v14  ;;  %v1978_v59 = vshrl.u32 %v7230_v16, %v1966_v40 }
 0x4e0   : > { %v1980_v7 = vshll.u32 %v7230_v16, %v1965_v41  ;;  %v1976_v10 = vor.u32 %v1975_v19, %v1974_v30  ;;  %v1981_v23 = vshrl.u32 %v7231_v15, %v1966_v40  ;;  %vm1983_vm0 = vcmp.lt.s32.totalorder %v1964_v36, 1  ;;  %v6813_v54 = vpop.eup %4417 }
 0x4e1   : > { %v3784_v31 = vmin.u32 %v1900_v8, %v6781_v9  ;;  %v1797_v50 = vand.u32 2147483647, %v1796_v2  ;;  %v1967_v47 = vshrl.u32 %v7243_v49, %v1966_v40  ;;  %v1979_v3 = vor.u32 %v1978_v59, %v1977_v26  ;;  %v6816_v56 = vpop.eup %4419 }
 0x4e2   : > { %vm1986_vm12 = vcmp.lt.s32.totalorder %v1964_v36, 4  ;;  %v1982_v8 = vor.u32 %v1981_v23, %v1980_v7  ;;  %vm1985_vm9 = vcmp.lt.s32.totalorder %v1964_v36, 3  ;;  %vm1984_vm10 = vcmp.lt.s32.totalorder %v1964_v36, 2 }
 0x4e3   : > { %v1902_v12 = vclz %v3784_v31  ;;  %v1988_v4 = vsel %vm1986_vm12, %v1976_v10, 2102212464  ;;  %v1991_v41 = vsel %vm1983_vm0, %v1970_v45, %v1973_v1  ;;  %v1992_v15 = vsel %vm1986_vm12, %v1979_v3, 920167782 }
 0x4e4   : > { %v1995_v49 = vsel %vm1983_vm0, %v1973_v1, %v1976_v10  ;;  %v1987_v40 = vsel %vm1983_vm0, %v1967_v47, %v1970_v45  ;;  %v1989_v63 = vsel %vm1985_vm9, %v1973_v1, %v1988_v4  ;;  %v1993_v31 = vsel %vm1985_vm9, %v1976_v10, %v1992_v15 }
 0x4e5   : > { %v3785_v38 = vadd.s32 4294967294, %v1902_v12  ;;  %v1996_v30 = vsel %vm1986_vm12, %v1982_v8, 1326507024  ;;  %vm1343_vm11 = vcmp.eq.s32.totalorder %v6734_v22, 0  ;;  %vm1346_vm13 = vcmp.eq.s32.totalorder %v6734_v22, 2  ;;  %v7262_v8 = vld [vmem:[#allocation44_spill] sm:$0xff] }
 0x4e6   : > { %v1994_v26 = vsel %vm1984_vm10, %v1991_v41, %v1993_v31  ;;  %v1800_v12 = vmul.f32 %v1799_v20, %v1797_v50  ;;  %v1458_v7 = vadd.s32 3, %v1454_v39  ;;  %v1685_v23 = vsel %vm1602_vm8, %v1684_v32, %v6786_v37 }
 0x4e7   : > { %vm3786_vm4 = vcmp.lt.s32.totalorder %v3785_v38, 0  ;;  %v6833_v45 = vmul.u32.u64.low %v6808_v51, %v1994_v26  ;;  %v6834_v1 = vmul.u32.u64.high %v6808_v51, %v1994_v26, %v6833_v45  ;;  %v1990_v50 = vsel %vm1984_vm10, %v1987_v40, %v1989_v63 }
 0x4e8   : > { %v1905_v16 = vsel %vm3786_vm4, 0, %v3785_v38  ;;  %vm1342_vm14 = vcmp.lt.s32.totalorder %v6734_v22, 2  ;;  %v1570_v33 = vsel %vm1485_vm6, %v1569_v52, %v7257_v60  ;;  %4421 = vcosq.f32 %v1571_v55 }
 0x4e9   : > { %v1906_v24 = vsub.s32 32, %v1905_v16  ;;  %v1907_v29 = vshll.u32 %v6781_v9, %v1905_v16  ;;  %v1910_v14 = vsub.s32 4294967266, %v1905_v16  ;;  %v1997_v9 = vsel %vm1985_vm9, %v1979_v3, %v1996_v30  ;;  %v7263_v16 = vld [vmem:[#allocation38_spill] sm:$0xff] }
 0x4ea   : > { %v1998_v59 = vsel %vm1984_vm10, %v1995_v49, %v1997_v9  ;;  %4423 = vsinq.f32 %v1571_v55  ;;  %v1686_v37 = vsub.s32 4, %v7262_v8  ;;  %v1801_v36 = vxor.u32 2147483648, %v1800_v12  ;;  %v7264_v55 = vld [vmem:[#allocation39_spill] sm:$0xff] }
 0x4eb   : > { %v1908_v19 = vshrl.u32 %v1890_v11, %v1906_v24  ;;  %v1911_v2 = vadd.s32 127, %v1910_v14  ;;  %v7259_v11 = vand.u32 2147483647, %v7258_v27  ;;  %v2009_v32 = vadd.s32 1, %v6834_v1 }
 0x4ec   : > { %v6852_v47 = vmul.u32.u64.low %v6808_v51, %v1998_v59  ;;  %v6853_v34 = vmul.u32.u64.high %v6808_v51, %v1998_v59, %v6852_v47  ;;  %vm1719_vm15 = vcmp.lt.s32.totalorder %v7263_v16, 0  ;;  %v2006_v15 = vmul.u32 %v6808_v51, %v1990_v50 }
 0x4ed   : > { %vm6843_vm1 = vcmp.le.f32.partialorder %v7259_v11, 0.7853982  ;;  %v1909_v10 = vor.u32 %v1908_v19, %v1907_v29  ;;  %v1912_v20 = vshll.u32 %v1911_v2, 23  ;;  %vm1339_vm3 = vweird.f32 %v5832_v44 }
 0x4ee   : > { %v1688_v4 = vsel %vm6843_vm1, %v7258_v27, %v1685_v23  ;;  %v1344_v60 = vxor.u32 2147483648, %v6798_v58  ;;  %v1347_v52 = vxor.u32 2147483648, %v6783_v0  ;;  %v6872_v24 = vmul.f32 0.29552424, %v7264_v55 }
 0x4ef   : > { %v1913_v39 = vor.u32 4788187, %v1912_v20  ;;  %v1916_v3 = vcvt.s32.f32 %v1909_v10  ;;  %vm2008_vm5 = vc.u32 %v6853_v34, %v6833_v45  ;;  %v1459_v29 = vand.u32 3, %v1458_v7 }
 0x4f0   : > { %v1572_v14 = vsel %vm6777_vm7, 0, %v1570_v33  ;;  %v7265_v49 = vand.u32 2147483647, %v7263_v16  ;;  %v1687_v63 = vsel %vm1602_vm8, %v1686_v37, %v7262_v8  ;;  %4425 = vcosq.f32 %v1688_v4 }
 0x4f1   : > { %v1914_v41 = vand.u32 2147483647, %v1913_v39  ;;  %v1802_v31 = vsel %vm1719_vm15, %v1801_v36, %v1800_v12  ;;  %v2010_v30 = vsel %vm2008_vm5, %v2009_v32, %v6834_v1  ;;  %4427 = vsinq.f32 %v1688_v4 }
 0x4f2   : > { %vm6880_vm6 = vcmp.le.f32.partialorder %v7265_v49, 0.7853982  ;;  %v1803_v53 = vsub.s32 4, %v6640_v5  ;;  %v2011_v2 = vadd.s32 %v2010_v30, %v2006_v15  ;;  %v1345_v26 = vsel %vm1343_vm11, %v6783_v0, %v1344_v60  ;;  %v4422_v10 = vpop.eup %4421 }
 0x4f3   : > { %v1917_v40 = vmul.f32 %v1916_v3, %v1914_v41  ;;  %v1348_v9 = vsel %vm1346_vm13, %v1347_v52, %v6798_v58  ;;  %v1576_v59 = vadd.s32 3, %v1572_v14  ;;  %vm1836_vm7 = vcmp.lt.s32.totalorder %v6520_v21, 0  ;;  %v7271_v52 = vld [vmem:[#allocation42_spill] sm:$0xff] }
 0x4f4   : > { %vm1457_vm8 = vweird.f32 %v5926_v17  ;;  %v1465_v12 = vxor.u32 2147483648, %v6813_v54  ;;  %v1689_v1 = vsel %vm6843_vm1, 0, %v1687_v63  ;;  %v1805_v7 = vsel %vm6880_vm6, %v7263_v16, %v1802_v31 }
 0x4f5   : > { %v1918_v19 = vxor.u32 2147483648, %v1917_v40  ;;  %v2012_v11 = vadd.s32 536870912, %v2011_v2  ;;  %v1238_v0 = vmul.f32 0.5, %v6752_v18  ;;  %vm1461_vm0 = vcmp.eq.s32.totalorder %v1459_v29, 0  ;;  %v4424_v18 = vpop.eup %4423 }
 0x4f6   : > { %v1462_v58 = vxor.u32 2147483648, %v6816_v56  ;;  %vm1464_vm12 = vcmp.eq.s32.totalorder %v1459_v29, 2  ;;  %v1804_v20 = vsel %vm1719_vm15, %v1803_v53, %v6640_v5  ;;  %v7268_v23 = vand.u32 2147483647, %v6520_v21 }
 0x4f7   : > { %v1919_v50 = vsel %vm1836_vm7, %v1918_v19, %v1917_v40  ;;  %v6918_v47 = vshrl.u32 %v2012_v11, 30  ;;  %v1349_v33 = vsel %vm1342_vm14, %v1345_v26, %v1348_v9  ;;  %v1577_v39 = vand.u32 3, %v1576_v59 }
 0x4f8   : > { %vm6912_vm4 = vcmp.le.f32.partialorder %v7268_v23, 0.7853982  ;;  %v1693_v3 = vadd.s32 3, %v1689_v1  ;;  %4429 = vcosq.f32 %v1805_v7  ;;  %vm1460_vm9 = vcmp.lt.s32.totalorder %v1459_v29, 2  ;;  %v7272_v1 = vld [vmem:[#allocation37_spill] sm:$0xff] }
 0x4f9   : > { %v1466_v5 = vsel %vm1464_vm12, %v1465_v12, %v6816_v56  ;;  %4431 = vsinq.f32 %v1805_v7  ;;  %v2014_v8 = vshll.u32 %v6918_v47, 30  ;;  %v1463_v37 = vsel %vm1461_vm0, %v6813_v54, %v1462_v58 }
 0x4fa   : > { %v1806_v36 = vsel %vm6880_vm6, 0, %v1804_v20  ;;  %v1920_v32 = vsub.s32 4, %v6762_v25  ;;  %v1922_v22 = vsel %vm6912_vm4, %v6520_v21, %v1919_v50  ;;  %v6934_v4 = vsel %vm1339_vm3, nan, %v1349_v33  ;;  %v4426_v60 = vpop.eup %4425 }
 0x4fb   : > { %v1580_v56 = vxor.u32 2147483648, %v4424_v18  ;;  %v1583_v41 = vxor.u32 2147483648, %v4422_v10  ;;  %v6936_v15 = vsub.s32 %v2011_v2, %v2014_v8  ;;  %v1235_v54 = vmul.f32 %v6750_v6, %v7271_v52  ;;  %v4428_v14 = vpop.eup %4427 }
 0x4fc   : > { %vm1579_vm10 = vcmp.eq.s32.totalorder %v1577_v39, 0  ;;  %vm1582_vm11 = vcmp.eq.s32.totalorder %v1577_v39, 2  ;;  %v1694_v55 = vand.u32 3, %v1693_v3  ;;  %v1467_v49 = vsel %vm1460_vm9, %v1463_v37, %v1466_v5 }
 0x4fd   : > { %v1810_v51 = vadd.s32 3, %v1806_v36  ;;  %4433 = vcosq.f32 %v1922_v22  ;;  %v2017_v44 = vsub.s32 0, %v6936_v15  ;;  %v1239_v40 = vsub.f32 0.25, %v1238_v0 }
 0x4fe   : > { %v1355_v63 = vmul.f32 %v6934_v4, %v6934_v4  ;;  %v1921_v31 = vsel %vm1836_vm7, %v1920_v32, %v6762_v25  ;;  %4435 = vsinq.f32 %v1922_v22  ;;  %vm1578_vm13 = vcmp.lt.s32.totalorder %v1577_v39, 2 }
 0x4ff   : > { %v1581_v6 = vsel %vm1579_vm10, %v4422_v10, %v1580_v56  ;;  %v1584_v30 = vsel %vm1582_vm11, %v1583_v41, %v4424_v18  ;;  %v3788_v53 = vmin.u32 %v2017_v44, %v6936_v15  ;;  %v6950_v29 = vsel %vm1457_vm8, nan, %v1467_v49 }
 0x500   : > { %vm1696_vm1 = vcmp.eq.s32.totalorder %v1694_v55, 0  ;;  %v1697_v19 = vxor.u32 2147483648, %v4428_v14  ;;  %v1700_v2 = vxor.u32 2147483648, %v4426_v60  ;;  %vm1699_vm14 = vcmp.eq.s32.totalorder %v1694_v55, 2 }
 0x501   : > { %v1811_v26 = vand.u32 3, %v1810_v51  ;;  %v1923_v9 = vsel %vm6912_vm4, 0, %v1921_v31  ;;  %v2019_v59 = vclz %v3788_v53  ;;  %v6955_v12 = vadd.f32 %v1235_v54, %v6728_v46 }
 0x502   : > { %v4430_v25 = vpop.eup %4429  ;;  %v1240_v7 = vmul.f32 %v1239_v40, %v7272_v1  ;;  %vm1575_vm15 = vweird.f32 %v6091_v28  ;;  %v1585_v17 = vsel %vm1578_vm13, %v1581_v6, %v1584_v30  ;;  %v1356_v0 = vmul.f32 0.5, %v1355_v63 }
 0x503   : > { %v4432_v11 = vpop.eup %4431  ;;  %v1473_v58 = vmul.f32 %v6950_v29, %v6950_v29  ;;  %vm1692_vm3 = vweird.f32 %v7258_v27  ;;  %v3789_v10 = vadd.s32 4294967294, %v2019_v59  ;;  %vm1695_vm5 = vcmp.lt.s32.totalorder %v1694_v55, 2 }
 0x504   : > { %v1698_v20 = vsel %vm1696_vm1, %v4426_v60, %v1697_v19  ;;  %v1701_v46 = vsel %vm1699_vm14, %v1700_v2, %v4428_v14  ;;  %v1927_v23 = vadd.s32 3, %v1923_v9  ;;  %v6965_v38 = vsel %vm1575_vm15, nan, %v1585_v17 }
 0x505   : > { %vm1813_vm6 = vcmp.eq.s32.totalorder %v1811_v26, 0  ;;  %v2007_v28 = vadd.s32 %v6833_v45, %v6853_v34  ;;  %vm3790_vm7 = vcmp.lt.s32.totalorder %v3789_v10, 0  ;;  %v1814_v50 = vxor.u32 2147483648, %v4432_v11 }
 0x506   : > { %vm1816_vm8 = vcmp.eq.s32.totalorder %v1811_v26, 2  ;;  %v1817_v18 = vxor.u32 2147483648, %v4430_v25  ;;  %v2022_v33 = vsel %vm3790_vm7, 0, %v3789_v10  ;;  %v1702_v3 = vsel %vm1695_vm5, %v1698_v20, %v1701_v46 }
 0x507   : > { %v4434_v39 = vpop.eup %4433  ;;  %v2023_v5 = vsub.s32 32, %v2022_v33  ;;  %v2024_v8 = vshll.u32 %v6936_v15, %v2022_v33  ;;  %v2027_v37 = vsub.s32 4294967266, %v2022_v33  ;;  %v1242_v32 = vsub.f32 %v1240_v7, %v6769_v13 }
 0x508   : > { %v4436_v36 = vpop.eup %4435  ;;  %v1357_v22 = vsub.f32 0.25, %v1356_v0  ;;  %v1474_v56 = vmul.f32 0.5, %v1473_v58  ;;  %v1928_v41 = vand.u32 3, %v1927_v23  ;;  %v1359_v45 = vmul.f32 %v6934_v4, %v6130_v61  ;;  %v7273_v0 = vld [vmem:[#allocation43_spill] sm:$0xff] }
 0x509   : > { %v1590_v34 = vmul.f32 %v6965_v38, %v6965_v38  ;;  %v2025_v60 = vshrl.u32 %v2007_v28, %v2023_v5  ;;  %v2028_v54 = vadd.s32 127, %v2027_v37  ;;  %v6977_v55 = vsel %vm1692_vm3, nan, %v1702_v3 }
 0x50a   : > { %vm1812_vm0 = vcmp.lt.s32.totalorder %v1811_v26, 2  ;;  %v1815_v15 = vsel %vm1813_vm6, %v4430_v25, %v1814_v50  ;;  %v1818_v13 = vsel %vm1816_vm8, %v1817_v18, %v4432_v11  ;;  %v1931_v14 = vxor.u32 2147483648, %v4436_v36 }
 0x50b   : > { %v1934_v49 = vxor.u32 2147483648, %v4434_v39  ;;  %v2026_v51 = vor.u32 %v2025_v60, %v2024_v8  ;;  %v2029_v44 = vshll.u32 %v2028_v54, 23  ;;  %v1358_v40 = vmul.f32 %v1357_v22, %v7272_v1 }
 0x50c   : > { %v1475_v63 = vsub.f32 0.25, %v1474_v56  ;;  %vm1930_vm12 = vcmp.eq.s32.totalorder %v1928_v41, 0  ;;  %vm1933_vm4 = vcmp.eq.s32.totalorder %v1928_v41, 2  ;;  %v1352_v31 = vmul.f32 %v6934_v4, %v6446_v48 }
 0x50d   : > { %v1591_v27 = vmul.f32 0.5, %v1590_v34  ;;  %v2030_v6 = vor.u32 4788187, %v2029_v44  ;;  %v2033_v30 = vcvt.s32.f32 %v2026_v51  ;;  %v1707_v53 = vmul.f32 %v6977_v55, %v6977_v55 }
 0x50e   : > { %vm1809_vm9 = vweird.f32 %v7263_v16  ;;  %v1819_v19 = vsel %vm1812_vm0, %v1815_v15, %v1818_v13  ;;  %vm1929_vm10 = vcmp.lt.s32.totalorder %v1928_v41, 2  ;;  %v1932_v2 = vsel %vm1930_vm12, %v4434_v39, %v1931_v14 }
 0x50f   : > { %v1935_v9 = vsel %vm1933_vm4, %v1934_v49, %v4436_v36  ;;  %v2031_v59 = vand.u32 2147483647, %v2030_v6  ;;  %v2037_v25 = vsub.s32 4, %v6918_v47  ;;  %v1243_v7 = vmul.f32 %v1242_v32, %v7271_v52 }
 0x510   : > { %v1360_v17 = vsub.f32 %v1358_v40, %v1359_v45  ;;  %v1476_v4 = vmul.f32 %v1475_v63, %v7272_v1  ;;  %v1477_v11 = vmul.f32 %v6950_v29, %v6130_v61  ;;  %v1353_v58 = vmul.f32 %v1352_v31, %v7273_v0 }
 0x511   : > { %v1592_v10 = vsub.f32 0.25, %v1591_v27  ;;  %v1820_v16 = vsel %vm1809_vm9, nan, %v1819_v19  ;;  %v2034_v26 = vmul.f32 %v2033_v30, %v2031_v59  ;;  %v1470_v20 = vmul.f32 %v6950_v29, %v6446_v48 }
 0x512   : > { %vm1926_vm11 = vweird.f32 %v6520_v21  ;;  %v1936_v46 = vsel %vm1929_vm10, %v1932_v2, %v1935_v9  ;;  %vm1953_vm13 = vcmp.lt.s32.totalorder %v6676_v35, 0  ;;  %v1708_v23 = vmul.f32 0.5, %v1707_v53 }
 0x513   : > { %vm7000_vm1 = vcmp.le.f32.partialorder %v1951_v57, 0.7853982  ;;  %v2035_v50 = vxor.u32 2147483648, %v2034_v26  ;;  %v2038_v18 = vsel %vm1953_vm13, %v2037_v25, %v6918_v47  ;;  %v1244_v33 = vadd.f32 %v1243_v7, %v6732_v43  ;;  %v3401_v25 = vpop.permute.xlu0 %3400 }
 0x514   : > { %v1361_v39 = vmul.f32 %v1360_v17, %v7273_v0  ;;  %v1478_v29 = vsub.f32 %v1476_v4, %v1477_v11  ;;  %v1824_v3 = vmul.f32 %v1820_v16, %v1820_v16  ;;  %v1593_v21 = vmul.f32 %v1592_v10, %v7272_v1 }
 0x515   : > { %v1594_v5 = vmul.f32 %v6965_v38, %v6130_v61  ;;  %v1937_v8 = vsel %vm1926_vm11, nan, %v1936_v46  ;;  %v2036_v37 = vsel %vm1953_vm13, %v2035_v50, %v2034_v26  ;;  %v1354_v57 = vadd.f32 %v1353_v58, %v6955_v12  ;;  %v7276_v26 = vld [vmem:[#allocation35_spill] sm:$0xff] }
 0x516   : > { %v2039_v36 = vsel %vm7000_vm1, %v6676_v35, %v2036_v37  ;;  %v2040_v43 = vsel %vm7000_vm1, 0, %v2038_v18  ;;  %v1471_v47 = vmul.f32 %v1470_v20, %v6872_v24  ;;  %v1587_v32 = vmul.f32 %v6965_v38, %v6446_v48 }
 0x517   : > { %v1709_v22 = vsub.f32 0.25, %v1708_v23  ;;  %4437 = vcosq.f32 %v2039_v36  ;;  %v1825_v56 = vmul.f32 0.5, %v1824_v3  ;;  %v1941_v41 = vmul.f32 %v1937_v8, %v1937_v8 }
 0x518   : > { %4439 = vsinq.f32 %v2039_v36  ;;  %v1362_v45 = vadd.f32 %v1361_v39, %v1244_v33  ;;  %v1479_v12 = vmul.f32 %v1478_v29, %v6872_v24  ;;  %v1595_v34 = vsub.f32 %v1593_v21, %v1594_v5 }
 0x519   : > { %v2044_v60 = vadd.s32 3, %v2040_v43  ;;  %v1710_v54 = vmul.f32 %v1709_v22, %v7272_v1  ;;  %v1711_v15 = vmul.f32 %v6977_v55, %v6130_v61  ;;  %v4852_v13 = vmov 1966171168  }
 0x51a   : > { %v3493_v14 = vunpack.c.l.s4 %v4852_v13  ;;  %v1472_v49 = vadd.f32 %v1471_v47, %v1354_v57  ;;  %v1588_v38 = vmul.f32 %v1587_v32, %v6872_v24  ;;  %v1826_v51 = vsub.f32 0.25, %v1825_v56 }
 0x51b   : > { %v1942_v44 = vmul.f32 0.5, %v1941_v41  ;;  %v1480_v40 = vadd.f32 %v1479_v12, %v1362_v45  ;;  %v1596_v63 = vmul.f32 %v1595_v34, %v6872_v24  ;;  %v1704_v31 = vmul.f32 %v6977_v55, %v6446_v48  ;;  %v7277_v12 = vld [vmem:[#allocation41_spill] sm:$0xff] }
 0x51c   : > { %v2045_v27 = vand.u32 3, %v2044_v60  ;;  %v1712_v6 = vsub.f32 %v1710_v54, %v1711_v15  ;;  %v3494_v30 = vunpack.c.0.s8 %v3493_v14  ;;  %v1589_v53 = vadd.f32 %v1588_v38, %v1472_v49  ;;  %v4447_v14 = vld [vmem:[%s5281_s20] sm:$0x1] }
 0x51d   : > { %v1827_v19 = vmul.f32 %v1826_v51, %v7272_v1  ;;  %v1828_v2 = vmul.f32 %v1820_v16, %v6130_v61  ;;  %v1943_v9 = vsub.f32 0.25, %v1942_v44  ;;  %v1597_v7 = vadd.f32 %v1596_v63, %v1480_v40  ;;  %v4448_v51 = vld [vmem:[%s5267_s13 + $0x1] sm:$0x1] }
 0x51e   : > { %v1705_v17 = vmul.f32 %v1704_v31, %v7273_v0  ;;  %vm2043_vm14 = vweird.f32 %v6676_v35  ;;  %vm2050_vm15 = vcmp.eq.s32.totalorder %v2045_v27, 2  ;;  %v1821_v55 = vmul.f32 %v1820_v16, %v6446_v48 }
 0x51f   : > { %vm2047_vm3 = vcmp.eq.s32.totalorder %v2045_v27, 0  ;;  %v3481_v11 = vadd.f32 %v6746_v42, %v3401_v25  ;;  %v1713_v58 = vmul.f32 %v1712_v6, %v7273_v0  ;;  %vm2046_vm5 = vcmp.lt.s32.totalorder %v2045_v27, 2 }
 0x520   : > { %v3497_v20 = vsub.s32 %v3494_v30, %v7276_v26  ;;  %v1829_v46 = vsub.f32 %v1827_v19, %v1828_v2  ;;  %v1944_v23 = vmul.f32 %v1943_v9, %v7272_v1  ;;  %v1945_v28 = vmul.f32 %v1937_v8, %v6130_v61 }
 0x521   : > { %v4438_v59 = vpop.eup %4437  ;;  %v1706_v33 = vadd.f32 %v1705_v17, %v1589_v53  ;;  %v1822_v16 = vmul.f32 %v1821_v55, %v7271_v52  ;;  %v1938_v39 = vmul.f32 %v1937_v8, %v6446_v48  ;;  %v1714_v3 = vadd.f32 %v1713_v58, %v1597_v7 }
 0x522   : > { %v4440_v24 = vpop.eup %4439  ;;  %v2051_v4 = vxor.u32 2147483648, %v4438_v59  ;;  %v3498_v0 = vrot.slane %v3481_v11, %v3497_v20  ;;  %v1830_v21 = vmul.f32 %v1829_v46, %v7271_v52  ;;  %v1946_v5 = vsub.f32 %v1944_v23, %v1945_v28 }
 0x523   : > { %v2048_v10 = vxor.u32 2147483648, %v4440_v24  ;;  %v875_v57 = vmul.f32 0.25, %v7272_v1  ;;  %v1823_v36 = vadd.f32 %v1822_v16, %v1706_v33  ;;  %v1939_v43 = vmul.f32 %v1938_v39, %v6484_v62 }
 0x524   : > { %v2052_v50 = vsel %vm2050_vm15, %v2051_v4, %v4440_v24  ;;  %v3499_v8 = vcombine.high %v3498_v0, %v3498_v0  ;;  %v1831_v22 = vadd.f32 %v1830_v21, %v1714_v3  ;;  %v1947_v35 = vmul.f32 %v1946_v5, %v6484_v62 }
 0x525   : > { %v2049_v18 = vsel %vm2047_vm3, %v4438_v59, %v2048_v10  ;;  %v876_v52 = vsub.f32 %v6446_v48, %v875_v57  ;;  %v1940_v45 = vadd.f32 %v1939_v43, %v1823_v36  ;;  %v3484_v49 = vmul.f32 %v4447_v14, %v4447_v14 }
 0x526   : > { %v2053_v29 = vsel %vm2046_vm5, %v2049_v18, %v2052_v50  ;;  %v1948_v54 = vadd.f32 %v1947_v35, %v1831_v22  ;;  %v3506_v13 = vrot.slane %v3499_v8, %v3497_v20  ;;  %v3485_v44 = vmul.f32 %v4448_v51, %v4447_v14 }
 0x527   : > { %v2054_v42 = vsel %vm2043_vm14, nan, %v2053_v29  ;;  %v3487_v31 = vmul.f32 %v3484_v49, %v3481_v11  ;;  %v7279_v30 = vsub.s32 0, %v7276_v26 }
 0x528   : > { %v2058_v37 = vmul.f32 %v2054_v42, %v2054_v42  ;;  %v2055_v47 = vmul.f32 %v2054_v42, %v6446_v48  ;;  %v2062_v41 = vmul.f32 %v2054_v42, %v6130_v61  ;;  %v3489_v61 = vmul.f32 %v4447_v14, %v876_v52 }
 0x529   : > { %v3508_v40 = vmul.f32 %v3506_v13, %v3484_v49 }
 0x52a   : > { %v2059_v32 = vmul.f32 0.5, %v2058_v37  ;;  %v2056_v34 = vmul.f32 %v2055_v47, %v7277_v12 }
 0x52c   : > { %v2060_v56 = vsub.f32 0.25, %v2059_v32  ;;  %v2057_v38 = vadd.f32 %v2056_v34, %v1940_v45 }
 0x52e   : > { %v2061_v60 = vmul.f32 %v2060_v56, %v7272_v1  ;;  %v3486_v63 = vadd.f32 %v3485_v44, %v2057_v38 }
 0x530   : > { %v2063_v15 = vsub.f32 %v2061_v60, %v2062_v41  ;;  %v3488_v6 = vadd.f32 %v3487_v31, %v3486_v63 }
 0x532   : > { %v2064_v62 = vmul.f32 %v2063_v15, %v7277_v12 }
 0x534   : > { %v2065_v48 = vadd.f32 %v2064_v62, %v1948_v54 }
 0x536   : > { %v3490_v1 = vadd.f32 %v3489_v61, %v2065_v48 }
 0x538   : > { %v3509_v27 = vadd.f32 %v3508_v40, %v3490_v1 }
 0x53a   : > { %v3514_v53 = vrot.slane %v3509_v27, %v7279_v30 }
 0x53c   : > { %v3516_v19 = vsel %vm2291_vm2, %v3488_v6, %v3514_v53 }
 0x53d   : > { %3517 = vst [vmem:[%s556_s4] sm:$0x3] %v3516_v19 }
 0x53e   : > { %4751 = shalt.err (!%p4748_p11)
}
 0x53f   : > { %s4752_s7 = scalar_lea.hbm %s7061_s26, 32  ;;  %s4756_s13 = scalar_lea.hbm %s7280_s27, 64 }
 0x540   : > { %p4753_p3 = scmp.ne.s32.totalorder %s7061_s26, %s4752_s7  ;;  %p4757_p1 = scmp.lt.u32.totalorder %s7061_s26, %s7280_s27 }
 0x541   : > { %p4758_p4 = scmp.lt.u32.totalorder %s4756_s13, %s4752_s7  ;;  %p4760_p8 = scmp.lt.u32.totalorder %s4752_s7, %s7061_s26 }
 0x542   : > { %p4754_p6 = pnand %p4753_p3, %p7281_p10 }
 0x543   : > { %p4759_p7 = por %p4758_p4, %p4757_p1 }
 0x544   : > { %p4755_p2 = pneg %p4754_p6 }
 0x545   : > { %p4761_p5 = por %p4760_p8, %p4759_p7 }
 0x547   : > { %p4762_p9 = pnand %p4761_p5, %p4755_p2 }
 0x549   : > { %4765 = shalt.err (!%p4762_p9)
}
 0x54a   : > { %4152 = dma.vmem_to_hbm [thread:$0]  (%p7281_p10), %s7063_s23, 32, %s7061_s26, %s3519_s19  }
 0x54b PF: > { %s7282_s28 = sld [smem:[#allocation28_spill]]  ;;  %s7283_s10 = sld [smem:[#allocation34_spill]] }
 0x54c   : > { %p7285_p0 = scmp.ge.s32.totalorder %s4828_s16, 2 }
 0x551   : > { %s3544_s15 = sand.u32 1, %s7282_s28   ;;  %p7284_p13 = scmp.ne.s32.totalorder %s7283_s10, 0 }
 0x552   : > { %s3545_s20 = scalar_lea.sflag [#allocation4], %s3544_s15 }
 0x553   : > { %p4187_p12 = pnand %p7285_p0, %p7284_p13 }
 0x555   : > { %4811 = dma.done.wait (!%p4187_p12), %s3545_s20, 32  }
 0x556   : > { %4813 = vsyncadd (!%p4187_p12), %s3545_s20, 4294967264  ;;  %s7286_s16 = sld [smem:[#allocation31_spill]]  ;;  %s7287_s12 = sld [smem:[#allocation29_spill]] }
 0x557   : > { %s7288_s15 = sld [smem:[#allocation32_spill]]  ;;  %s7289_s13 = smov %s4820_s14 }
 0x55c   : > { %p32_p11 = scmp.ge.s32.totalorder %s7286_s16, 4   ;;  %s7290_s14 = smov %s7287_s12 }
 0x55e   :  { %34 = sbr.rel (!%p32_p11) target bundleno = 18 (0x12), region = 166 }
 0x565   :  { %3550 = vsyncpa [#allocation3], 1 }
 0x566   :  { %3552 = vsyncpa [#allocation3 + $0x1], 1 }
 0x567   :  { %3553 = vsyncpa [#allocation6], 1 }
 0x568   :  { %3555 = vsyncpa [#allocation6 + $0x1], 1 }
 0x569   :  { %3556 = vsyncpa [#allocation9], 1 }
 0x56a   :  { %3558 = vsyncpa [#allocation9 + $0x1], 1 }
 0x56b   :  { %3559 = vsyncpa [#allocation12], 1 }
 0x56c   :  { %3560 = vsyncpa [#allocation15], 1 }
 0x56d   :  { %3561 = vsyncpa [#allocation18], 1 }
 0x56e   :  { %3562 = vsyncpa [#allocation4], 1 }
 0x56f   :  { %3564 = vsyncpa [#allocation4 + $0x1], 1 }

</bundles_post_ra>
